<compile_context>
chip_gen: v5e
topology: v5e:2x2
jax: 0.10.0
libtpu: 0.0.40
codegen_flags: <defaults>
</compile_context>

<pallas_src>
import functools

import jax
import jax.numpy as jnp
import numpy as np
from jax.experimental import pallas as pl
from jax.experimental.pallas import tpu as pltpu

EPS = 1e-5
LANE = 128
NEG_INF = -1e30

# (cin, cout, k, stride, pad) conv backbone, then GAP -> fc1(512,256)+BN+ReLU
# -> fc2(256, n_classes) -> log_softmax.
CONV_CFG = [
    (5, 32, 3, 2, 1),
    (32, 64, 3, 2, 1),
    (64, 128, 3, 2, 1),
    (128, 256, 1, 1, 0),
    (256, 512, 1, 1, 0),
]


def _round_up(x, m):
    return ((x + m - 1) // m) * m


# ------------------------- fused forward Pallas kernel ----------------------

def _fused_forward_kernel(*refs, plan):
    """One batch element end-to-end.  refs = (x_ref, *param_refs, o_ref)."""
    x_ref, o_ref = refs[0], refs[-1]
    params = refs[1:-1]

    h = x_ref[0]                               # (H*W, 128) bf16, channel-padded
    idx = 0
    for op in plan:
        if op == "conv3x3":
            s_ref, w_ref, b_ref = params[idx:idx + 3]
            idx += 3
            # In-kernel im2col: each tap is a 0/1 gather matmul on the MXU
            # (out-of-bounds taps are all-zero rows == zero padding), taps are
            # concatenated along lanes (Cin padded to 128 -> lane-dense).
            taps = s_ref.shape[0]
            pieces = [
                jnp.dot(s_ref[t], h, preferred_element_type=jnp.float32)
                .astype(jnp.bfloat16)
                for t in range(taps)
            ]
            cols = jnp.concatenate(pieces, axis=-1)        # (P_out, taps*Cin)
            y = jnp.dot(cols, w_ref[...], preferred_element_type=jnp.float32)
            h = jnp.maximum(y + b_ref[...], 0.0).astype(jnp.bfloat16)
        elif op == "matmul_relu":                          # 1x1 conv or fc1
            w_ref, b_ref = params[idx:idx + 2]
            idx += 2
            y = jnp.dot(h, w_ref[...], preferred_element_type=jnp.float32)
            h = jnp.maximum(y + b_ref[...], 0.0).astype(jnp.bfloat16)
        elif op == "mean_pool":
            # Global average pool over spatial rows, fused (stays in VMEM).
            h = jnp.mean(h.astype(jnp.float32), axis=0,
                         keepdims=True).astype(jnp.bfloat16)
        elif op == "fc_logsoftmax":
            w_ref, b_ref = params[idx:idx + 2]
            idx += 2
            logits = jnp.dot(h, w_ref[...],
                             preferred_element_type=jnp.float32) + b_ref[...]
            # Padded class columns carry bias=-1e30 -> exp underflows to 0.
            m = jnp.max(logits, axis=-1, keepdims=True)
            z = logits - m
            lse = jnp.log(jnp.sum(jnp.exp(z), axis=-1, keepdims=True))
            o_ref[0] = z - lse
        else:  # pragma: no cover
            raise ValueError(op)


def resnet_forward_pallas(folded, x_nchw):
    """Classification-mode forward (log_softmax). Dropout = identity (eval)."""
    n, c_in, sp_h, sp_w = x_nchw.shape
    params = folded["params"]
    plan = folded["plan"]
    n_cls_pad = folded["n_cls_pad"]
    c_pad = _round_up(c_in, LANE)

    # NCHW -> (N, H*W, C) with channels zero-padded to a lane-dense 128.
    x = jnp.transpose(x_nchw, (0, 2, 3, 1)).astype(jnp.float32)
    x = x.reshape(n, sp_h * sp_w, c_in)
    x = jnp.pad(x, ((0, 0), (0, 0), (0, c_pad - c_in))).astype(jnp.bfloat16)

    def resident_spec(arr):
        nd = arr.ndim
        return pl.BlockSpec(arr.shape, lambda b, _nd=nd: (0,) * _nd)

    in_specs = [pl.BlockSpec((1, sp_h * sp_w, c_pad), lambda b: (b, 0, 0))]
    in_specs += [resident_spec(p) for p in params]

    out = pl.pallas_call(
        functools.partial(_fused_forward_kernel, plan=plan),
        out_shape=jax.ShapeDtypeStruct((n, 1, n_cls_pad), jnp.float32),
        grid=(n,),
        in_specs=in_specs,
        out_specs=pl.BlockSpec((1, 1, n_cls_pad), lambda b: (b, 0, 0)),
        compiler_params=pltpu.CompilerParams(
            dimension_semantics=("parallel",)),
    )(x, *params)
    return out[:, 0, :folded["n_classes"]]


# ------------------------------ parameters ---------------------------------

def _gather_matrices(h_in, w_in, k, s, p):
    """0/1 selection matrices: S[t] @ x_flat gathers the tap-t input row for
    every output position (out-of-bounds taps -> all-zero row == zero pad)."""
    h_out = (h_in + 2 * p - k) // s + 1
    w_out = (w_in + 2 * p - k) // s + 1
    S = np.zeros((k * k, h_out * w_out, h_in * w_in), np.float32)
    for i in range(k):
        for j in range(k):
            t = i * k + j
            for ho in range(h_out):
                hi = s * ho + i - p
                if not 0 <= hi < h_in:
                    continue
                for wo in range(w_out):
                    wi = s * wo + j - p
                    if 0 <= wi < w_in:
                        S[t, ho * w_out + wo, hi * w_in + wi] = 1.0
    return jnp.asarray(S, jnp.bfloat16), h_out, w_out


def init_params(key, n_classes, in_hw=(16, 16)):
    """Synthetic parameters in PyTorch layouts (raw) + kernel-ready folded form."""
    raw = {"conv": []}
    params = []
    plan = []

    def bn_init(key, c):
        k1, k2, k3, k4 = jax.random.split(key, 4)
        gamma = 1.0 + 0.1 * jax.random.normal(k1, (c,), jnp.float32)
        beta = 0.1 * jax.random.normal(k2, (c,), jnp.float32)
        mean = 0.1 * jax.random.normal(k3, (c,), jnp.float32)
        var = 1.0 + 0.1 * jax.random.uniform(k4, (c,), jnp.float32)
        return gamma, beta, mean, var

    sp_h, sp_w = in_hw
    for (cin, cout, k, s, p) in CONV_CFG:
        key, kw_, kb_, kbn = jax.random.split(key, 4)
        w = jax.random.normal(kw_, (cout, cin, k, k), jnp.float32) / np.sqrt(cin * k * k)
        b = 0.05 * jax.random.normal(kb_, (cout,), jnp.float32)
        gamma, beta, mean, var = bn_init(kbn, cout)
        raw["conv"].append((w, b, gamma, beta, mean, var, s, p))

        # Fold BatchNorm into the conv weights (scale) and bias, so the kernel
        # epilogue is only bias + ReLU.  Zero-pad channels to 128 multiples
        # (padded outputs stay exactly 0 through ReLU).
        scale = gamma / jnp.sqrt(var + EPS)
        bias = beta + scale * (b - mean)
        cin_p, cout_p = _round_up(cin, LANE), _round_up(cout, LANE)
        w_hwio = jnp.transpose(w, (2, 3, 1, 0)) * scale[None, None, None, :]
        w_hwio = jnp.pad(w_hwio, ((0, 0), (0, 0),
                                  (0, cin_p - cin), (0, cout_p - cout)))
        w_mat = w_hwio.reshape(k * k * cin_p, cout_p).astype(jnp.bfloat16)
        bias_p = jnp.pad(bias, (0, cout_p - cout)).reshape(1, cout_p)
        bias_p = bias_p.astype(jnp.float32)

        if k == 1:
            plan.append("matmul_relu")
            params += [w_mat, bias_p]
        else:
            S, sp_h, sp_w = _gather_matrices(sp_h, sp_w, k, s, p)
            plan.append("conv3x3")
            params += [S, w_mat, bias_p]

    plan.append("mean_pool")

    # fc1: Linear(512, 256) + BatchNorm1d(256) + ReLU (BN folded into weights).
    key, kw_, kb_, kbn = jax.random.split(key, 4)
    fc1_w = jax.random.normal(kw_, (256, 512), jnp.float32) / np.sqrt(512)
    fc1_b = 0.05 * jax.random.normal(kb_, (256,), jnp.float32)
    g1, be1, mu1, v1 = bn_init(kbn, 256)
    raw["fc1"] = (fc1_w, fc1_b, g1, be1, mu1, v1)
    s1 = g1 / jnp.sqrt(v1 + EPS)
    plan.append("matmul_relu")
    params += [(fc1_w.T * s1[None, :]).astype(jnp.bfloat16),
               (be1 + s1 * (fc1_b - mu1)).reshape(1, 256).astype(jnp.float32)]

    # fc2: Linear(256, n_classes) -> log_softmax.  Classes are padded to a
    # lane-dense 128 with bias=-1e30 so padded columns vanish in the softmax.
    key, kw_, kb_ = jax.random.split(key, 3)
    fc2_w = jax.random.normal(kw_, (n_classes, 256), jnp.float32) / np.sqrt(256)
    fc2_b = 0.05 * jax.random.normal(kb_, (n_classes,), jnp.float32)
    raw["fc2"] = (fc2_w, fc2_b)
    n_cls_pad = _round_up(n_classes, LANE)
    fc2_w_p = jnp.pad(fc2_w.T, ((0, 0), (0, n_cls_pad - n_classes)))
    fc2_b_p = jnp.full((n_cls_pad,), NEG_INF, jnp.float32)
    fc2_b_p = fc2_b_p.at[:n_classes].set(fc2_b).reshape(1, n_cls_pad)
    plan.append("fc_logsoftmax")
    params += [fc2_w_p.astype(jnp.bfloat16), fc2_b_p]

    folded = {"plan": tuple(plan), "params": params,
              "n_classes": n_classes, "n_cls_pad": n_cls_pad}
    return raw, folded


# ------------------------------ pure-JAX reference --------------------------

def reference_forward(raw, x_nchw):
    """Pure-JAX f32 reference (mirrors the PyTorch eval-mode forward)."""
    h = x_nchw.astype(jnp.float32)
    for (w, b, g, be, mu, var, s, p) in raw["conv"]:
        h = jax.lax.conv_general_dilated(
            h, w, (s, s), [(p, p), (p, p)],
            dimension_numbers=("NCHW", "OIHW", "NCHW"))
        h = h + b[None, :, None, None]
        h = (g[None, :, None, None] * (h - mu[None, :, None, None])
             / jnp.sqrt(var[None, :, None, None] + EPS) + be[None, :, None, None])
        h = jnp.maximum(h, 0.0)
    pooled = jnp.mean(h.reshape(h.shape[0], h.shape[1], -1), axis=2)
    fc1_w, fc1_b, g1, be1, mu1, v1 = raw["fc1"]
    y = pooled @ fc1_w.T + fc1_b
    y = g1 * (y - mu1) / jnp.sqrt(v1 + EPS) + be1
    y = jnp.maximum(y, 0.0)
    fc2_w, fc2_b = raw["fc2"]
    logits = y @ fc2_w.T + fc2_b
    return jax.nn.log_softmax(logits, axis=-1)


if __name__ == "__main__":
    n_classes = 4
    key = jax.random.PRNGKey(0)
    key, kx = jax.random.split(key)
    x = jax.random.normal(kx, (2, 5, 16, 16), jnp.float32)  # NCHW, Cin=5

    raw, folded = init_params(key, n_classes, in_hw=(16, 16))
    out = resnet_forward_pallas(folded, x)
    out = jax.block_until_ready(out)
    assert out.shape == (2, n_classes)

    ref = jax.block_until_ready(reference_forward(raw, x))
    # bf16 matmuls (f32 accumulation) -> slightly looser tolerance than f32.
    np.testing.assert_allclose(np.asarray(out), np.asarray(ref),
                               atol=3e-2, rtol=5e-2)
    print("KERNEL_OK")
</pallas_src>

<mosaic_0001>
module attributes {stable_mosaic.version = 11 : i64} {
  func.func @_fused_forward_kernel(%arg0: i32, %arg1: memref<1x256x128xbf16, #tpu.memory_space<vmem>>, %arg2: memref<9x64x256xbf16, #tpu.memory_space<vmem>>, %arg3: memref<1152x128xbf16, #tpu.memory_space<vmem>>, %arg4: memref<1x128xf32, #tpu.memory_space<vmem>>, %arg5: memref<9x16x64xbf16, #tpu.memory_space<vmem>>, %arg6: memref<1152x128xbf16, #tpu.memory_space<vmem>>, %arg7: memref<1x128xf32, #tpu.memory_space<vmem>>, %arg8: memref<9x4x16xbf16, #tpu.memory_space<vmem>>, %arg9: memref<1152x128xbf16, #tpu.memory_space<vmem>>, %arg10: memref<1x128xf32, #tpu.memory_space<vmem>>, %arg11: memref<128x256xbf16, #tpu.memory_space<vmem>>, %arg12: memref<1x256xf32, #tpu.memory_space<vmem>>, %arg13: memref<256x512xbf16, #tpu.memory_space<vmem>>, %arg14: memref<1x512xf32, #tpu.memory_space<vmem>>, %arg15: memref<512x256xbf16, #tpu.memory_space<vmem>>, %arg16: memref<1x256xf32, #tpu.memory_space<vmem>>, %arg17: memref<256x128xbf16, #tpu.memory_space<vmem>>, %arg18: memref<1x128xf32, #tpu.memory_space<vmem>>, %arg19: memref<1x1x128xf32, #tpu.memory_space<vmem>>) attributes {dimension_semantics = [#tpu.dimension_semantics<parallel>], iteration_bounds = array<i64: 2>, scalar_prefetch = 0 : i64, scratch_operands = 0 : i64, tpu.core_type = #tpu.core_type<tc>, window_params = [{transform_indices = @transform_0, window_bounds = array<i64: 1, 256, 128>}, {pipeline_mode = #tpu.pipeline_mode<synchronous>, transform_indices = @transform_1, window_bounds = array<i64: 9, 64, 256>}, {pipeline_mode = #tpu.pipeline_mode<synchronous>, transform_indices = @transform_2, window_bounds = array<i64: 1152, 128>}, {pipeline_mode = #tpu.pipeline_mode<synchronous>, transform_indices = @transform_3, window_bounds = array<i64: 1, 128>}, {pipeline_mode = #tpu.pipeline_mode<synchronous>, transform_indices = @transform_4, window_bounds = array<i64: 9, 16, 64>}, {pipeline_mode = #tpu.pipeline_mode<synchronous>, transform_indices = @transform_5, window_bounds = array<i64: 1152, 128>}, {pipeline_mode = #tpu.pipeline_mode<synchronous>, transform_indices = @transform_6, window_bounds = array<i64: 1, 128>}, {pipeline_mode = #tpu.pipeline_mode<synchronous>, transform_indices = @transform_7, window_bounds = array<i64: 9, 4, 16>}, {pipeline_mode = #tpu.pipeline_mode<synchronous>, transform_indices = @transform_8, window_bounds = array<i64: 1152, 128>}, {pipeline_mode = #tpu.pipeline_mode<synchronous>, transform_indices = @transform_9, window_bounds = array<i64: 1, 128>}, {pipeline_mode = #tpu.pipeline_mode<synchronous>, transform_indices = @transform_10, window_bounds = array<i64: 128, 256>}, {pipeline_mode = #tpu.pipeline_mode<synchronous>, transform_indices = @transform_11, window_bounds = array<i64: 1, 256>}, {pipeline_mode = #tpu.pipeline_mode<synchronous>, transform_indices = @transform_12, window_bounds = array<i64: 256, 512>}, {pipeline_mode = #tpu.pipeline_mode<synchronous>, transform_indices = @transform_13, window_bounds = array<i64: 1, 512>}, {pipeline_mode = #tpu.pipeline_mode<synchronous>, transform_indices = @transform_14, window_bounds = array<i64: 512, 256>}, {pipeline_mode = #tpu.pipeline_mode<synchronous>, transform_indices = @transform_15, window_bounds = array<i64: 1, 256>}, {pipeline_mode = #tpu.pipeline_mode<synchronous>, transform_indices = @transform_16, window_bounds = array<i64: 256, 128>}, {pipeline_mode = #tpu.pipeline_mode<synchronous>, transform_indices = @transform_17, window_bounds = array<i64: 1, 128>}, {transform_indices = @transform_18, window_bounds = array<i64: 1, 1, 128>}]} {
    %c0 = arith.constant 0 : index
    %c0_0 = arith.constant 0 : index
    %c0_1 = arith.constant 0 : index
    %0 = vector.load %arg1[%c0, %c0_0, %c0_1] : memref<1x256x128xbf16, #tpu.memory_space<vmem>>, vector<1x256x128xbf16>
    %1 = vector.shape_cast %0 : vector<1x256x128xbf16> to vector<256x128xbf16>
    %c0_2 = arith.constant 0 : index
    %c0_3 = arith.constant 0 : index
    %c0_4 = arith.constant 0 : index
    %2 = vector.load %arg2[%c0_2, %c0_3, %c0_4] : memref<9x64x256xbf16, #tpu.memory_space<vmem>>, vector<1x64x256xbf16>
    %3 = vector.shape_cast %2 : vector<1x64x256xbf16> to vector<64x256xbf16>
    %cst = arith.constant dense<0.000000e+00> : vector<64x128xf32>
    %4 = tpu.matmul %3, %1, %cst {dimension_numbers = #tpu.dot_dimension_numbers<[1], [0], [0], [1], [0, 0, 1, 1], [], []>} : vector<64x256xbf16>, vector<256x128xbf16>, vector<64x128xf32> -> vector<64x128xf32>
    %5 = arith.truncf %4 : vector<64x128xf32> to vector<64x128xbf16>
    %c1 = arith.constant 1 : index
    %c0_5 = arith.constant 0 : index
    %c0_6 = arith.constant 0 : index
    %6 = vector.load %arg2[%c1, %c0_5, %c0_6] : memref<9x64x256xbf16, #tpu.memory_space<vmem>>, vector<1x64x256xbf16>
    %7 = vector.shape_cast %6 : vector<1x64x256xbf16> to vector<64x256xbf16>
    %cst_7 = arith.constant dense<0.000000e+00> : vector<64x128xf32>
    %8 = tpu.matmul %7, %1, %cst_7 {dimension_numbers = #tpu.dot_dimension_numbers<[1], [0], [0], [1], [0, 0, 1, 1], [], []>} : vector<64x256xbf16>, vector<256x128xbf16>, vector<64x128xf32> -> vector<64x128xf32>
    %9 = arith.truncf %8 : vector<64x128xf32> to vector<64x128xbf16>
    %c2 = arith.constant 2 : index
    %c0_8 = arith.constant 0 : index
    %c0_9 = arith.constant 0 : index
    %10 = vector.load %arg2[%c2, %c0_8, %c0_9] : memref<9x64x256xbf16, #tpu.memory_space<vmem>>, vector<1x64x256xbf16>
    %11 = vector.shape_cast %10 : vector<1x64x256xbf16> to vector<64x256xbf16>
    %cst_10 = arith.constant dense<0.000000e+00> : vector<64x128xf32>
    %12 = tpu.matmul %11, %1, %cst_10 {dimension_numbers = #tpu.dot_dimension_numbers<[1], [0], [0], [1], [0, 0, 1, 1], [], []>} : vector<64x256xbf16>, vector<256x128xbf16>, vector<64x128xf32> -> vector<64x128xf32>
    %13 = arith.truncf %12 : vector<64x128xf32> to vector<64x128xbf16>
    %c3 = arith.constant 3 : index
    %c0_11 = arith.constant 0 : index
    %c0_12 = arith.constant 0 : index
    %14 = vector.load %arg2[%c3, %c0_11, %c0_12] : memref<9x64x256xbf16, #tpu.memory_space<vmem>>, vector<1x64x256xbf16>
    %15 = vector.shape_cast %14 : vector<1x64x256xbf16> to vector<64x256xbf16>
    %cst_13 = arith.constant dense<0.000000e+00> : vector<64x128xf32>
    %16 = tpu.matmul %15, %1, %cst_13 {dimension_numbers = #tpu.dot_dimension_numbers<[1], [0], [0], [1], [0, 0, 1, 1], [], []>} : vector<64x256xbf16>, vector<256x128xbf16>, vector<64x128xf32> -> vector<64x128xf32>
    %17 = arith.truncf %16 : vector<64x128xf32> to vector<64x128xbf16>
    %c4 = arith.constant 4 : index
    %c0_14 = arith.constant 0 : index
    %c0_15 = arith.constant 0 : index
    %18 = vector.load %arg2[%c4, %c0_14, %c0_15] : memref<9x64x256xbf16, #tpu.memory_space<vmem>>, vector<1x64x256xbf16>
    %19 = vector.shape_cast %18 : vector<1x64x256xbf16> to vector<64x256xbf16>
    %cst_16 = arith.constant dense<0.000000e+00> : vector<64x128xf32>
    %20 = tpu.matmul %19, %1, %cst_16 {dimension_numbers = #tpu.dot_dimension_numbers<[1], [0], [0], [1], [0, 0, 1, 1], [], []>} : vector<64x256xbf16>, vector<256x128xbf16>, vector<64x128xf32> -> vector<64x128xf32>
    %21 = arith.truncf %20 : vector<64x128xf32> to vector<64x128xbf16>
    %c5 = arith.constant 5 : index
    %c0_17 = arith.constant 0 : index
    %c0_18 = arith.constant 0 : index
    %22 = vector.load %arg2[%c5, %c0_17, %c0_18] : memref<9x64x256xbf16, #tpu.memory_space<vmem>>, vector<1x64x256xbf16>
    %23 = vector.shape_cast %22 : vector<1x64x256xbf16> to vector<64x256xbf16>
    %cst_19 = arith.constant dense<0.000000e+00> : vector<64x128xf32>
    %24 = tpu.matmul %23, %1, %cst_19 {dimension_numbers = #tpu.dot_dimension_numbers<[1], [0], [0], [1], [0, 0, 1, 1], [], []>} : vector<64x256xbf16>, vector<256x128xbf16>, vector<64x128xf32> -> vector<64x128xf32>
    %25 = arith.truncf %24 : vector<64x128xf32> to vector<64x128xbf16>
    %c6 = arith.constant 6 : index
    %c0_20 = arith.constant 0 : index
    %c0_21 = arith.constant 0 : index
    %26 = vector.load %arg2[%c6, %c0_20, %c0_21] : memref<9x64x256xbf16, #tpu.memory_space<vmem>>, vector<1x64x256xbf16>
    %27 = vector.shape_cast %26 : vector<1x64x256xbf16> to vector<64x256xbf16>
    %cst_22 = arith.constant dense<0.000000e+00> : vector<64x128xf32>
    %28 = tpu.matmul %27, %1, %cst_22 {dimension_numbers = #tpu.dot_dimension_numbers<[1], [0], [0], [1], [0, 0, 1, 1], [], []>} : vector<64x256xbf16>, vector<256x128xbf16>, vector<64x128xf32> -> vector<64x128xf32>
    %29 = arith.truncf %28 : vector<64x128xf32> to vector<64x128xbf16>
    %c7 = arith.constant 7 : index
    %c0_23 = arith.constant 0 : index
    %c0_24 = arith.constant 0 : index
    %30 = vector.load %arg2[%c7, %c0_23, %c0_24] : memref<9x64x256xbf16, #tpu.memory_space<vmem>>, vector<1x64x256xbf16>
    %31 = vector.shape_cast %30 : vector<1x64x256xbf16> to vector<64x256xbf16>
    %cst_25 = arith.constant dense<0.000000e+00> : vector<64x128xf32>
    %32 = tpu.matmul %31, %1, %cst_25 {dimension_numbers = #tpu.dot_dimension_numbers<[1], [0], [0], [1], [0, 0, 1, 1], [], []>} : vector<64x256xbf16>, vector<256x128xbf16>, vector<64x128xf32> -> vector<64x128xf32>
    %33 = arith.truncf %32 : vector<64x128xf32> to vector<64x128xbf16>
    %c8 = arith.constant 8 : index
    %c0_26 = arith.constant 0 : index
    %c0_27 = arith.constant 0 : index
    %34 = vector.load %arg2[%c8, %c0_26, %c0_27] : memref<9x64x256xbf16, #tpu.memory_space<vmem>>, vector<1x64x256xbf16>
    %35 = vector.shape_cast %34 : vector<1x64x256xbf16> to vector<64x256xbf16>
    %cst_28 = arith.constant dense<0.000000e+00> : vector<64x128xf32>
    %36 = tpu.matmul %35, %1, %cst_28 {dimension_numbers = #tpu.dot_dimension_numbers<[1], [0], [0], [1], [0, 0, 1, 1], [], []>} : vector<64x256xbf16>, vector<256x128xbf16>, vector<64x128xf32> -> vector<64x128xf32>
    %37 = arith.truncf %36 : vector<64x128xf32> to vector<64x128xbf16>
    %38 = tpu.concatenate %5, %9, %13, %17, %21, %25, %29, %33, %37 in 1 : vector<64x128xbf16>, vector<64x128xbf16>, vector<64x128xbf16>, vector<64x128xbf16>, vector<64x128xbf16>, vector<64x128xbf16>, vector<64x128xbf16>, vector<64x128xbf16>, vector<64x128xbf16> -> vector<64x1152xbf16>
    %c0_29 = arith.constant 0 : index
    %c0_30 = arith.constant 0 : index
    %39 = vector.load %arg3[%c0_29, %c0_30] : memref<1152x128xbf16, #tpu.memory_space<vmem>>, vector<1152x128xbf16>
    %cst_31 = arith.constant dense<0.000000e+00> : vector<64x128xf32>
    %40 = tpu.matmul %38, %39, %cst_31 {dimension_numbers = #tpu.dot_dimension_numbers<[1], [0], [0], [1], [0, 0, 1, 1], [], []>} : vector<64x1152xbf16>, vector<1152x128xbf16>, vector<64x128xf32> -> vector<64x128xf32>
    %c0_32 = arith.constant 0 : index
    %c0_33 = arith.constant 0 : index
    %41 = vector.load %arg4[%c0_32, %c0_33] : memref<1x128xf32, #tpu.memory_space<vmem>>, vector<1x128xf32>
    %42 = vector.broadcast %41 : vector<1x128xf32> to vector<64x128xf32>
    %43 = arith.addf %40, %42 : vector<64x128xf32>
    %cst_34 = arith.constant 0.000000e+00 : f32
    %44 = vector.broadcast %cst_34 : f32 to vector<64x128xf32>
    %45 = arith.maximumf %43, %44 : vector<64x128xf32>
    %46 = arith.truncf %45 : vector<64x128xf32> to vector<64x128xbf16>
    %c0_35 = arith.constant 0 : index
    %c0_36 = arith.constant 0 : index
    %c0_37 = arith.constant 0 : index
    %47 = vector.load %arg5[%c0_35, %c0_36, %c0_37] : memref<9x16x64xbf16, #tpu.memory_space<vmem>>, vector<1x16x64xbf16>
    %48 = vector.shape_cast %47 : vector<1x16x64xbf16> to vector<16x64xbf16>
    %cst_38 = arith.constant dense<0.000000e+00> : vector<16x128xf32>
    %49 = tpu.matmul %48, %46, %cst_38 {dimension_numbers = #tpu.dot_dimension_numbers<[1], [0], [0], [1], [0, 0, 1, 1], [], []>} : vector<16x64xbf16>, vector<64x128xbf16>, vector<16x128xf32> -> vector<16x128xf32>
    %50 = arith.truncf %49 : vector<16x128xf32> to vector<16x128xbf16>
    %c1_39 = arith.constant 1 : index
    %c0_40 = arith.constant 0 : index
    %c0_41 = arith.constant 0 : index
    %51 = vector.load %arg5[%c1_39, %c0_40, %c0_41] : memref<9x16x64xbf16, #tpu.memory_space<vmem>>, vector<1x16x64xbf16>
    %52 = vector.shape_cast %51 : vector<1x16x64xbf16> to vector<16x64xbf16>
    %cst_42 = arith.constant dense<0.000000e+00> : vector<16x128xf32>
    %53 = tpu.matmul %52, %46, %cst_42 {dimension_numbers = #tpu.dot_dimension_numbers<[1], [0], [0], [1], [0, 0, 1, 1], [], []>} : vector<16x64xbf16>, vector<64x128xbf16>, vector<16x128xf32> -> vector<16x128xf32>
    %54 = arith.truncf %53 : vector<16x128xf32> to vector<16x128xbf16>
    %c2_43 = arith.constant 2 : index
    %c0_44 = arith.constant 0 : index
    %c0_45 = arith.constant 0 : index
    %55 = vector.load %arg5[%c2_43, %c0_44, %c0_45] : memref<9x16x64xbf16, #tpu.memory_space<vmem>>, vector<1x16x64xbf16>
    %56 = vector.shape_cast %55 : vector<1x16x64xbf16> to vector<16x64xbf16>
    %cst_46 = arith.constant dense<0.000000e+00> : vector<16x128xf32>
    %57 = tpu.matmul %56, %46, %cst_46 {dimension_numbers = #tpu.dot_dimension_numbers<[1], [0], [0], [1], [0, 0, 1, 1], [], []>} : vector<16x64xbf16>, vector<64x128xbf16>, vector<16x128xf32> -> vector<16x128xf32>
    %58 = arith.truncf %57 : vector<16x128xf32> to vector<16x128xbf16>
    %c3_47 = arith.constant 3 : index
    %c0_48 = arith.constant 0 : index
    %c0_49 = arith.constant 0 : index
    %59 = vector.load %arg5[%c3_47, %c0_48, %c0_49] : memref<9x16x64xbf16, #tpu.memory_space<vmem>>, vector<1x16x64xbf16>
    %60 = vector.shape_cast %59 : vector<1x16x64xbf16> to vector<16x64xbf16>
    %cst_50 = arith.constant dense<0.000000e+00> : vector<16x128xf32>
    %61 = tpu.matmul %60, %46, %cst_50 {dimension_numbers = #tpu.dot_dimension_numbers<[1], [0], [0], [1], [0, 0, 1, 1], [], []>} : vector<16x64xbf16>, vector<64x128xbf16>, vector<16x128xf32> -> vector<16x128xf32>
    %62 = arith.truncf %61 : vector<16x128xf32> to vector<16x128xbf16>
    %c4_51 = arith.constant 4 : index
    %c0_52 = arith.constant 0 : index
    %c0_53 = arith.constant 0 : index
    %63 = vector.load %arg5[%c4_51, %c0_52, %c0_53] : memref<9x16x64xbf16, #tpu.memory_space<vmem>>, vector<1x16x64xbf16>
    %64 = vector.shape_cast %63 : vector<1x16x64xbf16> to vector<16x64xbf16>
    %cst_54 = arith.constant dense<0.000000e+00> : vector<16x128xf32>
    %65 = tpu.matmul %64, %46, %cst_54 {dimension_numbers = #tpu.dot_dimension_numbers<[1], [0], [0], [1], [0, 0, 1, 1], [], []>} : vector<16x64xbf16>, vector<64x128xbf16>, vector<16x128xf32> -> vector<16x128xf32>
    %66 = arith.truncf %65 : vector<16x128xf32> to vector<16x128xbf16>
    %c5_55 = arith.constant 5 : index
    %c0_56 = arith.constant 0 : index
    %c0_57 = arith.constant 0 : index
    %67 = vector.load %arg5[%c5_55, %c0_56, %c0_57] : memref<9x16x64xbf16, #tpu.memory_space<vmem>>, vector<1x16x64xbf16>
    %68 = vector.shape_cast %67 : vector<1x16x64xbf16> to vector<16x64xbf16>
    %cst_58 = arith.constant dense<0.000000e+00> : vector<16x128xf32>
    %69 = tpu.matmul %68, %46, %cst_58 {dimension_numbers = #tpu.dot_dimension_numbers<[1], [0], [0], [1], [0, 0, 1, 1], [], []>} : vector<16x64xbf16>, vector<64x128xbf16>, vector<16x128xf32> -> vector<16x128xf32>
    %70 = arith.truncf %69 : vector<16x128xf32> to vector<16x128xbf16>
    %c6_59 = arith.constant 6 : index
    %c0_60 = arith.constant 0 : index
    %c0_61 = arith.constant 0 : index
    %71 = vector.load %arg5[%c6_59, %c0_60, %c0_61] : memref<9x16x64xbf16, #tpu.memory_space<vmem>>, vector<1x16x64xbf16>
    %72 = vector.shape_cast %71 : vector<1x16x64xbf16> to vector<16x64xbf16>
    %cst_62 = arith.constant dense<0.000000e+00> : vector<16x128xf32>
    %73 = tpu.matmul %72, %46, %cst_62 {dimension_numbers = #tpu.dot_dimension_numbers<[1], [0], [0], [1], [0, 0, 1, 1], [], []>} : vector<16x64xbf16>, vector<64x128xbf16>, vector<16x128xf32> -> vector<16x128xf32>
    %74 = arith.truncf %73 : vector<16x128xf32> to vector<16x128xbf16>
    %c7_63 = arith.constant 7 : index
    %c0_64 = arith.constant 0 : index
    %c0_65 = arith.constant 0 : index
    %75 = vector.load %arg5[%c7_63, %c0_64, %c0_65] : memref<9x16x64xbf16, #tpu.memory_space<vmem>>, vector<1x16x64xbf16>
    %76 = vector.shape_cast %75 : vector<1x16x64xbf16> to vector<16x64xbf16>
    %cst_66 = arith.constant dense<0.000000e+00> : vector<16x128xf32>
    %77 = tpu.matmul %76, %46, %cst_66 {dimension_numbers = #tpu.dot_dimension_numbers<[1], [0], [0], [1], [0, 0, 1, 1], [], []>} : vector<16x64xbf16>, vector<64x128xbf16>, vector<16x128xf32> -> vector<16x128xf32>
    %78 = arith.truncf %77 : vector<16x128xf32> to vector<16x128xbf16>
    %c8_67 = arith.constant 8 : index
    %c0_68 = arith.constant 0 : index
    %c0_69 = arith.constant 0 : index
    %79 = vector.load %arg5[%c8_67, %c0_68, %c0_69] : memref<9x16x64xbf16, #tpu.memory_space<vmem>>, vector<1x16x64xbf16>
    %80 = vector.shape_cast %79 : vector<1x16x64xbf16> to vector<16x64xbf16>
    %cst_70 = arith.constant dense<0.000000e+00> : vector<16x128xf32>
    %81 = tpu.matmul %80, %46, %cst_70 {dimension_numbers = #tpu.dot_dimension_numbers<[1], [0], [0], [1], [0, 0, 1, 1], [], []>} : vector<16x64xbf16>, vector<64x128xbf16>, vector<16x128xf32> -> vector<16x128xf32>
    %82 = arith.truncf %81 : vector<16x128xf32> to vector<16x128xbf16>
    %83 = tpu.concatenate %50, %54, %58, %62, %66, %70, %74, %78, %82 in 1 : vector<16x128xbf16>, vector<16x128xbf16>, vector<16x128xbf16>, vector<16x128xbf16>, vector<16x128xbf16>, vector<16x128xbf16>, vector<16x128xbf16>, vector<16x128xbf16>, vector<16x128xbf16> -> vector<16x1152xbf16>
    %c0_71 = arith.constant 0 : index
    %c0_72 = arith.constant 0 : index
    %84 = vector.load %arg6[%c0_71, %c0_72] : memref<1152x128xbf16, #tpu.memory_space<vmem>>, vector<1152x128xbf16>
    %cst_73 = arith.constant dense<0.000000e+00> : vector<16x128xf32>
    %85 = tpu.matmul %83, %84, %cst_73 {dimension_numbers = #tpu.dot_dimension_numbers<[1], [0], [0], [1], [0, 0, 1, 1], [], []>} : vector<16x1152xbf16>, vector<1152x128xbf16>, vector<16x128xf32> -> vector<16x128xf32>
    %c0_74 = arith.constant 0 : index
    %c0_75 = arith.constant 0 : index
    %86 = vector.load %arg7[%c0_74, %c0_75] : memref<1x128xf32, #tpu.memory_space<vmem>>, vector<1x128xf32>
    %87 = vector.broadcast %86 : vector<1x128xf32> to vector<16x128xf32>
    %88 = arith.addf %85, %87 : vector<16x128xf32>
    %cst_76 = arith.constant 0.000000e+00 : f32
    %89 = vector.broadcast %cst_76 : f32 to vector<16x128xf32>
    %90 = arith.maximumf %88, %89 : vector<16x128xf32>
    %91 = arith.truncf %90 : vector<16x128xf32> to vector<16x128xbf16>
    %c0_77 = arith.constant 0 : index
    %c0_78 = arith.constant 0 : index
    %c0_79 = arith.constant 0 : index
    %92 = vector.load %arg8[%c0_77, %c0_78, %c0_79] : memref<9x4x16xbf16, #tpu.memory_space<vmem>>, vector<1x4x16xbf16>
    %93 = vector.shape_cast %92 : vector<1x4x16xbf16> to vector<4x16xbf16>
    %cst_80 = arith.constant dense<0.000000e+00> : vector<4x128xf32>
    %94 = tpu.matmul %93, %91, %cst_80 {dimension_numbers = #tpu.dot_dimension_numbers<[1], [0], [0], [1], [0, 0, 1, 1], [], []>} : vector<4x16xbf16>, vector<16x128xbf16>, vector<4x128xf32> -> vector<4x128xf32>
    %95 = arith.truncf %94 : vector<4x128xf32> to vector<4x128xbf16>
    %c1_81 = arith.constant 1 : index
    %c0_82 = arith.constant 0 : index
    %c0_83 = arith.constant 0 : index
    %96 = vector.load %arg8[%c1_81, %c0_82, %c0_83] : memref<9x4x16xbf16, #tpu.memory_space<vmem>>, vector<1x4x16xbf16>
    %97 = vector.shape_cast %96 : vector<1x4x16xbf16> to vector<4x16xbf16>
    %cst_84 = arith.constant dense<0.000000e+00> : vector<4x128xf32>
    %98 = tpu.matmul %97, %91, %cst_84 {dimension_numbers = #tpu.dot_dimension_numbers<[1], [0], [0], [1], [0, 0, 1, 1], [], []>} : vector<4x16xbf16>, vector<16x128xbf16>, vector<4x128xf32> -> vector<4x128xf32>
    %99 = arith.truncf %98 : vector<4x128xf32> to vector<4x128xbf16>
    %c2_85 = arith.constant 2 : index
    %c0_86 = arith.constant 0 : index
    %c0_87 = arith.constant 0 : index
    %100 = vector.load %arg8[%c2_85, %c0_86, %c0_87] : memref<9x4x16xbf16, #tpu.memory_space<vmem>>, vector<1x4x16xbf16>
    %101 = vector.shape_cast %100 : vector<1x4x16xbf16> to vector<4x16xbf16>
    %cst_88 = arith.constant dense<0.000000e+00> : vector<4x128xf32>
    %102 = tpu.matmul %101, %91, %cst_88 {dimension_numbers = #tpu.dot_dimension_numbers<[1], [0], [0], [1], [0, 0, 1, 1], [], []>} : vector<4x16xbf16>, vector<16x128xbf16>, vector<4x128xf32> -> vector<4x128xf32>
    %103 = arith.truncf %102 : vector<4x128xf32> to vector<4x128xbf16>
    %c3_89 = arith.constant 3 : index
    %c0_90 = arith.constant 0 : index
    %c0_91 = arith.constant 0 : index
    %104 = vector.load %arg8[%c3_89, %c0_90, %c0_91] : memref<9x4x16xbf16, #tpu.memory_space<vmem>>, vector<1x4x16xbf16>
    %105 = vector.shape_cast %104 : vector<1x4x16xbf16> to vector<4x16xbf16>
    %cst_92 = arith.constant dense<0.000000e+00> : vector<4x128xf32>
    %106 = tpu.matmul %105, %91, %cst_92 {dimension_numbers = #tpu.dot_dimension_numbers<[1], [0], [0], [1], [0, 0, 1, 1], [], []>} : vector<4x16xbf16>, vector<16x128xbf16>, vector<4x128xf32> -> vector<4x128xf32>
    %107 = arith.truncf %106 : vector<4x128xf32> to vector<4x128xbf16>
    %c4_93 = arith.constant 4 : index
    %c0_94 = arith.constant 0 : index
    %c0_95 = arith.constant 0 : index
    %108 = vector.load %arg8[%c4_93, %c0_94, %c0_95] : memref<9x4x16xbf16, #tpu.memory_space<vmem>>, vector<1x4x16xbf16>
    %109 = vector.shape_cast %108 : vector<1x4x16xbf16> to vector<4x16xbf16>
    %cst_96 = arith.constant dense<0.000000e+00> : vector<4x128xf32>
    %110 = tpu.matmul %109, %91, %cst_96 {dimension_numbers = #tpu.dot_dimension_numbers<[1], [0], [0], [1], [0, 0, 1, 1], [], []>} : vector<4x16xbf16>, vector<16x128xbf16>, vector<4x128xf32> -> vector<4x128xf32>
    %111 = arith.truncf %110 : vector<4x128xf32> to vector<4x128xbf16>
    %c5_97 = arith.constant 5 : index
    %c0_98 = arith.constant 0 : index
    %c0_99 = arith.constant 0 : index
    %112 = vector.load %arg8[%c5_97, %c0_98, %c0_99] : memref<9x4x16xbf16, #tpu.memory_space<vmem>>, vector<1x4x16xbf16>
    %113 = vector.shape_cast %112 : vector<1x4x16xbf16> to vector<4x16xbf16>
    %cst_100 = arith.constant dense<0.000000e+00> : vector<4x128xf32>
    %114 = tpu.matmul %113, %91, %cst_100 {dimension_numbers = #tpu.dot_dimension_numbers<[1], [0], [0], [1], [0, 0, 1, 1], [], []>} : vector<4x16xbf16>, vector<16x128xbf16>, vector<4x128xf32> -> vector<4x128xf32>
    %115 = arith.truncf %114 : vector<4x128xf32> to vector<4x128xbf16>
    %c6_101 = arith.constant 6 : index
    %c0_102 = arith.constant 0 : index
    %c0_103 = arith.constant 0 : index
    %116 = vector.load %arg8[%c6_101, %c0_102, %c0_103] : memref<9x4x16xbf16, #tpu.memory_space<vmem>>, vector<1x4x16xbf16>
    %117 = vector.shape_cast %116 : vector<1x4x16xbf16> to vector<4x16xbf16>
    %cst_104 = arith.constant dense<0.000000e+00> : vector<4x128xf32>
    %118 = tpu.matmul %117, %91, %cst_104 {dimension_numbers = #tpu.dot_dimension_numbers<[1], [0], [0], [1], [0, 0, 1, 1], [], []>} : vector<4x16xbf16>, vector<16x128xbf16>, vector<4x128xf32> -> vector<4x128xf32>
    %119 = arith.truncf %118 : vector<4x128xf32> to vector<4x128xbf16>
    %c7_105 = arith.constant 7 : index
    %c0_106 = arith.constant 0 : index
    %c0_107 = arith.constant 0 : index
    %120 = vector.load %arg8[%c7_105, %c0_106, %c0_107] : memref<9x4x16xbf16, #tpu.memory_space<vmem>>, vector<1x4x16xbf16>
    %121 = vector.shape_cast %120 : vector<1x4x16xbf16> to vector<4x16xbf16>
    %cst_108 = arith.constant dense<0.000000e+00> : vector<4x128xf32>
    %122 = tpu.matmul %121, %91, %cst_108 {dimension_numbers = #tpu.dot_dimension_numbers<[1], [0], [0], [1], [0, 0, 1, 1], [], []>} : vector<4x16xbf16>, vector<16x128xbf16>, vector<4x128xf32> -> vector<4x128xf32>
    %123 = arith.truncf %122 : vector<4x128xf32> to vector<4x128xbf16>
    %c8_109 = arith.constant 8 : index
    %c0_110 = arith.constant 0 : index
    %c0_111 = arith.constant 0 : index
    %124 = vector.load %arg8[%c8_109, %c0_110, %c0_111] : memref<9x4x16xbf16, #tpu.memory_space<vmem>>, vector<1x4x16xbf16>
    %125 = vector.shape_cast %124 : vector<1x4x16xbf16> to vector<4x16xbf16>
    %cst_112 = arith.constant dense<0.000000e+00> : vector<4x128xf32>
    %126 = tpu.matmul %125, %91, %cst_112 {dimension_numbers = #tpu.dot_dimension_numbers<[1], [0], [0], [1], [0, 0, 1, 1], [], []>} : vector<4x16xbf16>, vector<16x128xbf16>, vector<4x128xf32> -> vector<4x128xf32>
    %127 = arith.truncf %126 : vector<4x128xf32> to vector<4x128xbf16>
    %128 = tpu.concatenate %95, %99, %103, %107, %111, %115, %119, %123, %127 in 1 : vector<4x128xbf16>, vector<4x128xbf16>, vector<4x128xbf16>, vector<4x128xbf16>, vector<4x128xbf16>, vector<4x128xbf16>, vector<4x128xbf16>, vector<4x128xbf16>, vector<4x128xbf16> -> vector<4x1152xbf16>
    %c0_113 = arith.constant 0 : index
    %c0_114 = arith.constant 0 : index
    %129 = vector.load %arg9[%c0_113, %c0_114] : memref<1152x128xbf16, #tpu.memory_space<vmem>>, vector<1152x128xbf16>
    %cst_115 = arith.constant dense<0.000000e+00> : vector<4x128xf32>
    %130 = tpu.matmul %128, %129, %cst_115 {dimension_numbers = #tpu.dot_dimension_numbers<[1], [0], [0], [1], [0, 0, 1, 1], [], []>} : vector<4x1152xbf16>, vector<1152x128xbf16>, vector<4x128xf32> -> vector<4x128xf32>
    %c0_116 = arith.constant 0 : index
    %c0_117 = arith.constant 0 : index
    %131 = vector.load %arg10[%c0_116, %c0_117] : memref<1x128xf32, #tpu.memory_space<vmem>>, vector<1x128xf32>
    %132 = vector.broadcast %131 : vector<1x128xf32> to vector<4x128xf32>
    %133 = arith.addf %130, %132 : vector<4x128xf32>
    %cst_118 = arith.constant 0.000000e+00 : f32
    %134 = vector.broadcast %cst_118 : f32 to vector<4x128xf32>
    %135 = arith.maximumf %133, %134 : vector<4x128xf32>
    %136 = arith.truncf %135 : vector<4x128xf32> to vector<4x128xbf16>
    %c0_119 = arith.constant 0 : index
    %c0_120 = arith.constant 0 : index
    %137 = vector.load %arg11[%c0_119, %c0_120] : memref<128x256xbf16, #tpu.memory_space<vmem>>, vector<128x256xbf16>
    %cst_121 = arith.constant dense<0.000000e+00> : vector<4x256xf32>
    %138 = tpu.matmul %136, %137, %cst_121 {dimension_numbers = #tpu.dot_dimension_numbers<[1], [0], [0], [1], [0, 0, 1, 1], [], []>} : vector<4x128xbf16>, vector<128x256xbf16>, vector<4x256xf32> -> vector<4x256xf32>
    %c0_122 = arith.constant 0 : index
    %c0_123 = arith.constant 0 : index
    %139 = vector.load %arg12[%c0_122, %c0_123] : memref<1x256xf32, #tpu.memory_space<vmem>>, vector<1x256xf32>
    %140 = vector.broadcast %139 : vector<1x256xf32> to vector<4x256xf32>
    %141 = arith.addf %138, %140 : vector<4x256xf32>
    %cst_124 = arith.constant 0.000000e+00 : f32
    %142 = vector.broadcast %cst_124 : f32 to vector<4x256xf32>
    %143 = arith.maximumf %141, %142 : vector<4x256xf32>
    %144 = arith.truncf %143 : vector<4x256xf32> to vector<4x256xbf16>
    %c0_125 = arith.constant 0 : index
    %c0_126 = arith.constant 0 : index
    %145 = vector.load %arg13[%c0_125, %c0_126] : memref<256x512xbf16, #tpu.memory_space<vmem>>, vector<256x512xbf16>
    %cst_127 = arith.constant dense<0.000000e+00> : vector<4x512xf32>
    %146 = tpu.matmul %144, %145, %cst_127 {dimension_numbers = #tpu.dot_dimension_numbers<[1], [0], [0], [1], [0, 0, 1, 1], [], []>} : vector<4x256xbf16>, vector<256x512xbf16>, vector<4x512xf32> -> vector<4x512xf32>
    %c0_128 = arith.constant 0 : index
    %c0_129 = arith.constant 0 : index
    %147 = vector.load %arg14[%c0_128, %c0_129] : memref<1x512xf32, #tpu.memory_space<vmem>>, vector<1x512xf32>
    %148 = vector.broadcast %147 : vector<1x512xf32> to vector<4x512xf32>
    %149 = arith.addf %146, %148 : vector<4x512xf32>
    %cst_130 = arith.constant 0.000000e+00 : f32
    %150 = vector.broadcast %cst_130 : f32 to vector<4x512xf32>
    %151 = arith.maximumf %149, %150 : vector<4x512xf32>
    %152 = arith.truncf %151 : vector<4x512xf32> to vector<4x512xbf16>
    %153 = arith.extf %152 : vector<4x512xbf16> to vector<4x512xf32>
    %cst_131 = arith.constant dense<0.000000e+00> : vector<512xf32>
    %154 = vector.multi_reduction <add>, %153, %cst_131 [0] : vector<4x512xf32> to vector<512xf32>
    %155 = vector.shape_cast %154 : vector<512xf32> to vector<1x512xf32>
    %cst_132 = arith.constant 4.000000e+00 : f32
    %156 = vector.broadcast %cst_132 : f32 to vector<1x512xf32>
    %157 = arith.divf %155, %156 : vector<1x512xf32>
    %158 = arith.truncf %157 : vector<1x512xf32> to vector<1x512xbf16>
    %c0_133 = arith.constant 0 : index
    %c0_134 = arith.constant 0 : index
    %159 = vector.load %arg15[%c0_133, %c0_134] : memref<512x256xbf16, #tpu.memory_space<vmem>>, vector<512x256xbf16>
    %cst_135 = arith.constant dense<0.000000e+00> : vector<1x256xf32>
    %160 = tpu.matmul %158, %159, %cst_135 {dimension_numbers = #tpu.dot_dimension_numbers<[1], [0], [0], [1], [0, 0, 1, 1], [], []>} : vector<1x512xbf16>, vector<512x256xbf16>, vector<1x256xf32> -> vector<1x256xf32>
    %c0_136 = arith.constant 0 : index
    %c0_137 = arith.constant 0 : index
    %161 = vector.load %arg16[%c0_136, %c0_137] : memref<1x256xf32, #tpu.memory_space<vmem>>, vector<1x256xf32>
    %162 = arith.addf %160, %161 : vector<1x256xf32>
    %cst_138 = arith.constant 0.000000e+00 : f32
    %163 = vector.broadcast %cst_138 : f32 to vector<1x256xf32>
    %164 = arith.maximumf %162, %163 : vector<1x256xf32>
    %165 = arith.truncf %164 : vector<1x256xf32> to vector<1x256xbf16>
    %c0_139 = arith.constant 0 : index
    %c0_140 = arith.constant 0 : index
    %166 = vector.load %arg17[%c0_139, %c0_140] : memref<256x128xbf16, #tpu.memory_space<vmem>>, vector<256x128xbf16>
    %cst_141 = arith.constant dense<0.000000e+00> : vector<1x128xf32>
    %167 = tpu.matmul %165, %166, %cst_141 {dimension_numbers = #tpu.dot_dimension_numbers<[1], [0], [0], [1], [0, 0, 1, 1], [], []>} : vector<1x256xbf16>, vector<256x128xbf16>, vector<1x128xf32> -> vector<1x128xf32>
    %c0_142 = arith.constant 0 : index
    %c0_143 = arith.constant 0 : index
    %168 = vector.load %arg18[%c0_142, %c0_143] : memref<1x128xf32, #tpu.memory_space<vmem>>, vector<1x128xf32>
    %169 = arith.addf %167, %168 : vector<1x128xf32>
    %cst_144 = arith.constant dense<0xFF800000> : vector<1xf32>
    %170 = vector.multi_reduction <maximumf>, %169, %cst_144 [1] : vector<1x128xf32> to vector<1xf32>
    %171 = vector.shape_cast %170 : vector<1xf32> to vector<1x1xf32>
    %172 = vector.broadcast %171 : vector<1x1xf32> to vector<1x128xf32>
    %173 = arith.subf %169, %172 : vector<1x128xf32>
    %174 = math.exp %173 : vector<1x128xf32>
    %cst_145 = arith.constant dense<0.000000e+00> : vector<1xf32>
    %175 = vector.multi_reduction <add>, %174, %cst_145 [1] : vector<1x128xf32> to vector<1xf32>
    %176 = vector.shape_cast %175 : vector<1xf32> to vector<1x1xf32>
    %177 = math.log %176 : vector<1x1xf32>
    %178 = vector.broadcast %177 : vector<1x1xf32> to vector<1x128xf32>
    %179 = arith.subf %173, %178 : vector<1x128xf32>
    %c0_146 = arith.constant 0 : index
    %c0_147 = arith.constant 0 : index
    %c0_148 = arith.constant 0 : index
    %180 = vector.load %arg19[%c0_146, %c0_147, %c0_148] : memref<1x1x128xf32, #tpu.memory_space<vmem>>, vector<1x1x128xf32>
    %181 = vector.shape_cast %180 : vector<1x1x128xf32> to vector<1x128xf32>
    %182 = vector.shape_cast %179 : vector<1x128xf32> to vector<1x1x128xf32>
    tpu.vector_store %arg19[%c0_146, %c0_147, %c0_148], %182 {strides = array<i32>} : memref<1x1x128xf32, #tpu.memory_space<vmem>>, vector<1x1x128xf32>,
    return
  }
  func.func @transform_0(%arg0: i32) -> (i32, i32, i32) {
    %c0_i32 = arith.constant 0 : i32
    %c0_i32_0 = arith.constant 0 : i32
    %c0_i32_1 = arith.constant 0 : i32
    return %arg0, %c0_i32, %c0_i32_0 : i32, i32, i32
  }
  func.func @transform_1(%arg0: i32) -> (i32, i32, i32) {
    %c0_i32 = arith.constant 0 : i32
    %c0_i32_0 = arith.constant 0 : i32
    %c0_i32_1 = arith.constant 0 : i32
    %c0_i32_2 = arith.constant 0 : i32
    return %c0_i32, %c0_i32_0, %c0_i32_1 : i32, i32, i32
  }
  func.func @transform_2(%arg0: i32) -> (i32, i32) {
    %c0_i32 = arith.constant 0 : i32
    %c0_i32_0 = arith.constant 0 : i32
    %c0_i32_1 = arith.constant 0 : i32
    return %c0_i32, %c0_i32_0 : i32, i32
  }
  func.func @transform_3(%arg0: i32) -> (i32, i32) {
    %c0_i32 = arith.constant 0 : i32
    %c0_i32_0 = arith.constant 0 : i32
    %c0_i32_1 = arith.constant 0 : i32
    return %c0_i32, %c0_i32_0 : i32, i32
  }
  func.func @transform_4(%arg0: i32) -> (i32, i32, i32) {
    %c0_i32 = arith.constant 0 : i32
    %c0_i32_0 = arith.constant 0 : i32
    %c0_i32_1 = arith.constant 0 : i32
    %c0_i32_2 = arith.constant 0 : i32
    return %c0_i32, %c0_i32_0, %c0_i32_1 : i32, i32, i32
  }
  func.func @transform_5(%arg0: i32) -> (i32, i32) {
    %c0_i32 = arith.constant 0 : i32
    %c0_i32_0 = arith.constant 0 : i32
    %c0_i32_1 = arith.constant 0 : i32
    return %c0_i32, %c0_i32_0 : i32, i32
  }
  func.func @transform_6(%arg0: i32) -> (i32, i32) {
    %c0_i32 = arith.constant 0 : i32
    %c0_i32_0 = arith.constant 0 : i32
    %c0_i32_1 = arith.constant 0 : i32
    return %c0_i32, %c0_i32_0 : i32, i32
  }
  func.func @transform_7(%arg0: i32) -> (i32, i32, i32) {
    %c0_i32 = arith.constant 0 : i32
    %c0_i32_0 = arith.constant 0 : i32
    %c0_i32_1 = arith.constant 0 : i32
    %c0_i32_2 = arith.constant 0 : i32
    return %c0_i32, %c0_i32_0, %c0_i32_1 : i32, i32, i32
  }
  func.func @transform_8(%arg0: i32) -> (i32, i32) {
    %c0_i32 = arith.constant 0 : i32
    %c0_i32_0 = arith.constant 0 : i32
    %c0_i32_1 = arith.constant 0 : i32
    return %c0_i32, %c0_i32_0 : i32, i32
  }
  func.func @transform_9(%arg0: i32) -> (i32, i32) {
    %c0_i32 = arith.constant 0 : i32
    %c0_i32_0 = arith.constant 0 : i32
    %c0_i32_1 = arith.constant 0 : i32
    return %c0_i32, %c0_i32_0 : i32, i32
  }
  func.func @transform_10(%arg0: i32) -> (i32, i32) {
    %c0_i32 = arith.constant 0 : i32
    %c0_i32_0 = arith.constant 0 : i32
    %c0_i32_1 = arith.constant 0 : i32
    return %c0_i32, %c0_i32_0 : i32, i32
  }
  func.func @transform_11(%arg0: i32) -> (i32, i32) {
    %c0_i32 = arith.constant 0 : i32
    %c0_i32_0 = arith.constant 0 : i32
    %c0_i32_1 = arith.constant 0 : i32
    return %c0_i32, %c0_i32_0 : i32, i32
  }
  func.func @transform_12(%arg0: i32) -> (i32, i32) {
    %c0_i32 = arith.constant 0 : i32
    %c0_i32_0 = arith.constant 0 : i32
    %c0_i32_1 = arith.constant 0 : i32
    return %c0_i32, %c0_i32_0 : i32, i32
  }
  func.func @transform_13(%arg0: i32) -> (i32, i32) {
    %c0_i32 = arith.constant 0 : i32
    %c0_i32_0 = arith.constant 0 : i32
    %c0_i32_1 = arith.constant 0 : i32
    return %c0_i32, %c0_i32_0 : i32, i32
  }
  func.func @transform_14(%arg0: i32) -> (i32, i32) {
    %c0_i32 = arith.constant 0 : i32
    %c0_i32_0 = arith.constant 0 : i32
    %c0_i32_1 = arith.constant 0 : i32
    return %c0_i32, %c0_i32_0 : i32, i32
  }
  func.func @transform_15(%arg0: i32) -> (i32, i32) {
    %c0_i32 = arith.constant 0 : i32
    %c0_i32_0 = arith.constant 0 : i32
    %c0_i32_1 = arith.constant 0 : i32
    return %c0_i32, %c0_i32_0 : i32, i32
  }
  func.func @transform_16(%arg0: i32) -> (i32, i32) {
    %c0_i32 = arith.constant 0 : i32
    %c0_i32_0 = arith.constant 0 : i32
    %c0_i32_1 = arith.constant 0 : i32
    return %c0_i32, %c0_i32_0 : i32, i32
  }
  func.func @transform_17(%arg0: i32) -> (i32, i32) {
    %c0_i32 = arith.constant 0 : i32
    %c0_i32_0 = arith.constant 0 : i32
    %c0_i32_1 = arith.constant 0 : i32
    return %c0_i32, %c0_i32_0 : i32, i32
  }
  func.func @transform_18(%arg0: i32) -> (i32, i32, i32) {
    %c0_i32 = arith.constant 0 : i32
    %c0_i32_0 = arith.constant 0 : i32
    %c0_i32_1 = arith.constant 0 : i32
    return %arg0, %c0_i32, %c0_i32_0 : i32, i32, i32
  }
}

</mosaic_0001>

<bundles_post_ra>
// kernel: tpu_custom_call.1
= control target key start
LH: loop header
LB: loop body
LE: loop exit
PB: predicated region body
PF: predicated region fallthrough
CT: control target
= control target key end

     0   :  { %s10641_s0 = inlined_call_operand.hbm [shape: bf16[2,256,128], index: 0, kind: input, shape index: {}]   ;;  %s10642_s1 = inlined_call_operand.hbm [shape: bf16[9,64,256], index: 1, kind: input, shape index: {}]   ;;  %s10643_s2 = inlined_call_operand.hbm [shape: bf16[1152,128], index: 2, kind: input, shape index: {}]   ;;  %s10644_s3 = inlined_call_operand.hbm [shape: f32[1,128], index: 3, kind: input, shape index: {}]   ;;  %s10645_s4 = inlined_call_operand.hbm [shape: bf16[9,16,64], index: 4, kind: input, shape index: {}]   ;;  %s10646_s5 = inlined_call_operand.hbm [shape: bf16[1152,128], index: 5, kind: input, shape index: {}]   ;;  %s10647_s6 = inlined_call_operand.hbm [shape: f32[1,128], index: 6, kind: input, shape index: {}]   ;;  %s10648_s7 = inlined_call_operand.hbm [shape: bf16[9,4,16], index: 7, kind: input, shape index: {}]   ;;  %s10649_s8 = inlined_call_operand.hbm [shape: bf16[1152,128], index: 8, kind: input, shape index: {}]   ;;  %s10650_s9 = inlined_call_operand.hbm [shape: f32[1,128], index: 9, kind: input, shape index: {}]   ;;  %s10651_s10 = inlined_call_operand.hbm [shape: bf16[128,256], index: 10, kind: input, shape index: {}]   ;;  %s10652_s11 = inlined_call_operand.vmem [shape: f32[1,256], index: 11, kind: input, shape index: {}]   ;;  %s10653_s12 = inlined_call_operand.hbm [shape: bf16[256,512], index: 12, kind: input, shape index: {}]   ;;  %s10654_s13 = inlined_call_operand.vmem [shape: f32[1,512], index: 13, kind: input, shape index: {}]   ;;  %s10655_s14 = inlined_call_operand.hbm [shape: bf16[512,256], index: 14, kind: input, shape index: {}]   ;;  %s10656_s15 = inlined_call_operand.vmem [shape: f32[1,256], index: 15, kind: input, shape index: {}]   ;;  %s10657_s16 = inlined_call_operand.hbm [shape: bf16[256,128], index: 16, kind: input, shape index: {}]   ;;  %s10658_s17 = inlined_call_operand.vmem [shape: f32[1,128], index: 17, kind: input, shape index: {}]   ;;  %s10659_s18 = inlined_call_operand.hbm [shape: f32[2,1,128], index: 18, kind: output, shape index: {}]  }
   0x1   :  { %10672 = sst [smem:[#allocation37_spill]] %s10641_s0 }
   0x2   :  { %10673 = sst [smem:[#allocation38_spill]] %s10642_s1 }
   0x3   :  { %10674 = sst [smem:[#allocation39_spill]] %s10643_s2 }
   0x4   :  { %10675 = sst [smem:[#allocation40_spill]] %s10644_s3 }
   0x5   :  { %10676 = sst [smem:[#allocation41_spill]] %s10645_s4 }
   0x6   :  { %10677 = sst [smem:[#allocation42_spill]] %s10646_s5 }
   0x7   :  { %10678 = sst [smem:[#allocation43_spill]] %s10647_s6 }
   0x8   :  { %10679 = sst [smem:[#allocation44_spill]] %s10652_s11 }
   0x9   :  { %10680 = sst [smem:[#allocation45_spill]] %s10654_s13 }
   0xa   :  { %10681 = sst [smem:[#allocation46_spill]] %s10656_s15 }
   0xb   :  { %10682 = sst [smem:[#allocation47_spill]] %s10658_s17 }
   0xc   :  { %10683 = sst [smem:[#allocation48_spill]] %s10659_s18 }
   0xd   :  { %23 = vsyncpa [#allocation3], 0 }
   0xe   :  { %25 = vsyncpa [#allocation3 + $0x1], 0 }
   0xf   :  { %26 = vsyncpa [#allocation6], 0 }
  0x10   :  { %27 = vsyncpa [#allocation9], 0 }
  0x11   :  { %28 = vsyncpa [#allocation12], 0 }
  0x12   :  { %29 = vsyncpa [#allocation15], 0 }
  0x13   :  { %30 = vsyncpa [#allocation18], 0 }
  0x14   :  { %31 = vsyncpa [#allocation21], 0 }
  0x15   :  { %32 = vsyncpa [#allocation24], 0 }
  0x16   :  { %33 = vsyncpa [#allocation4], 0 }
  0x17   :  { %35 = vsyncpa [#allocation4 + $0x1], 0  ;;  %s9716_s27 = smov 0   ;;  %s9718_s28 = smov 0  }
  0x18   :  { %s9720_s29 = smov 0   ;;  %s9722_s30 = smov 0  }
  0x19 LB: > { %s10684_s1 = sld [smem:[#allocation38_spill]]  ;;  %s9740_s21 = sadd.s32 4294967295, %s9597_s30   ;;  %s9597_s30 = sphi %s9722_s30, %s10719_s30   ;;  %s9593_s29 = sphi %s9720_s29, %s10718_s29   ;;  %s9589_s28 = sphi %s9718_s28, %s10717_s28   ;;  %s9585_s27 = sphi %s9716_s27, %s10716_s27  }
  0x1a   : > { %10685 = sst [smem:[#allocation35_spill]] %s9740_s21  ;;  %p6469_p0 = scmp.ge.s32.totalorder %s9597_s30, 1 }
  0x1b   : > { %p62_p1 = scmp.eq.s32.totalorder %s9740_s21, 0  ;;  %p455_p2 = scmp.lt.s32.totalorder %s9597_s30, 3 }
  0x1c   : > { %s9599_s2 = smov [#allocation5]   ;;  %s10688_s3 = sld [smem:[#allocation40_spill]] }
  0x1d   : > { %p9745_p3 = pnand %p6469_p0, %p455_p2  ;;  %s468_s23 = sshll.u32 %s9599_s2, 4  ;;  %s469_s23 = int_to_ptr.vmem [resolvable:$true] %s468_s23 }
  0x1e   : > { %s9600_s19 = smov [#allocation8]   ;;  %s10666_s2 = smov 128  }
  0x1f   : > { %s466_s20 = sshll.u32 %s10684_s1, 4  ;;  %p8944_p4 = pneg %p9745_p3  ;;  %s467_s20 = int_to_ptr.hbm [resolvable:$true] %s466_s20 }
  0x20   : > { %s10686_s22 = scalar_select %p9745_p3, 1, 0 }
  0x21   : > { %p9757_p6 = pnand %p8944_p4, %p62_p1  ;;  %s497_s1 = sshll.u32 %s9600_s19, 4  ;;  %s498_s1 = int_to_ptr.vmem [resolvable:$true] %s497_s1 }
  0x22   : > { %10687 = sst [smem:[#allocation36_spill]] %s10686_s22  ;;  %s495_s26 = sshll.u32 %s10688_s3, 4  ;;  %s496_s26 = int_to_ptr.hbm [resolvable:$true] %s495_s26 }
  0x23   : > { %s10668_s18 = smov 8   ;;  %s10690_s5 = sld [smem:[#allocation42_spill]] }
  0x24   : > { %8947 = dma.hbm_to_vmem [thread:$0]  (!%p9757_p6), %s467_s20, 9216, %s469_s23, [#allocation6], %s10666_s2, %s10666_s2, %s10668_s18  }
  0x25   : > { %8953 = dma.hbm_to_vmem [thread:$0]  (!%p9757_p6), %s496_s26, 16, %s498_s1, [#allocation9]  }
  0x26   : > { %s9603_s17 = smov [#allocation11]   ;;  %s546_s11 = sshll.u32 %s10648_s7, 4  ;;  %s547_s11 = int_to_ptr.hbm [resolvable:$true] %s546_s11 }
  0x27   : > { %s522_s15 = sshll.u32 %s9603_s17, 4  ;;  %s10670_s22 = smov 64   ;;  %s523_s15 = int_to_ptr.vmem [resolvable:$true] %s522_s15 }
  0x28   : > { %s10671_s21 = smov 4   ;;  %s9606_s20 = smov [#allocation14]  }
  0x29   : > { %s520_s3 = sshll.u32 %s10690_s5, 4  ;;  %s548_s23 = sshll.u32 %s9606_s20, 4  ;;  %s521_s3 = int_to_ptr.hbm [resolvable:$true] %s520_s3  ;;  %s549_s23 = int_to_ptr.vmem [resolvable:$true] %s548_s23 }
  0x2a   : > { %8959 = dma.hbm_to_vmem [thread:$0]  (!%p9757_p6), %s521_s3, 9216, %s523_s15, [#allocation12], %s10670_s22, %s10670_s22, %s10671_s21  }
  0x2b   : > { %s9607_s26 = smov 32   ;;  %s9608_s17 = smov 2  }
  0x2c   : > { %8965 = dma.hbm_to_vmem [thread:$0]  (!%p9757_p6), %s547_s11, 288, %s549_s23, [#allocation15], %s9607_s26, %s9607_s26, %s9608_s17  }
  0x2d   : > { %s575_s24 = sshll.u32 %s10650_s9, 4  ;;  %s9609_s25 = smov [#allocation17]   ;;  %s576_s24 = int_to_ptr.hbm [resolvable:$true] %s575_s24 }
  0x2e   : > { %s577_s19 = sshll.u32 %s9609_s25, 4  ;;  %s603_s3 = sshll.u32 %s10653_s12, 4  ;;  %s578_s19 = int_to_ptr.vmem [resolvable:$true] %s577_s19  ;;  %s604_s3 = int_to_ptr.hbm [resolvable:$true] %s603_s3 }
  0x2f   : > { %8971 = dma.hbm_to_vmem [thread:$0]  (!%p9757_p6), %s576_s24, 16, %s578_s19, [#allocation18]  }
  0x30   : > { %s9610_s15 = smov [#allocation20]   ;;  %s9611_s11 = smov 256  }
  0x31   : > { %s605_s20 = sshll.u32 %s9610_s15, 4  ;;  %s9612_s23 = smov 16   ;;  %s606_s20 = int_to_ptr.vmem [resolvable:$true] %s605_s20 }
  0x32   : > { %8977 = dma.hbm_to_vmem [thread:$0]  (!%p9757_p6), %s604_s3, 8192, %s606_s20, [#allocation21], %s9611_s11, %s9611_s11, %s9612_s23  }
  0x33   : > { %s10691_s1 = sld [smem:[#allocation39_spill]]  ;;  %s9613_s25 = smov [#allocation7]  }
  0x34   : > { %s482_s18 = sshll.u32 %s9613_s25, 4  ;;  %s10692_s4 = sld [smem:[#allocation41_spill]]  ;;  %s483_s18 = int_to_ptr.vmem [resolvable:$true] %s482_s18 }
  0x35   : > { %s9614_s3 = smov [#allocation10]   ;;  %s10693_s6 = sld [smem:[#allocation43_spill]] }
  0x36   : > { %s508_s15 = sshll.u32 %s9614_s3, 4  ;;  %s586_s20 = sshll.u32 %s10651_s10, 4  ;;  %s509_s15 = int_to_ptr.vmem [resolvable:$true] %s508_s15  ;;  %s587_s20 = int_to_ptr.hbm [resolvable:$true] %s586_s20 }
  0x37   : > { %s620_s11 = sshll.u32 %s10655_s14, 4  ;;  %s10694_s17 = smov 8   ;;  %s621_s11 = int_to_ptr.hbm [resolvable:$true] %s620_s11 }
  0x38   : > { %s637_s24 = sshll.u32 %s10657_s16, 4  ;;  %s10696_s3 = sld [smem:[#allocation35_spill]]  ;;  %s638_s24 = int_to_ptr.hbm [resolvable:$true] %s637_s24 }
  0x39   : > { %s480_s13 = sshll.u32 %s10691_s1, 4  ;;  %s560_s1 = sshll.u32 %s10649_s8, 4  ;;  %s481_s13 = int_to_ptr.hbm [resolvable:$true] %s480_s13  ;;  %s561_s1 = int_to_ptr.hbm [resolvable:$true] %s560_s1 }
  0x3a   : > { %s506_s19 = sshll.u32 %s10692_s4, 4  ;;  %p55_p7 = scmp.ne.s32.totalorder %s9593_s29, %s9589_s28  ;;  %s507_s19 = int_to_ptr.hbm [resolvable:$true] %s506_s19 }
  0x3b   : > { %8950 = dma.hbm_to_vmem [thread:$0]  (!%p9757_p6), %s481_s13, 9216, %s483_s18, [#allocation6], %s10670_s22, %s10670_s22, %s10671_s21  }
  0x3c   : > { %s535_s23 = sshll.u32 %s10693_s6, 4  ;;  %s9615_s13 = smov [#allocation13]   ;;  %s536_s23 = int_to_ptr.hbm [resolvable:$true] %s535_s23 }
  0x3d   : > { %8956 = dma.hbm_to_vmem [thread:$0]  (!%p9757_p6), %s507_s19, 1152, %s509_s15, [#allocation9], %s10670_s22, %s10670_s22, %s10671_s21  }
  0x3e   : > { %s537_s25 = sshll.u32 %s9615_s13, 4  ;;  %s9616_s18 = smov [#allocation16]   ;;  %s538_s25 = int_to_ptr.vmem [resolvable:$true] %s537_s25 }
  0x3f   : > { %8962 = dma.hbm_to_vmem [thread:$0]  (!%p9757_p6), %s536_s23, 16, %s538_s25, [#allocation12]  }
  0x40   : > { %s562_s2 = sshll.u32 %s9616_s18, 4  ;;  %s9617_s23 = smov [#allocation19]   ;;  %s563_s2 = int_to_ptr.vmem [resolvable:$true] %s562_s2 }
  0x41   : > { %8968 = dma.hbm_to_vmem [thread:$0]  (!%p9757_p6), %s561_s1, 9216, %s563_s2, [#allocation15], %s10670_s22, %s10670_s22, %s10671_s21  }
  0x42   : > { %s588_s26 = sshll.u32 %s9617_s23, 4  ;;  %s10695_s13 = smov 128   ;;  %s589_s26 = int_to_ptr.vmem [resolvable:$true] %s588_s26 }
  0x43   : > { %8974 = dma.hbm_to_vmem [thread:$0]  (!%p9757_p6), %s587_s20, 2048, %s589_s26, [#allocation18], %s10695_s13, %s10695_s13, %s10694_s17  }
  0x44   : > { %s9618_s1 = smov [#allocation22]   ;;  %s9619_s20 = smov [#allocation23]  }
  0x45   : > { %s622_s25 = sshll.u32 %s9618_s1, 4  ;;  %s639_s19 = sshll.u32 %s9619_s20, 4  ;;  %s623_s25 = int_to_ptr.vmem [resolvable:$true] %s622_s25  ;;  %s640_s19 = int_to_ptr.vmem [resolvable:$true] %s639_s19 }
  0x46   : > { %8980 = dma.hbm_to_vmem [thread:$0]  (!%p9757_p6), %s621_s11, 8192, %s623_s25, [#allocation21], %s10695_s13, %s10695_s13, %s10694_s17  }
  0x47   : > { %8983 = dma.hbm_to_vmem [thread:$0]  (!%p9757_p6), %s638_s24, 2048, %s640_s19, [#allocation24], %s10670_s22, %s10670_s22, %s10671_s21  }
  0x48   : > { %s6468_s15 = sadd.s32 4294967294, %s9597_s30   ;;  %s9846_s23 = sadd.s32 1, %s9597_s30  }
  0x49   : > { %s48_s26 = sadd.s32 1, %s9593_s29  ;;  %s45_s1 = ssub.s32 %s9597_s30, %s9846_s23 }
  0x4a   : > { %p46_p8 = scmp.eq.s32.totalorder %s45_s1, 0  ;;  %p56_p9 = scmp.eq.s32.totalorder %s9597_s30, 0 }
  0x4b   : > { %p61_p10 = scmp.ne.s32.totalorder %s9589_s28, %s9585_s27  ;;  %p442_p11 = scmp.eq.s32.totalorder %s10696_s3, 1 }
  0x4c   : > { %s9858_s11 = scalar_select %p46_p8, %s9593_s29, %s48_s26  }
  0x4d   : > { %p9862_p12 = por %p62_p1, %p61_p10  ;;  %p9866_p13 = por %p442_p11, %p55_p7 }
  0x4e   : > { %p448_p0 = scmp.eq.s32.totalorder %s6468_s15, 1  ;;  %p57_p2 = por %p56_p9, %p55_p7 }
  0x4f   : > { %s656_s13 = sand.u32 1, %s9593_s29   ;;  %p9005_p6 = scmp.lt.s32.totalorder %s9597_s30, 2 }
  0x50   : > { %p9871_p4 = por %p448_p0, %p61_p10  ;;  %s6484_s18 = sshll.u32 %s656_s13, 7 }
  0x51   : > { %s8414_s2 = sshll.u32 %s9597_s30, 7  ;;  %s10700_s20 = sld [smem:[#allocation37_spill]] }
  0x52   : > { %s660_s1 = scalar_lea.vmem [#allocation2], %s6484_s18  ;;  %p9880_p8 = pnand %p9005_p6, %p57_p2 }
  0x53   : > { %s668_s22 = sshll.u32 %s660_s1, 4  ;;  %s657_s21 = scalar_lea.sflag [#allocation3], %s656_s13  ;;  %s669_s22 = int_to_ptr.vmem [resolvable:$true] %s668_s22 }
  0x54   : > { %p9477_p9 = pneg %p9880_p8 }
  0x57   : > { %s665_s19 = scalar_lea.hbm %s10700_s20, %s8414_s2  ;;  %s9480_s18 = scalar_lea.hbm %s10700_s20, 256 }
  0x58   : > { %s666_s26 = sshll.u32 %s665_s19, 4  ;;  %s667_s26 = int_to_ptr.hbm [resolvable:$true] %s666_s26 }
  0x59   : > { %s9473_s4 = sshra.s32 %s667_s26, 4  ;;  %s9474_s4 = int_to_ptr.hbm [resolvable:$true] %s9473_s4 }
  0x5a   : > { %s9475_s5 = scalar_lea.hbm %s9474_s4, 128  ;;  %p9481_p0 = scmp.lt.s32.totalorder %s9474_s4, %s10700_s20 }
  0x5b   : > { %p9476_p7 = scmp.ne.s32.totalorder %s9474_s4, %s9475_s5  ;;  %p9482_p2 = scmp.lt.s32.totalorder %s9480_s18, %s9475_s5 }
  0x5d   : > { %p9478_p10 = pnand %p9477_p9, %p9476_p7  ;;  %p9483_p6 = por %p9482_p2, %p9481_p0 }
  0x5f   : > { %p9479_p11 = pneg %p9478_p10 }
  0x61   : > { %p9484_p5 = pnand %p9483_p6, %p9479_p11 }
  0x63   : > { %9487 = shalt.err (!%p9484_p5)
}
  0x64   : > { %s10702_s13 = smov 4   ;;  %s10703_s1 = smov 64  }
  0x65   : > { %8987 = dma.hbm_to_vmem [thread:$0]  (!%p9880_p8), %s667_s26, 2048, %s669_s22, %s657_s21, %s10703_s1, %s10703_s1, %s10702_s13  }
  0x66   : > { %680 = sbr.rel (%p9745_p3) target bundleno = 2275 (0x8e3), region = 92  ;;  %s9900_s2 = sand.u32 (!%p9745_p3), 1, %s9589_s28  }
  0x67   : > { %s6488_s4 = sshll.u32 (!%p9745_p3), %s9900_s2, 7  ;;  %s683_s5 = scalar_lea.sflag (!%p9745_p3), [#allocation3], %s9900_s2 }
  0x68   : > { %s9904_s24 = scalar_lea.vmem (!%p9745_p3), [#allocation2], %s6488_s4 }
  0x6b   : > { %9548 = dma.done.wait (%p9862_p12), %s683_s5, 2048  }
  0x6c   : > { %9550 = vsyncadd (%p9862_p12), %s683_s5, 4294965248  ;;  %s10705_s15 = sld [smem:[#allocation35_spill]] }
  0x6d   : > { %9552 = dma.done.wait (%p62_p1), [#allocation6], 18432  }
  0x6e   : > { %9554 = vsyncadd (%p62_p1), [#allocation6], 4294948864 }
  0x6f   : > { %9556 = dma.done.wait (%p62_p1), [#allocation9], 1168  }
  0x70   : > { %9558 = vsyncadd (%p62_p1), [#allocation9], 4294966128 }
  0x71   : > { %9560 = dma.done.wait (%p62_p1), [#allocation12], 9232  }
  0x72   : > { %9562 = vsyncadd (%p62_p1), [#allocation12], 4294958064 }
  0x73   : > { %9564 = dma.done.wait (%p62_p1), [#allocation15], 9504  }
  0x74   : > { %9566 = vsyncadd (%p62_p1), [#allocation15], 4294957792 }
  0x75   : > { %9568 = dma.done.wait (%p62_p1), [#allocation18], 2064  }
  0x76   : > { %9570 = vsyncadd (%p62_p1), [#allocation18], 4294965232 }
  0x77   : > { %9572 = dma.done.wait (%p62_p1), [#allocation21], 16384  }
  0x78   : > { %9574 = vsyncadd (%p62_p1), [#allocation21], 4294950912 }
  0x79   : > { %9576 = dma.done.wait (%p62_p1), [#allocation24], 2048  }
  0x7a   : > { %9578 = vsyncadd (%p62_p1), [#allocation24], 4294965248  ;;  %v9939_v0 = vld [vmem:[%s9904_s24 + $0x38] sm:$0xff]  ;;  %v9947_v2 = vld [vmem:[%s9904_s24 + $0x30] sm:$0xff]  ;;  %vm3043_vm0 = vcmask 523264   ;;  %vm4043_vm1 = vcmask 130048  }
  0x7b   : > { %v9942_v1 = vld [vmem:[%s9904_s24 + $0x78] sm:$0xff]  ;;  %981 = vmatpush.bf16.msra.mxu0 %v9939_v0  ;;  %v9950_v3 = vld [vmem:[%s9904_s24 + $0x70] sm:$0xff]  ;;  %1096 = vmatpush.bf16.msra.mxu2 %v9939_v0  ;;  %v9957_v4 = vld [vmem:[%s9904_s24 + $0x28] sm:$0xff]  ;;  %s10710_s22 = sld [smem:[#allocation44_spill]]  ;;  %vm5554_vm2 = vcmask 1043456   ;;  %vm6251_vm4 = vcmask 1040384  }
  0x7c   : > { %1010 = vmatpush.bf16.msra.mxu1 %v9942_v1  ;;  %1125 = vmatpush.bf16.msra.mxu3 %v9942_v1  ;;  %v9960_v5 = vld [vmem:[%s9904_s24 + $0x68] sm:$0xff]  ;;  %v9967_v6 = vld [vmem:[%s9904_s24 + $0x20] sm:$0xff]  ;;  %v9977_v8 = vld [vmem:[%s9904_s24 + $0x18] sm:$0xff]  ;;  %s10711_s18 = sld [smem:[#allocation45_spill]]  ;;  %s803_s0 = scalar_lea.vmem [#allocation25], %s9900_s2 }
  0x7d   : > { %v9970_v7 = vld [vmem:[%s9904_s24 + $0x60] sm:$0xff]  ;;  %v9980_v9 = vld [vmem:[%s9904_s24 + $0x58] sm:$0xff]  ;;  %v9987_v10 = vld [vmem:[%s9904_s24 + $0x10] sm:$0xff]  ;;  %s10712_s13 = sld [smem:[#allocation46_spill]]  ;;  %s6276_s26 = sshll.u32 %s803_s0, 4  ;;  %s6277_s26 = int_to_ptr.vmem [resolvable:$true] %s6276_s26 }
  0x7e   : > { %v9990_v11 = vld [vmem:[%s9904_s24 + $0x50] sm:$0xff]  ;;  %v9997_v12 = vld [vmem:[%s9904_s24 + $0x8] sm:$0xff]  ;;  %v10005_v14 = vld [vmem:[%s9904_s24] sm:$0xff]  ;;  %s10713_s5 = sld [smem:[#allocation47_spill]]  ;;  %s6266_s3 = scalar_lea.sflag [#allocation4], %s9900_s2 }
  0x7f   : > { %982 = vmatpush.bf16.msra.mxu0 %v9947_v2  ;;  %1097 = vmatpush.bf16.msra.mxu2 %v9947_v2  ;;  %v10000_v13 = vld [vmem:[%s9904_s24 + $0x48] sm:$0xff]  ;;  %v10008_v15 = vld [vmem:[%s9904_s24 + $0x40] sm:$0xff]  ;;  %v6512_v28 = vld [vmem:[#allocation5 + $0x10] sm:$0xf]  ;;  %s10714_s21 = sld [smem:[#allocation48_spill]] }
  0x80   : > { %1011 = vmatpush.bf16.msra.mxu1 %v9950_v3  ;;  %1126 = vmatpush.bf16.msra.mxu3 %v9950_v3  ;;  %v6504_v16 = vld [vmem:[#allocation5] sm:$0xf]  ;;  %v8432_v17 = vld [vmem:[#allocation5 + $0x4] sm:$0xf0]  ;;  %v8431_v18 = vld [vmem:[#allocation5 + $0x4] sm:$0xf] }
  0x81   : > { %v6506_v19 = vld [vmem:[#allocation5 + $0x8] sm:$0xf0]  ;;  %v6600_v20 = vld [vmem:[#allocation5 + $0x40] sm:$0xf]  ;;  %v8440_v21 = vld [vmem:[#allocation5 + $0x44] sm:$0xf0]  ;;  %v6505_v24 = vor.u32 %v8432_v17, %v6504_v16 }
  0x82   : > { %v8439_v22 = vld [vmem:[#allocation5 + $0x44] sm:$0xf]  ;;  %v6602_v23 = vld [vmem:[#allocation5 + $0x48] sm:$0xf0]  ;;  %v6509_v25 = vor.u32 %v8431_v18, %v6506_v19  ;;  %v6601_v26 = vor.u32 %v8440_v21, %v6600_v20  ;;  %v8434_v29 = vld [vmem:[#allocation5 + $0x14] sm:$0xf0] }
  0x83   : > { %983 = vmatpush.bf16.msra.mxu0 %v9957_v4  ;;  %1098 = vmatpush.bf16.msra.mxu2 %v9957_v4  ;;  %v6605_v27 = vor.u32 %v8439_v22, %v6602_v23  ;;  %v8433_v30 = vld [vmem:[#allocation5 + $0x14] sm:$0xf]  ;;  %v6514_v31 = vld [vmem:[#allocation5 + $0x18] sm:$0xf0]  ;;  %v6608_v32 = vld [vmem:[#allocation5 + $0x50] sm:$0xf]  ;;  %v6513_v36 = vor.u32 %v8434_v29, %v6512_v28 }
  0x84   : > { %1012 = vmatpush.bf16.msra.mxu1 %v9960_v5  ;;  %1127 = vmatpush.bf16.msra.mxu3 %v9960_v5  ;;  %v8442_v33 = vld [vmem:[#allocation5 + $0x54] sm:$0xf0]  ;;  %v8441_v34 = vld [vmem:[#allocation5 + $0x54] sm:$0xf]  ;;  %v6610_v35 = vld [vmem:[#allocation5 + $0x58] sm:$0xf0]  ;;  %v6517_v37 = vor.u32 %v8433_v30, %v6514_v31 }
  0x85   : > { %v6609_v38 = vor.u32 %v8442_v33, %v6608_v32  ;;  %v6613_v39 = vor.u32 %v8441_v34, %v6610_v35  ;;  %v6520_v40 = vld [vmem:[#allocation5 + $0x20] sm:$0xf]  ;;  %v8436_v41 = vld [vmem:[#allocation5 + $0x24] sm:$0xf0]  ;;  %v8435_v42 = vld [vmem:[#allocation5 + $0x24] sm:$0xf] }
  0x86   : > { %v6522_v43 = vld [vmem:[#allocation5 + $0x28] sm:$0xf0]  ;;  %v6616_v44 = vld [vmem:[#allocation5 + $0x60] sm:$0xf]  ;;  %v8444_v45 = vld [vmem:[#allocation5 + $0x64] sm:$0xf0]  ;;  %v6521_v48 = vor.u32 %v8436_v41, %v6520_v40 }
  0x87   : > { %984 = vmatpush.bf16.msra.mxu0 %v9967_v6  ;;  %1099 = vmatpush.bf16.msra.mxu2 %v9967_v6  ;;  %v8443_v46 = vld [vmem:[#allocation5 + $0x64] sm:$0xf]  ;;  %v6618_v47 = vld [vmem:[#allocation5 + $0x68] sm:$0xf0]  ;;  %v6525_v49 = vor.u32 %v8435_v42, %v6522_v43  ;;  %v6617_v50 = vor.u32 %v8444_v45, %v6616_v44  ;;  %v6528_v52 = vld [vmem:[#allocation5 + $0x30] sm:$0xf] }
  0x88   : > { %1013 = vmatpush.bf16.msra.mxu1 %v9970_v7  ;;  %1128 = vmatpush.bf16.msra.mxu3 %v9970_v7  ;;  %v6621_v51 = vor.u32 %v8443_v46, %v6618_v47  ;;  %v8438_v53 = vld [vmem:[#allocation5 + $0x34] sm:$0xf0]  ;;  %v8437_v54 = vld [vmem:[#allocation5 + $0x34] sm:$0xf]  ;;  %v6530_v55 = vld [vmem:[#allocation5 + $0x38] sm:$0xf0] }
  0x89   : > { %v6624_v56 = vld [vmem:[#allocation5 + $0x70] sm:$0xf]  ;;  %v8446_v57 = vld [vmem:[#allocation5 + $0x74] sm:$0xf0]  ;;  %v8445_v58 = vld [vmem:[#allocation5 + $0x74] sm:$0xf]  ;;  %v6529_v60 = vor.u32 %v8438_v53, %v6528_v52  ;;  %v6533_v61 = vor.u32 %v8437_v54, %v6530_v55 }
  0x8a   : > { %v6626_v59 = vld [vmem:[#allocation5 + $0x78] sm:$0xf0]  ;;  %v6625_v62 = vor.u32 %v8446_v57, %v6624_v56  ;;  %v6632_v16 = vld [vmem:[#allocation5 + $0x80] sm:$0xf]  ;;  %v8448_v17 = vld [vmem:[#allocation5 + $0x84] sm:$0xf0] }
  0x8b   : > { %985 = vmatpush.bf16.msra.mxu0 %v9977_v8  ;;  %1100 = vmatpush.bf16.msra.mxu2 %v9977_v8  ;;  %v6629_v63 = vor.u32 %v8445_v58, %v6626_v59  ;;  %v8447_v18 = vld [vmem:[#allocation5 + $0x84] sm:$0xf]  ;;  %v6634_v19 = vld [vmem:[#allocation5 + $0x88] sm:$0xf0]  ;;  %v6664_v20 = vld [vmem:[#allocation5 + $0xc0] sm:$0xf] }
  0x8c   : > { %1014 = vmatpush.bf16.msra.mxu1 %v9980_v9  ;;  %1129 = vmatpush.bf16.msra.mxu3 %v9980_v9  ;;  %v8456_v21 = vld [vmem:[#allocation5 + $0xc4] sm:$0xf0]  ;;  %v8455_v22 = vld [vmem:[#allocation5 + $0xc4] sm:$0xf]  ;;  %v6666_v23 = vld [vmem:[#allocation5 + $0xc8] sm:$0xf0] }
  0x8d   : > { %v6640_v28 = vld [vmem:[#allocation5 + $0x90] sm:$0xf]  ;;  %v8450_v29 = vld [vmem:[#allocation5 + $0x94] sm:$0xf0]  ;;  %v8449_v30 = vld [vmem:[#allocation5 + $0x94] sm:$0xf] }
  0x8e   : > { %v6642_v31 = vld [vmem:[#allocation5 + $0x98] sm:$0xf0]  ;;  %v6672_v32 = vld [vmem:[#allocation5 + $0xd0] sm:$0xf]  ;;  %v8458_v33 = vld [vmem:[#allocation5 + $0xd4] sm:$0xf0] }
  0x8f   : > { %986 = vmatpush.bf16.msra.mxu0 %v9987_v10  ;;  %1101 = vmatpush.bf16.msra.mxu2 %v9987_v10  ;;  %v8457_v34 = vld [vmem:[#allocation5 + $0xd4] sm:$0xf]  ;;  %v6674_v35 = vld [vmem:[#allocation5 + $0xd8] sm:$0xf0]  ;;  %v6648_v40 = vld [vmem:[#allocation5 + $0xa0] sm:$0xf] }
  0x90   : > { %1015 = vmatpush.bf16.msra.mxu1 %v9990_v11  ;;  %1130 = vmatpush.bf16.msra.mxu3 %v9990_v11  ;;  %v8452_v41 = vld [vmem:[#allocation5 + $0xa4] sm:$0xf0]  ;;  %v8451_v42 = vld [vmem:[#allocation5 + $0xa4] sm:$0xf]  ;;  %v6650_v43 = vld [vmem:[#allocation5 + $0xa8] sm:$0xf0] }
  0x91   : > { %v6680_v44 = vld [vmem:[#allocation5 + $0xe0] sm:$0xf]  ;;  %v8460_v45 = vld [vmem:[#allocation5 + $0xe4] sm:$0xf0]  ;;  %v8459_v46 = vld [vmem:[#allocation5 + $0xe4] sm:$0xf] }
  0x92   : > { %v6682_v47 = vld [vmem:[#allocation5 + $0xe8] sm:$0xf0]  ;;  %v6656_v52 = vld [vmem:[#allocation5 + $0xb0] sm:$0xf]  ;;  %v8454_v53 = vld [vmem:[#allocation5 + $0xb4] sm:$0xf0] }
  0x93   : > { %987 = vmatpush.bf16.msra.mxu0 %v9997_v12  ;;  %1102 = vmatpush.bf16.msra.mxu2 %v9997_v12  ;;  %v8453_v54 = vld [vmem:[#allocation5 + $0xb4] sm:$0xf]  ;;  %v6658_v55 = vld [vmem:[#allocation5 + $0xb8] sm:$0xf0]  ;;  %v6688_v56 = vld [vmem:[#allocation5 + $0xf0] sm:$0xf] }
  0x94   : > { %1016 = vmatpush.bf16.msra.mxu1 %v10000_v13  ;;  %1131 = vmatpush.bf16.msra.mxu3 %v10000_v13  ;;  %v8462_v57 = vld [vmem:[#allocation5 + $0xf4] sm:$0xf0]  ;;  %v8461_v58 = vld [vmem:[#allocation5 + $0xf4] sm:$0xf]  ;;  %v6690_v59 = vld [vmem:[#allocation5 + $0xf8] sm:$0xf0] }
  0x97   : > { %988 = vmatpush.bf16.msra.mxu0 %v10005_v14  ;;  %1103 = vmatpush.bf16.msra.mxu2 %v10005_v14 }
  0x98   : > { %1017 = vmatpush.bf16.msra.mxu1 %v10008_v15  ;;  %1132 = vmatpush.bf16.msra.mxu3 %v10008_v15 }
  0x9a   : > { %989 = vmatmul.bf16.vlgmr.msra.gmra.mxu0 %v6505_v24  ;;  %1104 = vmatmul.bf16.vlgmr.msra.gmra.mxu2 %v6601_v26  ;;  %v6633_v24 = vor.u32 %v8448_v17, %v6632_v16  ;;  %v6665_v26 = vor.u32 %v8456_v21, %v6664_v20  ;;  %v6696_v16 = vld [vmem:[#allocation5 + $0x100] sm:$0xf]  ;;  %v8464_v17 = vld [vmem:[#allocation5 + $0x104] sm:$0xf0] }
  0x9b   : > { %1211 = vmatpush.bf16.msrb.mxu0 %v9939_v0  ;;  %1018 = vmatmul.bf16.vlgmr.msra.gmra.mxu1 %v6509_v25  ;;  %v6637_v25 = vor.u32 %v8447_v18, %v6634_v19  ;;  %v8463_v18 = vld [vmem:[#allocation5 + $0x104] sm:$0xf]  ;;  %v6698_v19 = vld [vmem:[#allocation5 + $0x108] sm:$0xf0]  ;;  %v6728_v20 = vld [vmem:[#allocation5 + $0x140] sm:$0xf] }
  0x9c   : > { %1240 = vmatpush.bf16.msrb.mxu1 %v9942_v1  ;;  %1133 = vmatmul.bf16.vlgmr.msra.gmra.mxu3 %v6605_v27  ;;  %v6669_v27 = vor.u32 %v8455_v22, %v6666_v23  ;;  %v8472_v21 = vld [vmem:[#allocation5 + $0x144] sm:$0xf0]  ;;  %v8471_v22 = vld [vmem:[#allocation5 + $0x144] sm:$0xf]  ;;  %v6730_v23 = vld [vmem:[#allocation5 + $0x148] sm:$0xf0] }
  0x9d   : > { %1326 = vmatpush.bf16.msrb.mxu2 %v9939_v0  ;;  %1355 = vmatpush.bf16.msrb.mxu3 %v9942_v1 }
  0x9f   : > { %1212 = vmatpush.bf16.msrb.mxu0 %v9947_v2 }
  0xa0   : > { %1241 = vmatpush.bf16.msrb.mxu1 %v9950_v3 }
  0xa1   : > { %1327 = vmatpush.bf16.msrb.mxu2 %v9947_v2  ;;  %1356 = vmatpush.bf16.msrb.mxu3 %v9950_v3 }
  0xa3   : > { %1213 = vmatpush.bf16.msrb.mxu0 %v9957_v4 }
  0xa4   : > { %1242 = vmatpush.bf16.msrb.mxu1 %v9960_v5 }
  0xa5   : > { %1328 = vmatpush.bf16.msrb.mxu2 %v9957_v4  ;;  %1357 = vmatpush.bf16.msrb.mxu3 %v9960_v5 }
  0xa7   : > { %1214 = vmatpush.bf16.msrb.mxu0 %v9967_v6 }
  0xa8   : > { %1243 = vmatpush.bf16.msrb.mxu1 %v9970_v7 }
  0xa9   : > { %1329 = vmatpush.bf16.msrb.mxu2 %v9967_v6  ;;  %1358 = vmatpush.bf16.msrb.mxu3 %v9970_v7 }
  0xaa   : > { %994 = vmatmul.bf16.gmra.mxu0 %v6513_v36  ;;  %1109 = vmatmul.bf16.gmra.mxu2 %v6609_v38  ;;  %v6641_v36 = vor.u32 %v8450_v29, %v6640_v28  ;;  %v6673_v38 = vor.u32 %v8458_v33, %v6672_v32  ;;  %v6729_v28 = vor.u32 %v8472_v21, %v6728_v20 }
  0xab   : > { %1215 = vmatpush.bf16.msrb.mxu0 %v9977_v8  ;;  %1023 = vmatmul.bf16.gmra.mxu1 %v6517_v37  ;;  %v6645_v37 = vor.u32 %v8449_v30, %v6642_v31  ;;  %v6733_v29 = vor.u32 %v8471_v22, %v6730_v23  ;;  %v8476_v22 = vld [vmem:[#allocation5 + $0x164] sm:$0xf0]  ;;  %v8475_v23 = vld [vmem:[#allocation5 + $0x164] sm:$0xf] }
  0xac   : > { %1244 = vmatpush.bf16.msrb.mxu1 %v9980_v9  ;;  %1138 = vmatmul.bf16.gmra.mxu3 %v6613_v39  ;;  %v6677_v39 = vor.u32 %v8457_v34, %v6674_v35 }
  0xad   : > { %1330 = vmatpush.bf16.msrb.mxu2 %v9977_v8  ;;  %1359 = vmatpush.bf16.msrb.mxu3 %v9980_v9 }
  0xaf   : > { %1216 = vmatpush.bf16.msrb.mxu0 %v9987_v10 }
  0xb0   : > { %1245 = vmatpush.bf16.msrb.mxu1 %v9990_v11 }
  0xb1   : > { %1331 = vmatpush.bf16.msrb.mxu2 %v9987_v10  ;;  %1360 = vmatpush.bf16.msrb.mxu3 %v9990_v11 }
  0xb3   : > { %1217 = vmatpush.bf16.msrb.mxu0 %v9997_v12 }
  0xb4   : > { %1246 = vmatpush.bf16.msrb.mxu1 %v10000_v13 }
  0xb5   : > { %1332 = vmatpush.bf16.msrb.mxu2 %v9997_v12  ;;  %1361 = vmatpush.bf16.msrb.mxu3 %v10000_v13 }
  0xb7   : > { %1218 = vmatpush.bf16.msrb.mxu0 %v10005_v14 }
  0xb8   : > { %1247 = vmatpush.bf16.msrb.mxu1 %v10008_v15 }
  0xb9   : > { %1333 = vmatpush.bf16.msrb.mxu2 %v10005_v14  ;;  %1362 = vmatpush.bf16.msrb.mxu3 %v10008_v15 }
  0xba   : > { %999 = vmatmul.bf16.gmra.mxu0 %v6521_v48  ;;  %1114 = vmatmul.bf16.gmra.mxu2 %v6617_v50  ;;  %v6649_v48 = vor.u32 %v8452_v41, %v6648_v40  ;;  %v6681_v50 = vor.u32 %v8460_v45, %v6680_v44  ;;  %v8466_v40 = vld [vmem:[#allocation5 + $0x114] sm:$0xf0]  ;;  %v8465_v41 = vld [vmem:[#allocation5 + $0x114] sm:$0xf] }
  0xbb   : > { %1441 = vmatpush.bf16.msra.mxu0 %v9939_v0  ;;  %1028 = vmatmul.bf16.gmra.mxu1 %v6525_v49  ;;  %v6653_v49 = vor.u32 %v8451_v42, %v6650_v43  ;;  %v6706_v42 = vld [vmem:[#allocation5 + $0x118] sm:$0xf0]  ;;  %v6736_v43 = vld [vmem:[#allocation5 + $0x150] sm:$0xf]  ;;  %v8474_v44 = vld [vmem:[#allocation5 + $0x154] sm:$0xf0] }
  0xbc   : > { %1470 = vmatpush.bf16.msra.mxu1 %v9942_v1  ;;  %1143 = vmatmul.bf16.gmra.mxu3 %v6621_v51  ;;  %v6685_v51 = vor.u32 %v8459_v46, %v6682_v47  ;;  %v8473_v45 = vld [vmem:[#allocation5 + $0x154] sm:$0xf]  ;;  %v6738_v46 = vld [vmem:[#allocation5 + $0x158] sm:$0xf0] }
  0xbd   : > { %1556 = vmatpush.bf16.msra.mxu2 %v9939_v0  ;;  %1585 = vmatpush.bf16.msra.mxu3 %v9942_v1 }
  0xbf   : > { %1442 = vmatpush.bf16.msra.mxu0 %v9947_v2 }
  0xc0   : > { %1471 = vmatpush.bf16.msra.mxu1 %v9950_v3 }
  0xc1   : > { %1557 = vmatpush.bf16.msra.mxu2 %v9947_v2  ;;  %1586 = vmatpush.bf16.msra.mxu3 %v9950_v3 }
  0xc3   : > { %1443 = vmatpush.bf16.msra.mxu0 %v9957_v4 }
  0xc4   : > { %1472 = vmatpush.bf16.msra.mxu1 %v9960_v5 }
  0xc5   : > { %1558 = vmatpush.bf16.msra.mxu2 %v9957_v4  ;;  %1587 = vmatpush.bf16.msra.mxu3 %v9960_v5 }
  0xc7   : > { %1444 = vmatpush.bf16.msra.mxu0 %v9967_v6 }
  0xc8   : > { %1473 = vmatpush.bf16.msra.mxu1 %v9970_v7 }
  0xc9   : > { %1559 = vmatpush.bf16.msra.mxu2 %v9967_v6  ;;  %1588 = vmatpush.bf16.msra.mxu3 %v9970_v7 }
  0xca   : > { %1004 = vmatmul.bf16.gmra.mxu0 %v6529_v60  ;;  %1119 = vmatmul.bf16.gmra.mxu2 %v6625_v62  ;;  %v6657_v60 = vor.u32 %v8454_v53, %v6656_v52  ;;  %v6689_v62 = vor.u32 %v8462_v57, %v6688_v56 }
  0xcb   : > { %1445 = vmatpush.bf16.msra.mxu0 %v9977_v8  ;;  %1033 = vmatmul.bf16.gmra.mxu1 %v6533_v61  ;;  %v6661_v61 = vor.u32 %v8453_v54, %v6658_v55  ;;  %v6737_v54 = vor.u32 %v8474_v44, %v6736_v43  ;;  %v6741_v55 = vor.u32 %v8473_v45, %v6738_v46  ;;  %v6720_v43 = vld [vmem:[#allocation5 + $0x130] sm:$0xf]  ;;  %v8470_v44 = vld [vmem:[#allocation5 + $0x134] sm:$0xf0]  ;;  %v8469_v45 = vld [vmem:[#allocation5 + $0x134] sm:$0xf] }
  0xcc   : > { %1474 = vmatpush.bf16.msra.mxu1 %v9980_v9  ;;  %1148 = vmatmul.bf16.gmra.mxu3 %v6629_v63  ;;  %v6693_v63 = vor.u32 %v8461_v58, %v6690_v59  ;;  %v6722_v46 = vld [vmem:[#allocation5 + $0x138] sm:$0xf0] }
  0xcd   : > { %1560 = vmatpush.bf16.msra.mxu2 %v9977_v8  ;;  %1589 = vmatpush.bf16.msra.mxu3 %v9980_v9 }
  0xcf   : > { %1446 = vmatpush.bf16.msra.mxu0 %v9987_v10 }
  0xd0   : > { %1475 = vmatpush.bf16.msra.mxu1 %v9990_v11 }
  0xd1   : > { %1561 = vmatpush.bf16.msra.mxu2 %v9987_v10  ;;  %1590 = vmatpush.bf16.msra.mxu3 %v9990_v11 }
  0xd3   : > { %1447 = vmatpush.bf16.msra.mxu0 %v9997_v12 }
  0xd4   : > { %1476 = vmatpush.bf16.msra.mxu1 %v10000_v13 }
  0xd5   : > { %1562 = vmatpush.bf16.msra.mxu2 %v9997_v12  ;;  %1591 = vmatpush.bf16.msra.mxu3 %v10000_v13 }
  0xd7   : > { %1448 = vmatpush.bf16.msra.mxu0 %v10005_v14 }
  0xd8   : > { %1477 = vmatpush.bf16.msra.mxu1 %v10008_v15 }
  0xd9   : > { %1563 = vmatpush.bf16.msra.mxu2 %v10005_v14  ;;  %1592 = vmatpush.bf16.msra.mxu3 %v10008_v15 }
  0xda   : > { %1219 = vmatmul.bf16.vlgmr.msrb.gmra.mxu0 %v6633_v24  ;;  %1334 = vmatmul.bf16.vlgmr.msrb.gmra.mxu2 %v6665_v26  ;;  %v6697_v24 = vor.u32 %v8464_v17, %v6696_v16  ;;  %v6712_v17 = vld [vmem:[#allocation5 + $0x120] sm:$0xf] }
  0xdb   : > { %1248 = vmatmul.bf16.vlgmr.msrb.gmra.mxu1 %v6637_v25  ;;  %1671 = vmatpush.bf16.msrb.mxu0 %v9939_v0  ;;  %v6701_v25 = vor.u32 %v8463_v18, %v6698_v19  ;;  %v8468_v18 = vld [vmem:[#allocation5 + $0x124] sm:$0xf0]  ;;  %v6714_v19 = vld [vmem:[#allocation5 + $0x128] sm:$0xf0] }
  0xdc   : > { %1363 = vmatmul.bf16.vlgmr.msrb.gmra.mxu3 %v6669_v27  ;;  %1700 = vmatpush.bf16.msrb.mxu1 %v9942_v1 }
  0xdd   : > { %1786 = vmatpush.bf16.msrb.mxu2 %v9939_v0  ;;  %1815 = vmatpush.bf16.msrb.mxu3 %v9942_v1 }
  0xdf   : > { %1672 = vmatpush.bf16.msrb.mxu0 %v9947_v2 }
  0xe0   : > { %1701 = vmatpush.bf16.msrb.mxu1 %v9950_v3 }
  0xe1   : > { %1787 = vmatpush.bf16.msrb.mxu2 %v9947_v2  ;;  %1816 = vmatpush.bf16.msrb.mxu3 %v9950_v3 }
  0xe3   : > { %1673 = vmatpush.bf16.msrb.mxu0 %v9957_v4 }
  0xe4   : > { %1702 = vmatpush.bf16.msrb.mxu1 %v9960_v5 }
  0xe5   : > { %1788 = vmatpush.bf16.msrb.mxu2 %v9957_v4  ;;  %1817 = vmatpush.bf16.msrb.mxu3 %v9960_v5 }
  0xe7   : > { %1674 = vmatpush.bf16.msrb.mxu0 %v9967_v6 }
  0xe8   : > { %1703 = vmatpush.bf16.msrb.mxu1 %v9970_v7 }
  0xe9   : > { %1789 = vmatpush.bf16.msrb.mxu2 %v9967_v6  ;;  %1818 = vmatpush.bf16.msrb.mxu3 %v9970_v7 }
  0xea   : > { %1224 = vmatmul.bf16.gmra.mxu0 %v6641_v36  ;;  %1339 = vmatmul.bf16.gmra.mxu2 %v6673_v38 }
  0xeb   : > { %1253 = vmatmul.bf16.gmra.mxu1 %v6645_v37  ;;  %1675 = vmatpush.bf16.msrb.mxu0 %v9977_v8 }
  0xec   : > { %1368 = vmatmul.bf16.gmra.mxu3 %v6677_v39  ;;  %1704 = vmatpush.bf16.msrb.mxu1 %v9980_v9  ;;  %v6704_v39 = vld [vmem:[#allocation5 + $0x110] sm:$0xf] }
  0xed   : > { %1790 = vmatpush.bf16.msrb.mxu2 %v9977_v8  ;;  %1819 = vmatpush.bf16.msrb.mxu3 %v9980_v9 }
  0xef   : > { %1676 = vmatpush.bf16.msrb.mxu0 %v9987_v10 }
  0xf0   : > { %1705 = vmatpush.bf16.msrb.mxu1 %v9990_v11 }
  0xf1   : > { %1791 = vmatpush.bf16.msrb.mxu2 %v9987_v10  ;;  %1820 = vmatpush.bf16.msrb.mxu3 %v9990_v11 }
  0xf3   : > { %1677 = vmatpush.bf16.msrb.mxu0 %v9997_v12 }
  0xf4   : > { %1706 = vmatpush.bf16.msrb.mxu1 %v10000_v13 }
  0xf5   : > { %1792 = vmatpush.bf16.msrb.mxu2 %v9997_v12  ;;  %1821 = vmatpush.bf16.msrb.mxu3 %v10000_v13 }
  0xf7   : > { %1678 = vmatpush.bf16.msrb.mxu0 %v10005_v14 }
  0xf8   : > { %1707 = vmatpush.bf16.msrb.mxu1 %v10008_v15 }
  0xf9   : > { %1793 = vmatpush.bf16.msrb.mxu2 %v10005_v14  ;;  %1822 = vmatpush.bf16.msrb.mxu3 %v10008_v15 }
  0xfa   : > { %1229 = vmatmul.bf16.gmra.mxu0 %v6649_v48  ;;  %1344 = vmatmul.bf16.gmra.mxu2 %v6681_v50  ;;  %v6709_v50 = vor.u32 %v8465_v41, %v6706_v42 }
  0xfb   : > { %1258 = vmatmul.bf16.gmra.mxu1 %v6653_v49  ;;  %v6705_v49 = vor.u32 %v8466_v40, %v6704_v39 }
  0xfc   : > { %1373 = vmatmul.bf16.gmra.mxu3 %v6685_v51 }
 0x10a   : > { %1234 = vmatmul.bf16.gmra.mxu0 %v6657_v60  ;;  %1349 = vmatmul.bf16.gmra.mxu2 %v6689_v62 }
 0x10b   : > { %1263 = vmatmul.bf16.gmra.mxu1 %v6661_v61 }
 0x10c   : > { %1378 = vmatmul.bf16.gmra.mxu3 %v6693_v63 }
 0x117   : > { %v990_v26 = vpop.f32.mrf.mxu0 }
 0x118   : > { %v1019_v27 = vpop.f32.mrf.mxu1 }
 0x119   : > { %v1020_v30 = vadd.f32 %v1019_v27, %v990_v26  ;;  %v6713_v26 = vor.u32 %v8468_v18, %v6712_v17 }
 0x11a   : > { %1449 = vmatmul.bf16.vlgmr.msra.gmra.mxu0 %v6697_v24  ;;  %1564 = vmatmul.bf16.vlgmr.msra.gmra.mxu2 %v6729_v28  ;;  %v6746_v24 = vld [vmem:[#allocation5 + $0x168] sm:$0xf0] }
 0x11b   : > { %1478 = vmatmul.bf16.vlgmr.msra.gmra.mxu1 %v6701_v25  ;;  %1901 = vmatpush.bf16.msra.mxu0 %v9939_v0  ;;  %v1039_v36 = vpack.c.bf16 %v1020_v30, %v1020_v30 }
 0x11c   : > { %1593 = vmatmul.bf16.vlgmr.msra.gmra.mxu3 %v6733_v29  ;;  %1930 = vmatpush.bf16.msra.mxu1 %v9942_v1 }
 0x11d   : > { %v1105_v31 = vpop.f32.mrf.mxu2  ;;  %v10118_v0 = vunpack.c.l.b16 %v1039_v36 }
 0x11f   : > { %v1134_v32 = vpop.f32.mrf.mxu3  ;;  %v992_v34 = vpop.f32.mrf.mxu0  ;;  %1902 = vmatpush.bf16.msra.mxu0 %v9947_v2 }
 0x120   : > { %v1135_v33 = vadd.f32 %v1134_v32, %v1105_v31  ;;  %v1021_v35 = vpop.f32.mrf.mxu1  ;;  %1931 = vmatpush.bf16.msra.mxu1 %v9950_v3 }
 0x121   : > { %v1022_v37 = vadd.f32 %v1021_v35, %v992_v34 }
 0x122   : > { %v1154_v2 = vpack.c.bf16 %v1135_v33, %v1135_v33  ;;  %v6749_v33 = vor.u32 %v8475_v23, %v6746_v24 }
 0x123   : > { %v1040_v38 = vpack.c.bf16 %v1022_v37, %v1022_v37  ;;  %1903 = vmatpush.bf16.msra.mxu0 %v9957_v4 }
 0x124   : > { %1932 = vmatpush.bf16.msra.mxu1 %v9960_v5  ;;  %v10128_v4 = vunpack.c.l.b16 %v1154_v2  ;;  %v6752_v2 = vld [vmem:[#allocation5 + $0x170] sm:$0xf] }
 0x125   : > { %v10120_v1 = vunpack.c.l.b16 %v1040_v38  ;;  %v1107_v47 = vpop.f32.mrf.mxu2 }
 0x127   : > { %v1983_v3 = vpack.c.b16 %v10120_v1, %v10118_v0  ;;  %v1136_v48 = vpop.f32.mrf.mxu3  ;;  %v995_v52 = vpop.f32.mrf.mxu0  ;;  %1904 = vmatpush.bf16.msra.mxu0 %v9967_v6  ;;  %v8541_v0 = vld [vmem:[#allocation7 + $0x130] sm:$0xff] }
 0x128   : > { %v1137_v51 = vadd.f32 %v1136_v48, %v1107_v47  ;;  %v1024_v53 = vpop.f32.mrf.mxu1  ;;  %1933 = vmatpush.bf16.msra.mxu1 %v9970_v7 }
 0x129   : > { %v1025_v56 = vadd.f32 %v1024_v53, %v995_v52 }
 0x12a   : > { %v1155_v5 = vpack.c.bf16 %v1137_v51, %v1137_v51  ;;  %1454 = vmatmul.bf16.gmra.mxu0 %v6705_v49  ;;  %1569 = vmatmul.bf16.gmra.mxu2 %v6737_v54  ;;  %v8478_v49 = vld [vmem:[#allocation5 + $0x174] sm:$0xf0]  ;;  %v6754_v51 = vld [vmem:[#allocation5 + $0x178] sm:$0xf0] }
 0x12b   : > { %1483 = vmatmul.bf16.gmra.mxu1 %v6709_v50  ;;  %1905 = vmatpush.bf16.msra.mxu0 %v9977_v8  ;;  %v1041_v62 = vpack.c.bf16 %v1025_v56, %v1025_v56  ;;  %v8467_v8 = vld [vmem:[#allocation5 + $0x124] sm:$0xf]  ;;  %v8477_v50 = vld [vmem:[#allocation5 + $0x174] sm:$0xf]  ;;  %v6725_v56 = vor.u32 %v8469_v45, %v6722_v46 }
 0x12c   : > { %v10130_v57 = vunpack.c.l.b16 %v1155_v5  ;;  %1598 = vmatmul.bf16.gmra.mxu3 %v6741_v55  ;;  %1934 = vmatpush.bf16.msra.mxu1 %v9980_v9  ;;  %v6744_v9 = vld [vmem:[#allocation5 + $0x160] sm:$0xf]  ;;  %v6717_v27 = vor.u32 %v8467_v8, %v6714_v19  ;;  %v6721_v55 = vor.u32 %v8470_v44, %v6720_v43 }
 0x12d   : > { %v1110_v59 = vpop.f32.mrf.mxu2  ;;  %v10138_v20 = vunpack.c.l.b16 %v1041_v62  ;;  %v6745_v32 = vor.u32 %v8476_v22, %v6744_v9 }
 0x12e   : > { %v2007_v58 = vpack.c.b16 %v10130_v57, %v10128_v4  ;;  %v8549_v4 = vld [vmem:[#allocation7 + $0x170] sm:$0xff] }
 0x12f   : > { %v1139_v6 = vpop.f32.mrf.mxu3  ;;  %v997_v7 = vpop.f32.mrf.mxu0  ;;  %1906 = vmatpush.bf16.msra.mxu0 %v9987_v10  ;;  %v6832_v57 = vld [vmem:[#allocation5 + $0x210] sm:$0xf] }
 0x130   : > { %v1140_v60 = vadd.f32 %v1139_v6, %v1110_v59  ;;  %v1026_v61 = vpop.f32.mrf.mxu1  ;;  %1935 = vmatpush.bf16.msra.mxu1 %v9990_v11 }
 0x131   : > { %v1027_v63 = vadd.f32 %v1026_v61, %v997_v7  ;;  %v6753_v7 = vor.u32 %v8478_v49, %v6752_v2  ;;  %v6757_v61 = vor.u32 %v8477_v50, %v6754_v51  ;;  %v8510_v50 = vld [vmem:[#allocation7 + $0x38] sm:$0xff] }
 0x132   : > { %v1156_v10 = vpack.c.bf16 %v1140_v60, %v1140_v60  ;;  %2763 = vmatpush.bf16.msra.mxu2 %v8510_v50  ;;  %v8506_v50 = vld [vmem:[#allocation7 + $0x18] sm:$0xff] }
 0x133   : > { %v1042_v16 = vpack.c.bf16 %v1027_v63, %v1027_v63  ;;  %1907 = vmatpush.bf16.msra.mxu0 %v9997_v12 }
 0x134   : > { %1936 = vmatpush.bf16.msra.mxu1 %v10000_v13  ;;  %v10148_v12 = vunpack.c.l.b16 %v1156_v10 }
 0x135   : > { %v10140_v21 = vunpack.c.l.b16 %v1042_v16  ;;  %v1112_v25 = vpop.f32.mrf.mxu2 }
 0x137   : > { %v1141_v11 = vpop.f32.mrf.mxu3  ;;  %v1984_v28 = vpack.c.b16 %v10140_v21, %v10138_v20  ;;  %v1000_v30 = vpop.f32.mrf.mxu0  ;;  %1908 = vmatpush.bf16.msra.mxu0 %v10005_v14  ;;  %v8545_v21 = vld [vmem:[#allocation7 + $0x150] sm:$0xff] }
 0x138   : > { %v1142_v29 = vadd.f32 %v1141_v11, %v1112_v25  ;;  %v1029_v31 = vpop.f32.mrf.mxu1  ;;  %1937 = vmatpush.bf16.msra.mxu1 %v10008_v15  ;;  %v6760_v11 = vld [vmem:[#allocation5 + $0x180] sm:$0xf] }
 0x139   : > { %v1030_v34 = vadd.f32 %v1029_v31, %v1000_v30  ;;  %v6792_v30 = vld [vmem:[#allocation5 + $0x1c0] sm:$0xf] }
 0x13a   : > { %v1157_v13 = vpack.c.bf16 %v1142_v29, %v1142_v29  ;;  %1459 = vmatmul.bf16.gmra.mxu0 %v6713_v26  ;;  %1574 = vmatmul.bf16.gmra.mxu2 %v6745_v32  ;;  %v8480_v26 = vld [vmem:[#allocation5 + $0x184] sm:$0xf0]  ;;  %v6762_v29 = vld [vmem:[#allocation5 + $0x188] sm:$0xf0] }
 0x13b   : > { %1488 = vmatmul.bf16.gmra.mxu1 %v6717_v27  ;;  %v1043_v14 = vpack.c.bf16 %v1030_v34, %v1030_v34  ;;  %v8479_v27 = vld [vmem:[#allocation5 + $0x184] sm:$0xf] }
 0x13c   : > { %v10150_v35 = vunpack.c.l.b16 %v1157_v13  ;;  %1603 = vmatmul.bf16.gmra.mxu3 %v6749_v33  ;;  %v8488_v33 = vld [vmem:[#allocation5 + $0x1c4] sm:$0xf0]  ;;  %v8487_v34 = vld [vmem:[#allocation5 + $0x1c4] sm:$0xf]  ;;  %v6794_v13 = vld [vmem:[#allocation5 + $0x1c8] sm:$0xf0] }
 0x13d   : > { %v1115_v37 = vpop.f32.mrf.mxu2  ;;  %v10154_v47 = vunpack.c.l.b16 %v1043_v14  ;;  %v6793_v44 = vor.u32 %v8488_v33, %v6792_v30  ;;  %v6797_v45 = vor.u32 %v8487_v34, %v6794_v13 }
 0x13e   : > { %v2008_v36 = vpack.c.b16 %v10150_v35, %v10148_v12  ;;  %v8500_v12 = vld [vmem:[#allocation5 + $0x224] sm:$0xf0] }
 0x13f   : > { %v1144_v38 = vpop.f32.mrf.mxu3  ;;  %v1002_v40 = vpop.f32.mrf.mxu0  ;;  %v8520_v35 = vld [vmem:[#allocation7 + $0x88] sm:$0xff] }
 0x140   : > { %v1145_v39 = vadd.f32 %v1144_v38, %v1115_v37  ;;  %v1031_v41 = vpop.f32.mrf.mxu1 }
 0x141   : > { %v1032_v42 = vadd.f32 %v1031_v41, %v1002_v40  ;;  %v6761_v40 = vor.u32 %v8480_v26, %v6760_v11  ;;  %v6765_v41 = vor.u32 %v8479_v27, %v6762_v29  ;;  %v8490_v26 = vld [vmem:[#allocation5 + $0x1d4] sm:$0xf0]  ;;  %v8489_v27 = vld [vmem:[#allocation5 + $0x1d4] sm:$0xf]  ;;  %v6802_v29 = vld [vmem:[#allocation5 + $0x1d8] sm:$0xf0] }
 0x142   : > { %v1158_v52 = vpack.c.bf16 %v1145_v39, %v1145_v39 }
 0x143   : > { %v1044_v15 = vpack.c.bf16 %v1032_v42, %v1032_v42 }
 0x144   : > { %v10160_v63 = vunpack.c.l.b16 %v1158_v52  ;;  %v8518_v52 = vld [vmem:[#allocation7 + $0x78] sm:$0xff] }
 0x145   : > { %v10156_v48 = vunpack.c.l.b16 %v1044_v15  ;;  %v1117_v53 = vpop.f32.mrf.mxu2  ;;  %2792 = vmatpush.bf16.msra.mxu3 %v8518_v52 }
 0x147   : > { %v1146_v54 = vpop.f32.mrf.mxu3  ;;  %v1985_v5 = vpack.c.b16 %v10156_v48, %v10154_v47  ;;  %v1005_v6 = vpop.f32.mrf.mxu0 }
 0x148   : > { %v1147_v59 = vadd.f32 %v1146_v54, %v1117_v53  ;;  %v1034_v60 = vpop.f32.mrf.mxu1 }
 0x149   : > { %v1035_v62 = vadd.f32 %v1034_v60, %v1005_v6 }
 0x14a   : > { %v1159_v16 = vpack.c.bf16 %v1147_v59, %v1147_v59  ;;  %1464 = vmatmul.bf16.gmra.mxu0 %v6721_v55  ;;  %1579 = vmatmul.bf16.gmra.mxu2 %v6753_v7  ;;  %v8517_v59 = vld [vmem:[#allocation7 + $0x70] sm:$0xff] }
 0x14b   : > { %1493 = vmatmul.bf16.gmra.mxu1 %v6725_v56  ;;  %v1045_v24 = vpack.c.bf16 %v1035_v62, %v1035_v62  ;;  %v8509_v56 = vld [vmem:[#allocation7 + $0x30] sm:$0xff]  ;;  %2793 = vmatpush.bf16.msra.mxu3 %v8517_v59 }
 0x14c   : > { %v10162_v17 = vunpack.c.l.b16 %v1159_v16  ;;  %1608 = vmatmul.bf16.gmra.mxu3 %v6757_v61  ;;  %2764 = vmatpush.bf16.msra.mxu2 %v8509_v56  ;;  %v6768_v16 = vld [vmem:[#allocation5 + $0x190] sm:$0xf] }
 0x14d   : > { %v1120_v8 = vpop.f32.mrf.mxu2  ;;  %v10166_v31 = vunpack.c.l.b16 %v1045_v24  ;;  %v6770_v24 = vld [vmem:[#allocation5 + $0x198] sm:$0xf0] }
 0x14e   : > { %v2009_v18 = vpack.c.b16 %v10162_v17, %v10160_v63 }
 0x14f   : > { %v1149_v19 = vpop.f32.mrf.mxu3  ;;  %v1007_v22 = vpop.f32.mrf.mxu0 }
 0x150   : > { %v1150_v9 = vadd.f32 %v1149_v19, %v1120_v8  ;;  %v1036_v23 = vpop.f32.mrf.mxu1  ;;  %v8482_v19 = vld [vmem:[#allocation5 + $0x194] sm:$0xf0] }
 0x151   : > { %v1037_v10 = vadd.f32 %v1036_v23, %v1007_v22  ;;  %v8516_v22 = vld [vmem:[#allocation7 + $0x68] sm:$0xff]  ;;  %v8481_v23 = vld [vmem:[#allocation5 + $0x194] sm:$0xf] }
 0x152   : > { %v1160_v37 = vpack.c.bf16 %v1150_v9, %v1150_v9  ;;  %v8508_v9 = vld [vmem:[#allocation7 + $0x28] sm:$0xff]  ;;  %2794 = vmatpush.bf16.msra.mxu3 %v8516_v22 }
 0x153   : > { %v1046_v25 = vpack.c.bf16 %v1037_v10, %v1037_v10  ;;  %v6800_v10 = vld [vmem:[#allocation5 + $0x1d0] sm:$0xf]  ;;  %2765 = vmatpush.bf16.msra.mxu2 %v8508_v9  ;;  %v8484_v22 = vld [vmem:[#allocation5 + $0x1a4] sm:$0xf0] }
 0x154   : > { %v10172_v2 = vunpack.c.l.b16 %v1160_v37  ;;  %v6769_v37 = vor.u32 %v8482_v19, %v6768_v16  ;;  %v6776_v19 = vld [vmem:[#allocation5 + $0x1a0] sm:$0xf] }
 0x155   : > { %v10168_v32 = vunpack.c.l.b16 %v1046_v25  ;;  %v1122_v38 = vpop.f32.mrf.mxu2 }
 0x157   : > { %v1151_v39 = vpop.f32.mrf.mxu3  ;;  %v1986_v14 = vpack.c.b16 %v10168_v32, %v10166_v31  ;;  %v1220_v15 = vpop.f32.mrf.mxu0 }
 0x158   : > { %v1152_v42 = vadd.f32 %v1151_v39, %v1122_v38  ;;  %v1249_v43 = vpop.f32.mrf.mxu1  ;;  %v6773_v38 = vor.u32 %v8481_v23, %v6770_v24  ;;  %v8507_v39 = vld [vmem:[#allocation7 + $0x20] sm:$0xff]  ;;  %v8504_v23 = vld [vmem:[#allocation7 + $0x8] sm:$0xff] }
 0x159   : > { %v1250_v46 = vadd.f32 %v1249_v43, %v1220_v15  ;;  %v6801_v43 = vor.u32 %v8490_v26, %v6800_v10  ;;  %2766 = vmatpush.bf16.msra.mxu2 %v8507_v39  ;;  %v8512_v24 = vld [vmem:[#allocation7 + $0x48] sm:$0xff]  ;;  %v8483_v10 = vld [vmem:[#allocation5 + $0x1a4] sm:$0xf] }
 0x15a   : > { %v1161_v49 = vpack.c.bf16 %v1152_v42, %v1152_v42  ;;  %1679 = vmatmul.bf16.vlgmr.msrb.gmra.mxu0 %v6761_v40  ;;  %1794 = vmatmul.bf16.vlgmr.msrb.gmra.mxu2 %v6793_v44  ;;  %v8515_v40 = vld [vmem:[#allocation7 + $0x60] sm:$0xff]  ;;  %v6805_v44 = vor.u32 %v8489_v27, %v6802_v29  ;;  %v6778_v26 = vld [vmem:[#allocation5 + $0x1a8] sm:$0xf0] }
 0x15b   : > { %1708 = vmatmul.bf16.vlgmr.msrb.gmra.mxu1 %v6765_v41  ;;  %v1269_v61 = vpack.c.bf16 %v1250_v46, %v1250_v46  ;;  %2795 = vmatpush.bf16.msra.mxu3 %v8515_v40  ;;  %v6808_v27 = vld [vmem:[#allocation5 + $0x1e0] sm:$0xf] }
 0x15c   : > { %v10174_v51 = vunpack.c.l.b16 %v1161_v49  ;;  %1823 = vmatmul.bf16.vlgmr.msrb.gmra.mxu3 %v6797_v45 }
 0x15d   : > { %v1335_v54 = vpop.f32.mrf.mxu2  ;;  %v10178_v25 = vunpack.c.l.b16 %v1269_v61  ;;  %2767 = vmatpush.bf16.msra.mxu2 %v8506_v50 }
 0x15e   : > { %v2010_v53 = vpack.c.b16 %v10174_v51, %v10172_v2 }
 0x15f   : > { %v1364_v55 = vpop.f32.mrf.mxu3  ;;  %v1222_v60 = vpop.f32.mrf.mxu0 }
 0x160   : > { %v1365_v6 = vadd.f32 %v1364_v55, %v1335_v54  ;;  %v1251_v7 = vpop.f32.mrf.mxu1  ;;  %v8514_v54 = vld [vmem:[#allocation7 + $0x58] sm:$0xff] }
 0x161   : > { %v1252_v62 = vadd.f32 %v1251_v7, %v1222_v60  ;;  %2796 = vmatpush.bf16.msra.mxu3 %v8514_v54  ;;  %v8513_v60 = vld [vmem:[#allocation7 + $0x50] sm:$0xff] }
 0x162   : > { %v1384_v30 = vpack.c.bf16 %v1365_v6, %v1365_v6  ;;  %v8505_v6 = vld [vmem:[#allocation7 + $0x10] sm:$0xff] }
 0x163   : > { %v1270_v8 = vpack.c.bf16 %v1252_v62, %v1252_v62  ;;  %2768 = vmatpush.bf16.msra.mxu2 %v8505_v6 }
 0x164   : > { %v10184_v46 = vunpack.c.l.b16 %v1384_v30 }
 0x165   : > { %v10180_v11 = vunpack.c.l.b16 %v1270_v8  ;;  %v1337_v34 = vpop.f32.mrf.mxu2  ;;  %2797 = vmatpush.bf16.msra.mxu3 %v8513_v60 }
 0x167   : > { %v2031_v33 = vpack.c.b16 %v10180_v11, %v10178_v25  ;;  %v1366_v13 = vpop.f32.mrf.mxu3  ;;  %v1225_v42 = vpop.f32.mrf.mxu0  ;;  %2769 = vmatpush.bf16.msra.mxu2 %v8504_v23 }
 0x168   : > { %v1367_v41 = vadd.f32 %v1366_v13, %v1337_v34  ;;  %v1254_v15 = vpop.f32.mrf.mxu1  ;;  %v8492_v34 = vld [vmem:[#allocation5 + $0x1e4] sm:$0xf0]  ;;  %v8491_v13 = vld [vmem:[#allocation5 + $0x1e4] sm:$0xf] }
 0x169   : > { %v1255_v45 = vadd.f32 %v1254_v15, %v1225_v42  ;;  %2798 = vmatpush.bf16.msra.mxu3 %v8512_v24  ;;  %v6781_v42 = vor.u32 %v8483_v10, %v6778_v26  ;;  %v8503_v15 = vld [vmem:[#allocation7] sm:$0xff]  ;;  %v6809_v54 = vor.u32 %v8492_v34, %v6808_v27  ;;  %v6784_v10 = vld [vmem:[#allocation5 + $0x1b0] sm:$0xf]  ;;  %v8486_v26 = vld [vmem:[#allocation5 + $0x1b4] sm:$0xf0] }
 0x16a   : > { %v1385_v49 = vpack.c.bf16 %v1367_v41, %v1367_v41  ;;  %1684 = vmatmul.bf16.gmra.mxu0 %v6769_v37  ;;  %1799 = vmatmul.bf16.gmra.mxu2 %v6801_v43  ;;  %v6810_v37 = vld [vmem:[#allocation5 + $0x1e8] sm:$0xf0]  ;;  %v6777_v41 = vor.u32 %v8484_v22, %v6776_v19  ;;  %v8511_v43 = vld [vmem:[#allocation7 + $0x40] sm:$0xff]  ;;  %v8485_v27 = vld [vmem:[#allocation5 + $0x1b4] sm:$0xf] }
 0x16b   : > { %1713 = vmatmul.bf16.gmra.mxu1 %v6773_v38  ;;  %v1271_v16 = vpack.c.bf16 %v1255_v45, %v1255_v45  ;;  %2770 = vmatpush.bf16.msra.mxu2 %v8503_v15  ;;  %v6786_v34 = vld [vmem:[#allocation5 + $0x1b8] sm:$0xf0] }
 0x16c   : > { %v10186_v52 = vunpack.c.l.b16 %v1385_v49  ;;  %1828 = vmatmul.bf16.gmra.mxu3 %v6805_v44 }
 0x16d   : > { %v1340_v56 = vpop.f32.mrf.mxu2  ;;  %v10190_v29 = vunpack.c.l.b16 %v1271_v16  ;;  %2799 = vmatpush.bf16.msra.mxu3 %v8511_v43 }
 0x16e   : > { %v2055_v55 = vpack.c.b16 %v10186_v52, %v10184_v46  ;;  %v8557_v46 = vld [vmem:[#allocation7 + $0x1b0] sm:$0xff] }
 0x16f   : > { %v1369_v59 = vpop.f32.mrf.mxu3  ;;  %v1227_v61 = vpop.f32.mrf.mxu0  ;;  %v8565_v52 = vld [vmem:[#allocation7 + $0x1f0] sm:$0xff] }
 0x170   : > { %v1370_v7 = vadd.f32 %v1369_v59, %v1340_v56  ;;  %v1256_v62 = vpop.f32.mrf.mxu1  ;;  %v6813_v56 = vor.u32 %v8491_v13, %v6810_v37  ;;  %v6816_v13 = vld [vmem:[#allocation5 + $0x1f0] sm:$0xf] }
 0x171   : > { %v1257_v8 = vadd.f32 %v1256_v62, %v1227_v61 }
 0x172   : > { %v1386_v38 = vpack.c.bf16 %v1370_v7, %v1370_v7 }
 0x173   : > { %v1272_v9 = vpack.c.bf16 %v1257_v8, %v1257_v8 }
 0x174   : > { %v10196_v6 = vunpack.c.l.b16 %v1386_v38 }
 0x175   : > { %v10192_v30 = vunpack.c.l.b16 %v1272_v9  ;;  %v1342_v39 = vpop.f32.mrf.mxu2 }
 0x177   : > { %v1371_v40 = vpop.f32.mrf.mxu3  ;;  %v2032_v44 = vpack.c.b16 %v10192_v30, %v10190_v29  ;;  %v1230_v49 = vpop.f32.mrf.mxu0 }
 0x178   : > { %v1372_v45 = vadd.f32 %v1371_v40, %v1342_v39  ;;  %v1259_v50 = vpop.f32.mrf.mxu1  ;;  %v8494_v39 = vld [vmem:[#allocation5 + $0x1f4] sm:$0xf0]  ;;  %v8493_v40 = vld [vmem:[#allocation5 + $0x1f4] sm:$0xf] }
 0x179   : > { %v1260_v59 = vadd.f32 %v1259_v50, %v1230_v49  ;;  %v6789_v49 = vor.u32 %v8485_v27, %v6786_v34  ;;  %v8543_v50 = vld [vmem:[#allocation7 + $0x140] sm:$0xff] }
 0x17a   : > { %v1387_v60 = vpack.c.bf16 %v1372_v45, %v1372_v45  ;;  %1689 = vmatmul.bf16.gmra.mxu0 %v6777_v41  ;;  %1804 = vmatmul.bf16.gmra.mxu2 %v6809_v54  ;;  %v6818_v41 = vld [vmem:[#allocation5 + $0x1f8] sm:$0xf0]  ;;  %v6785_v45 = vor.u32 %v8486_v26, %v6784_v10 }
 0x17b   : > { %1718 = vmatmul.bf16.gmra.mxu1 %v6781_v42  ;;  %v1273_v22 = vpack.c.bf16 %v1260_v59, %v1260_v59 }
 0x17c   : > { %v10198_v7 = vunpack.c.l.b16 %v1387_v60  ;;  %1833 = vmatmul.bf16.gmra.mxu3 %v6813_v56  ;;  %v6817_v60 = vor.u32 %v8494_v39, %v6816_v13 }
 0x17d   : > { %v1345_v62 = vpop.f32.mrf.mxu2  ;;  %v10202_v37 = vunpack.c.l.b16 %v1273_v22 }
 0x17e   : > { %v2056_v61 = vpack.c.b16 %v10198_v7, %v10196_v6  ;;  %v8553_v6 = vld [vmem:[#allocation7 + $0x190] sm:$0xff] }
 0x17f   : > { %v1374_v16 = vpop.f32.mrf.mxu3  ;;  %v1232_v19 = vpop.f32.mrf.mxu0  ;;  %v8561_v7 = vld [vmem:[#allocation7 + $0x1d0] sm:$0xff] }
 0x180   : > { %v1375_v8 = vadd.f32 %v1374_v16, %v1345_v62  ;;  %v1261_v9 = vpop.f32.mrf.mxu1  ;;  %v6821_v62 = vor.u32 %v8493_v40, %v6818_v41  ;;  %v6824_v40 = vld [vmem:[#allocation5 + $0x200] sm:$0xf]  ;;  %v8496_v41 = vld [vmem:[#allocation5 + $0x204] sm:$0xf0] }
 0x181   : > { %v1262_v23 = vadd.f32 %v1261_v9, %v1232_v19 }
 0x182   : > { %v1388_v42 = vpack.c.bf16 %v1375_v8, %v1375_v8 }
 0x183   : > { %v1274_v24 = vpack.c.bf16 %v1262_v23, %v1262_v23 }
 0x184   : > { %v10208_v19 = vunpack.c.l.b16 %v1388_v42  ;;  %v8495_v42 = vld [vmem:[#allocation5 + $0x204] sm:$0xf] }
 0x185   : > { %v10204_v38 = vunpack.c.l.b16 %v1274_v24  ;;  %v1347_v15 = vpop.f32.mrf.mxu2 }
 0x187   : > { %v1376_v43 = vpop.f32.mrf.mxu3  ;;  %v1235_v56 = vpop.f32.mrf.mxu0 }
 0x188   : > { %v1377_v54 = vadd.f32 %v1376_v43, %v1347_v15  ;;  %v1264_v59 = vpop.f32.mrf.mxu1  ;;  %v6826_v15 = vld [vmem:[#allocation5 + $0x208] sm:$0xf0] }
 0x189   : > { %v1265_v16 = vadd.f32 %v1264_v59, %v1235_v56  ;;  %v6825_v59 = vor.u32 %v8496_v41, %v6824_v40 }
 0x18a   : > { %v1389_v9 = vpack.c.bf16 %v1377_v54, %v1377_v54  ;;  %1694 = vmatmul.bf16.gmra.mxu0 %v6785_v45  ;;  %1809 = vmatmul.bf16.gmra.mxu2 %v6817_v60  ;;  %v6829_v60 = vor.u32 %v8495_v42, %v6826_v15  ;;  %v8525_v15 = vld [vmem:[#allocation7 + $0xb0] sm:$0xff] }
 0x18b   : > { %1723 = vmatmul.bf16.gmra.mxu1 %v6789_v49  ;;  %v1275_v34 = vpack.c.bf16 %v1265_v16, %v1265_v16 }
 0x18c   : > { %v10210_v22 = vunpack.c.l.b16 %v1389_v9  ;;  %1838 = vmatmul.bf16.gmra.mxu3 %v6821_v62  ;;  %v8547_v62 = vld [vmem:[#allocation7 + $0x160] sm:$0xff] }
 0x18d   : > { %v1350_v23 = vpop.f32.mrf.mxu2  ;;  %v10214_v43 = vunpack.c.l.b16 %v1275_v34  ;;  %v8534_v34 = vld [vmem:[#allocation7 + $0xf8] sm:$0xff] }
 0x18e   : > { %2850 = vmatpush.bf16.msrb.mxu1 %v8534_v34 }
 0x18f   : > { %v1379_v24 = vpop.f32.mrf.mxu3  ;;  %v1237_v26 = vpop.f32.mrf.mxu0 }
 0x190   : > { %v1380_v10 = vadd.f32 %v1379_v24, %v1350_v23  ;;  %v1266_v27 = vpop.f32.mrf.mxu1 }
 0x191   : > { %v1267_v13 = vadd.f32 %v1266_v27, %v1237_v26  ;;  %v8526_v27 = vld [vmem:[#allocation7 + $0xb8] sm:$0xff] }
 0x192   : > { %v1390_v49 = vpack.c.bf16 %v1380_v10, %v1380_v10  ;;  %v8542_v10 = vld [vmem:[#allocation7 + $0x138] sm:$0xff]  ;;  %2821 = vmatpush.bf16.msrb.mxu0 %v8526_v27 }
 0x193   : > { %v1276_v39 = vpack.c.bf16 %v1267_v13, %v1267_v13  ;;  %2879 = vmatpush.bf16.msrb.mxu2 %v8542_v10 }
 0x194   : > { %v10224_v24 = vunpack.c.l.b16 %v1390_v49  ;;  %v8533_v49 = vld [vmem:[#allocation7 + $0xf0] sm:$0xff] }
 0x195   : > { %v10216_v45 = vunpack.c.l.b16 %v1276_v39  ;;  %v1352_v54 = vpop.f32.mrf.mxu2  ;;  %v8550_v39 = vld [vmem:[#allocation7 + $0x178] sm:$0xff]  ;;  %2851 = vmatpush.bf16.msrb.mxu1 %v8533_v49  ;;  %v8531_v49 = vld [vmem:[#allocation7 + $0xe0] sm:$0xff] }
 0x196   : > { %2908 = vmatpush.bf16.msrb.mxu3 %v8550_v39  ;;  %2822 = vmatpush.bf16.msrb.mxu0 %v8525_v15  ;;  %v8523_v15 = vld [vmem:[#allocation7 + $0xa0] sm:$0xff] }
 0x197   : > { %v1381_v56 = vpop.f32.mrf.mxu3  ;;  %v10220_v16 = vpop.f32.mrf.mxu0  ;;  %2880 = vmatpush.bf16.msrb.mxu2 %v8541_v0  ;;  %v8539_v0 = vld [vmem:[#allocation7 + $0x120] sm:$0xff] }
 0x198   : > { %v1382_v9 = vadd.f32 %v1381_v56, %v1352_v54  ;;  %v10222_v23 = vpop.f32.mrf.mxu1  ;;  %v8524_v54 = vld [vmem:[#allocation7 + $0xa8] sm:$0xff] }
 0x199   : > { %v8532_v56 = vld [vmem:[#allocation7 + $0xe8] sm:$0xff]  ;;  %v1480_v31 = vadd.f32 %v10222_v23, %v10220_v16 }
 0x19a   : > { %v1391_v26 = vpack.c.bf16 %v1382_v9, %v1382_v9  ;;  %1909 = vmatmul.bf16.vlgmr.msra.gmra.mxu0 %v6825_v59  ;;  %2771 = vmatmul.bf16.vlgmr.msra.gmra.mxu2 %v1983_v3  ;;  %v8540_v59 = vld [vmem:[#allocation7 + $0x128] sm:$0xff]  ;;  %v6834_v9 = vld [vmem:[#allocation5 + $0x218] sm:$0xf0] }
 0x19b   : > { %1938 = vmatmul.bf16.vlgmr.msra.gmra.mxu1 %v6829_v60  ;;  %2909 = vmatpush.bf16.msrb.mxu3 %v8549_v4  ;;  %v8497_v60 = vld [vmem:[#allocation5 + $0x214] sm:$0xf] }
 0x19c   : > { %v10226_v13 = vunpack.c.l.b16 %v1391_v26  ;;  %2800 = vmatmul.bf16.vlgmr.msra.gmra.mxu3 %v2007_v58  ;;  %v8498_v58 = vld [vmem:[#allocation5 + $0x214] sm:$0xf0]  ;;  %v8548_v26 = vld [vmem:[#allocation7 + $0x168] sm:$0xff]  ;;  %2823 = vmatpush.bf16.msrb.mxu0 %v8524_v54  ;;  %v6837_v39 = vor.u32 %v8497_v60, %v6834_v9  ;;  %v8521_v60 = vld [vmem:[#allocation7 + $0x90] sm:$0xff] }
 0x19d   : > { %v10236_v41 = vpop.f32.mrf.mxu2  ;;  %2852 = vmatpush.bf16.msrb.mxu1 %v8532_v56  ;;  %2881 = vmatpush.bf16.msrb.mxu2 %v8540_v59  ;;  %v6833_v10 = vor.u32 %v8498_v58, %v6832_v57  ;;  %v8522_v54 = vld [vmem:[#allocation7 + $0x98] sm:$0xff]  ;;  %v8529_v9 = vld [vmem:[#allocation7 + $0xd0] sm:$0xff] }
 0x19e   : > { %v8530_v56 = vld [vmem:[#allocation7 + $0xd8] sm:$0xff] }
 0x19f   : > { %v10238_v42 = vpop.f32.mrf.mxu3  ;;  %v10240_v1 = vpop.f32.mrf.mxu0  ;;  %2910 = vmatpush.bf16.msrb.mxu3 %v8548_v26  ;;  %v8538_v59 = vld [vmem:[#allocation7 + $0x118] sm:$0xff]  ;;  %v8537_v26 = vld [vmem:[#allocation7 + $0x110] sm:$0xff] }
 0x1a0   : > { %v10242_v3 = vpop.f32.mrf.mxu1  ;;  %2824 = vmatpush.bf16.msrb.mxu0 %v8523_v15  ;;  %v8546_v57 = vld [vmem:[#allocation7 + $0x158] sm:$0xff]  ;;  %v8499_v15 = vld [vmem:[#allocation5 + $0x224] sm:$0xf] }
 0x1a1   : > { %2853 = vmatpush.bf16.msrb.mxu1 %v8531_v49  ;;  %2882 = vmatpush.bf16.msrb.mxu2 %v8539_v0  ;;  %v6842_v49 = vld [vmem:[#allocation5 + $0x228] sm:$0xf0] }
 0x1a2   : > { %v8544_v0 = vld [vmem:[#allocation7 + $0x148] sm:$0xff] }
 0x1a3   : > { %2911 = vmatpush.bf16.msrb.mxu3 %v8547_v62 }
 0x1a4   : > { %2825 = vmatpush.bf16.msrb.mxu0 %v8522_v54 }
 0x1a5   : > { %v10244_v27 = vpop.f32.mrf.mxu2  ;;  %2854 = vmatpush.bf16.msrb.mxu1 %v8530_v56  ;;  %2883 = vmatpush.bf16.msrb.mxu2 %v8538_v59 }
 0x1a7   : > { %v10246_v34 = vpop.f32.mrf.mxu3  ;;  %v10248_v4 = vpop.f32.mrf.mxu0  ;;  %2912 = vmatpush.bf16.msrb.mxu3 %v8546_v57  ;;  %v6845_v57 = vor.u32 %v8499_v15, %v6842_v49  ;;  %v8501_v15 = vld [vmem:[#allocation5 + $0x234] sm:$0xf]  ;;  %v6850_v49 = vld [vmem:[#allocation5 + $0x238] sm:$0xf0] }
 0x1a8   : > { %v10250_v40 = vpop.f32.mrf.mxu1  ;;  %2826 = vmatpush.bf16.msrb.mxu0 %v8521_v60  ;;  %v8519_v60 = vld [vmem:[#allocation7 + $0x80] sm:$0xff] }
 0x1a9   : > { %2855 = vmatpush.bf16.msrb.mxu1 %v8529_v9  ;;  %2884 = vmatpush.bf16.msrb.mxu2 %v8537_v26  ;;  %v8527_v9 = vld [vmem:[#allocation7 + $0xc0] sm:$0xff] }
 0x1aa   : > { %1914 = vmatmul.bf16.gmra.mxu0 %v6833_v10  ;;  %2776 = vmatmul.bf16.gmra.mxu2 %v1984_v28  ;;  %v6840_v28 = vld [vmem:[#allocation5 + $0x220] sm:$0xf] }
 0x1ab   : > { %1943 = vmatmul.bf16.gmra.mxu1 %v6837_v39  ;;  %2913 = vmatpush.bf16.msrb.mxu3 %v8545_v21  ;;  %v8536_v39 = vld [vmem:[#allocation7 + $0x108] sm:$0xff]  ;;  %v6841_v59 = vor.u32 %v8500_v12, %v6840_v28  ;;  %v8535_v26 = vld [vmem:[#allocation7 + $0x100] sm:$0xff] }
 0x1ac   : > { %2805 = vmatmul.bf16.gmra.mxu3 %v2008_v36  ;;  %v8528_v36 = vld [vmem:[#allocation7 + $0xc8] sm:$0xff]  ;;  %2827 = vmatpush.bf16.msrb.mxu0 %v8520_v35 }
 0x1ad   : > { %v10258_v58 = vpop.f32.mrf.mxu2  ;;  %2856 = vmatpush.bf16.msrb.mxu1 %v8528_v36  ;;  %2885 = vmatpush.bf16.msrb.mxu2 %v8536_v39  ;;  %v6848_v39 = vld [vmem:[#allocation5 + $0x230] sm:$0xf] }
 0x1af   : > { %v10260_v62 = vpop.f32.mrf.mxu3  ;;  %v10262_v10 = vpop.f32.mrf.mxu0  ;;  %2914 = vmatpush.bf16.msrb.mxu3 %v8544_v0 }
 0x1b0   : > { %v10264_v20 = vpop.f32.mrf.mxu1  ;;  %2828 = vmatpush.bf16.msrb.mxu0 %v8519_v60 }
 0x1b1   : > { %2857 = vmatpush.bf16.msrb.mxu1 %v8527_v9  ;;  %2886 = vmatpush.bf16.msrb.mxu2 %v8535_v26 }
 0x1b3   : > { %2915 = vmatpush.bf16.msrb.mxu3 %v8543_v50  ;;  %v8502_v50 = vld [vmem:[#allocation5 + $0x234] sm:$0xf0] }
 0x1b4   : > { %v6849_v48 = vor.u32 %v8502_v50, %v6848_v39 }
 0x1b5   : > { %v10266_v54 = vpop.f32.mrf.mxu2 }
 0x1b7   : > { %v10268_v56 = vpop.f32.mrf.mxu3  ;;  %v10270_v21 = vpop.f32.mrf.mxu0 }
 0x1b8   : > { %v10272_v8 = vpop.f32.mrf.mxu1  ;;  %v1602_v25 = vadd.f32 %v10268_v56, %v10266_v54  ;;  %v8564_v54 = vld [vmem:[#allocation7 + $0x1e8] sm:$0xff] }
 0x1ba   : > { %1919 = vmatmul.bf16.gmra.mxu0 %v6841_v59  ;;  %2781 = vmatmul.bf16.gmra.mxu2 %v1985_v5  ;;  %v6853_v5 = vor.u32 %v8501_v15, %v6850_v49  ;;  %v1482_v59 = vadd.f32 %v10242_v3, %v10240_v1  ;;  %v8558_v15 = vld [vmem:[#allocation7 + $0x1b8] sm:$0xff] }
 0x1bb   : > { %1948 = vmatmul.bf16.gmra.mxu1 %v6845_v57  ;;  %v1597_v57 = vadd.f32 %v10246_v34, %v10244_v27  ;;  %v8566_v49 = vld [vmem:[#allocation7 + $0x1f8] sm:$0xff]  ;;  %2937 = vmatpush.bf16.msra.mxu0 %v8558_v15 }
 0x1bc   : > { %2810 = vmatmul.bf16.gmra.mxu3 %v2009_v18  ;;  %v1595_v18 = vadd.f32 %v10238_v42, %v10236_v41  ;;  %v1500_v51 = vpack.c.bf16 %v1482_v59, %v1482_v59  ;;  %v1499_v41 = vpack.c.bf16 %v1480_v31, %v1480_v31  ;;  %2966 = vmatpush.bf16.msra.mxu1 %v8566_v49  ;;  %v8562_v15 = vld [vmem:[#allocation7 + $0x1d8] sm:$0xff]  ;;  %v8573_v49 = vld [vmem:[#allocation7 + $0x230] sm:$0xff] }
 0x1bd   : > { %v10280_v28 = vpop.f32.mrf.mxu2 }
 0x1be   : > { %v1614_v2 = vpack.c.bf16 %v1595_v18, %v1595_v18  ;;  %v2072_v1 = vunpack.c.l.b16 %v1500_v51  ;;  %v2071_v34 = vunpack.c.l.b16 %v1499_v41 }
 0x1bf   : > { %v10282_v12 = vpop.f32.mrf.mxu3  ;;  %v10284_v35 = vpop.f32.mrf.mxu0  ;;  %2938 = vmatpush.bf16.msra.mxu0 %v8557_v46 }
 0x1c0   : > { %v10286_v36 = vpop.f32.mrf.mxu1  ;;  %v2095_v42 = vunpack.c.l.b16 %v1614_v2  ;;  %v2079_v16 = vpack.c.b16 %v2072_v1, %v2071_v34  ;;  %2967 = vmatpush.bf16.msra.mxu1 %v8565_v52 }
 0x1c4   : > { %2968 = vmatpush.bf16.msra.mxu1 %v8564_v54  ;;  %v8559_v54 = vld [vmem:[#allocation7 + $0x1c0] sm:$0xff] }
 0x1c5   : > { %v10288_v0 = vpop.f32.mrf.mxu2 }
 0x1c7   : > { %v10290_v47 = vpop.f32.mrf.mxu3  ;;  %v10292_v63 = vpop.f32.mrf.mxu0 }
 0x1c8   : > { %v10294_v17 = vpop.f32.mrf.mxu1  ;;  %v1607_v29 = vadd.f32 %v10290_v47, %v10288_v0  ;;  %v8552_v0 = vld [vmem:[#allocation7 + $0x188] sm:$0xff] }
 0x1c9   : > { %v8560_v47 = vld [vmem:[#allocation7 + $0x1c8] sm:$0xff] }
 0x1ca   : > { %1924 = vmatmul.bf16.gmra.mxu0 %v6849_v48  ;;  %2786 = vmatmul.bf16.gmra.mxu2 %v1986_v14  ;;  %v1600_v48 = vadd.f32 %v10260_v62, %v10258_v58 }
 0x1cb   : > { %1953 = vmatmul.bf16.gmra.mxu1 %v6853_v5  ;;  %v1487_v5 = vadd.f32 %v10264_v20, %v10262_v10  ;;  %v1617_v10 = vpack.c.bf16 %v1602_v25, %v1602_v25  ;;  %v8556_v20 = vld [vmem:[#allocation7 + $0x1a8] sm:$0xff] }
 0x1cc   : > { %2815 = vmatmul.bf16.gmra.mxu3 %v2010_v53  ;;  %v1615_v53 = vpack.c.bf16 %v1597_v57, %v1597_v57  ;;  %v1616_v58 = vpack.c.bf16 %v1600_v48, %v1600_v48  ;;  %2939 = vmatpush.bf16.msra.mxu0 %v8556_v20  ;;  %v1605_v48 = vadd.f32 %v10282_v12, %v10280_v28  ;;  %v8572_v28 = vld [vmem:[#allocation7 + $0x228] sm:$0xff]  ;;  %v8551_v20 = vld [vmem:[#allocation7 + $0x180] sm:$0xff] }
 0x1cd   : > { %v10308_v60 = vpop.f32.mrf.mxu2  ;;  %v1502_v62 = vpack.c.bf16 %v1487_v5, %v1487_v5  ;;  %v2098_v2 = vunpack.c.l.b16 %v1617_v10  ;;  %v1492_v5 = vadd.f32 %v10286_v36, %v10284_v35  ;;  %v1619_v36 = vpack.c.bf16 %v1607_v29, %v1607_v29 }
 0x1ce   : > { %v2096_v3 = vunpack.c.l.b16 %v1615_v53  ;;  %v2097_v57 = vunpack.c.l.b16 %v1616_v58  ;;  %v8563_v53 = vld [vmem:[#allocation7 + $0x1e0] sm:$0xff]  ;;  %v1618_v12 = vpack.c.bf16 %v1605_v48, %v1605_v48  ;;  %v8568_v48 = vld [vmem:[#allocation7 + $0x208] sm:$0xff] }
 0x1cf   : > { %v10310_v9 = vpop.f32.mrf.mxu3  ;;  %v10314_v32 = vpop.f32.mrf.mxu0  ;;  %v2074_v31 = vunpack.c.l.b16 %v1502_v62  ;;  %2969 = vmatpush.bf16.msra.mxu1 %v8563_v53  ;;  %v1504_v35 = vpack.c.bf16 %v1492_v5, %v1492_v5 }
 0x1d0   : > { %v10316_v14 = vpop.f32.mrf.mxu1  ;;  %v2103_v23 = vpack.c.b16 %v2096_v3, %v2095_v42  ;;  %v8574_v3 = vld [vmem:[#allocation7 + $0x238] sm:$0xff]  ;;  %v2099_v58 = vunpack.c.l.b16 %v1618_v12 }
 0x1d1   : > { %2995 = vmatpush.bf16.msra.mxu2 %v8574_v3  ;;  %v2076_v62 = vunpack.c.l.b16 %v1504_v35  ;;  %v10707_v3 = vpack.c.b16 %v10210_v22, %v10208_v19  ;;  %v10708_v35 = vpack.c.b16 %v10216_v45, %v10214_v43 }
 0x1d3   : > { %2970 = vmatpush.bf16.msra.mxu1 %v8562_v15 }
 0x1d5   : > { %v10318_v26 = vpop.f32.mrf.mxu2  ;;  %2996 = vmatpush.bf16.msra.mxu2 %v8573_v49 }
 0x1d7   : > { %v10320_v27 = vpop.f32.mrf.mxu3  ;;  %v10322_v39 = vpop.f32.mrf.mxu0  ;;  %2971 = vmatpush.bf16.msra.mxu1 %v8561_v7 }
 0x1d8   : > { %v10324_v50 = vpop.f32.mrf.mxu1  ;;  %v1612_v15 = vadd.f32 %v10320_v27, %v10318_v26 }
 0x1d9   : > { %2997 = vmatpush.bf16.msra.mxu2 %v8572_v28 }
 0x1da   : > { %2829 = vmatmul.bf16.vlgmr.msrb.gmra.mxu0 %v2031_v33  ;;  %2887 = vmatmul.bf16.vlgmr.msrb.gmra.mxu2 %v2079_v16  ;;  %v2104_v16 = vpack.c.b16 %v2098_v2, %v2097_v57  ;;  %v8570_v2 = vld [vmem:[#allocation7 + $0x218] sm:$0xff]  ;;  %v1621_v5 = vpack.c.bf16 %v1612_v15, %v1612_v15 }
 0x1db   : > { %2858 = vmatmul.bf16.vlgmr.msrb.gmra.mxu1 %v2055_v55  ;;  %v1485_v55 = vadd.f32 %v10250_v40, %v10248_v4  ;;  %v8555_v4 = vld [vmem:[#allocation7 + $0x1a0] sm:$0xff] }
 0x1dc   : > { %2916 = vmatmul.bf16.vlgmr.msrb.gmra.mxu3 %v2103_v23  ;;  %2940 = vmatpush.bf16.msra.mxu0 %v8555_v4  ;;  %v8554_v23 = vld [vmem:[#allocation7 + $0x198] sm:$0xff]  ;;  %v2102_v29 = vunpack.c.l.b16 %v1621_v5 }
 0x1dd   : > { %v10338_v11 = vpop.f32.mrf.mxu2  ;;  %v1501_v56 = vpack.c.bf16 %v1485_v55, %v1485_v55  ;;  %v8571_v55 = vld [vmem:[#allocation7 + $0x220] sm:$0xff]  ;;  %2972 = vmatpush.bf16.msra.mxu1 %v8560_v47 }
 0x1de   : > { %2998 = vmatpush.bf16.msra.mxu2 %v8571_v55  ;;  %v1710_v55 = vadd.f32 %v10324_v50, %v10322_v39 }
 0x1df   : > { %v10340_v33 = vpop.f32.mrf.mxu3  ;;  %v10344_v18 = vpop.f32.mrf.mxu0  ;;  %v2073_v41 = vunpack.c.l.b16 %v1501_v56 }
 0x1e0   : > { %v10346_v59 = vpop.f32.mrf.mxu1  ;;  %2941 = vmatpush.bf16.msra.mxu0 %v8554_v23  ;;  %v1497_v23 = vadd.f32 %v10316_v14, %v10314_v32  ;;  %v8567_v14 = vld [vmem:[#allocation7 + $0x200] sm:$0xff] }
 0x1e1   : > { %v2080_v34 = vpack.c.b16 %v2074_v31, %v2073_v41  ;;  %2973 = vmatpush.bf16.msra.mxu1 %v8559_v54  ;;  %v10706_v41 = vpack.c.b16 %v10204_v38, %v10202_v37  ;;  %v1495_v38 = vadd.f32 %v10294_v17, %v10292_v63  ;;  %v1712_v47 = vadd.f32 %v10346_v59, %v10344_v18 }
 0x1e2   : > { %2999 = vmatpush.bf16.msra.mxu2 %v8570_v2 }
 0x1e3   : > { %v1505_v32 = vpack.c.bf16 %v1495_v38, %v1495_v38 }
 0x1e4   : > { %2942 = vmatpush.bf16.msra.mxu0 %v8553_v6 }
 0x1e5   : > { %v10348_v51 = vpop.f32.mrf.mxu2  ;;  %v2077_v63 = vunpack.c.l.b16 %v1505_v32 }
 0x1e7   : > { %v10350_v40 = vpop.f32.mrf.mxu3  ;;  %v10352_v42 = vpop.f32.mrf.mxu0 }
 0x1e8   : > { %v10354_v1 = vpop.f32.mrf.mxu1  ;;  %2943 = vmatpush.bf16.msra.mxu0 %v8552_v0  ;;  %v1825_v0 = vadd.f32 %v10340_v33, %v10338_v11  ;;  %v1729_v33 = vpack.c.bf16 %v1710_v55, %v1710_v55 }
 0x1ea   : > { %2834 = vmatmul.bf16.gmra.mxu0 %v2032_v44  ;;  %2892 = vmatmul.bf16.gmra.mxu2 %v2080_v34  ;;  %v8569_v34 = vld [vmem:[#allocation7 + $0x210] sm:$0xff] }
 0x1eb   : > { %2863 = vmatmul.bf16.gmra.mxu1 %v2056_v61  ;;  %v1490_v61 = vadd.f32 %v10272_v8, %v10270_v21  ;;  %v2100_v8 = vunpack.c.l.b16 %v1619_v36  ;;  %3000 = vmatpush.bf16.msra.mxu2 %v8569_v34  ;;  %v10709_v36 = vpack.c.b16 %v10226_v13, %v10224_v24  ;;  %v1715_v34 = vadd.f32 %v10354_v1, %v10352_v42 }
 0x1ec   : > { %2921 = vmatmul.bf16.gmra.mxu3 %v2104_v16  ;;  %2944 = vmatpush.bf16.msra.mxu0 %v8551_v20  ;;  %v1610_v16 = vadd.f32 %v10310_v9, %v10308_v60  ;;  %v1506_v9 = vpack.c.bf16 %v1497_v23, %v1497_v23  ;;  %v2119_v20 = vunpack.c.l.b16 %v1729_v33 }
 0x1ed   : > { %v10368_v30 = vpop.f32.mrf.mxu2  ;;  %v1503_v52 = vpack.c.bf16 %v1490_v61, %v1490_v61  ;;  %v2105_v53 = vpack.c.b16 %v2100_v8, %v2099_v58  ;;  %v1844_v58 = vpack.c.bf16 %v1825_v0, %v1825_v0 }
 0x1ee   : > { %v1620_v60 = vpack.c.bf16 %v1610_v16, %v1610_v16  ;;  %v2078_v27 = vunpack.c.l.b16 %v1506_v9 }
 0x1ef   : > { %v10370_v44 = vpop.f32.mrf.mxu3  ;;  %v10374_v25 = vpop.f32.mrf.mxu0  ;;  %v2075_v56 = vunpack.c.l.b16 %v1503_v52  ;;  %3001 = vmatpush.bf16.msra.mxu2 %v8568_v48  ;;  %v1827_v52 = vadd.f32 %v10350_v40, %v10348_v51  ;;  %v2143_v8 = vunpack.c.l.b16 %v1844_v58 }
 0x1f0   : > { %v10376_v46 = vpop.f32.mrf.mxu1  ;;  %v2101_v26 = vunpack.c.l.b16 %v1620_v60  ;;  %v2082_v28 = vpack.c.b16 %v2078_v27, %v2077_v63  ;;  %v1830_v2 = vadd.f32 %v10370_v44, %v10368_v30 }
 0x1f1   : > { %v2081_v4 = vpack.c.b16 %v2076_v62, %v2075_v56  ;;  %v1730_v62 = vpack.c.bf16 %v1712_v47, %v1712_v47  ;;  %v1845_v11 = vpack.c.bf16 %v1827_v52, %v1827_v52 }
 0x1f2   : > { %v2106_v12 = vpack.c.b16 %v2102_v29, %v2101_v26  ;;  %v1846_v15 = vpack.c.bf16 %v1830_v2, %v1830_v2 }
 0x1f3   : > { %3002 = vmatpush.bf16.msra.mxu2 %v8567_v14  ;;  %v2120_v18 = vunpack.c.l.b16 %v1730_v62  ;;  %v2144_v59 = vunpack.c.l.b16 %v1845_v11 }
 0x1f5   : > { %v10378_v21 = vpop.f32.mrf.mxu2  ;;  %v2127_v54 = vpack.c.b16 %v2120_v18, %v2119_v20  ;;  %v2151_v56 = vpack.c.b16 %v2144_v59, %v2143_v8 }
 0x1f7   : > { %v10380_v10 = vpop.f32.mrf.mxu3  ;;  %v10382_v57 = vpop.f32.mrf.mxu0 }
 0x1f8   : > { %v10384_v31 = vpop.f32.mrf.mxu1 }
 0x1f9   : > { %v1720_v58 = vadd.f32 %v10384_v31, %v10382_v57 }
 0x1fa   : > { %2839 = vmatmul.bf16.gmra.mxu0 %v10706_v41  ;;  %2897 = vmatmul.bf16.gmra.mxu2 %v2081_v4  ;;  %v10444_v4 = vld [vmem:[#allocation8] ss:$0 sm:$0xff]  ;;  %v1832_v41 = vadd.f32 %v10380_v10, %v10378_v21  ;;  %v2145_v21 = vunpack.c.l.b16 %v1846_v15 }
 0x1fb   : > { %2868 = vmatmul.bf16.gmra.mxu1 %v10707_v3 }
 0x1fc   : > { %2926 = vmatmul.bf16.gmra.mxu3 %v2105_v53  ;;  %v1717_v53 = vadd.f32 %v10376_v46, %v10374_v25  ;;  %v1847_v44 = vpack.c.bf16 %v1832_v41, %v1832_v41  ;;  %v1731_v25 = vpack.c.bf16 %v1715_v34, %v1715_v34 }
 0x1fd   : > { %v10398_v49 = vpop.f32.mrf.mxu2 }
 0x1fe   : > { %v1732_v30 = vpack.c.bf16 %v1717_v53, %v1717_v53  ;;  %v2146_v14 = vunpack.c.l.b16 %v1847_v44  ;;  %v2121_v1 = vunpack.c.l.b16 %v1731_v25 }
 0x1ff   : > { %v10400_v37 = vpop.f32.mrf.mxu3  ;;  %v10404_v19 = vpop.f32.mrf.mxu0 }
 0x200   : > { %v10406_v22 = vpop.f32.mrf.mxu1  ;;  %v2122_v10 = vunpack.c.l.b16 %v1732_v30  ;;  %v1835_v0 = vadd.f32 %v10400_v37, %v10398_v49 }
 0x201   : > { %v1722_v47 = vadd.f32 %v10406_v22, %v10404_v19  ;;  %v1733_v19 = vpack.c.bf16 %v1720_v58, %v1720_v58 }
 0x202   : > { %v1848_v33 = vpack.c.bf16 %v1835_v0, %v1835_v0 }
 0x203   : > { %v1734_v20 = vpack.c.bf16 %v1722_v47, %v1722_v47  ;;  %v2123_v31 = vunpack.c.l.b16 %v1733_v19 }
 0x205   : > { %v10408_v6 = vpop.f32.mrf.mxu2 }
 0x207   : > { %v10410_v7 = vpop.f32.mrf.mxu3  ;;  %v10412_v17 = vpop.f32.mrf.mxu0 }
 0x208   : > { %v10414_v61 = vpop.f32.mrf.mxu1  ;;  %v1837_v52 = vadd.f32 %v10410_v7, %v10408_v6  ;;  %v2147_v6 = vunpack.c.l.b16 %v1848_v33  ;;  %v2124_v7 = vunpack.c.l.b16 %v1734_v20 }
 0x209   : > { %v1725_v30 = vadd.f32 %v10414_v61, %v10412_v17 }
 0x20a   : > { %2844 = vmatmul.bf16.gmra.mxu0 %v10708_v35  ;;  %2902 = vmatmul.bf16.gmra.mxu2 %v2082_v28  ;;  %v2128_v35 = vpack.c.b16 %v2122_v10, %v2121_v1 }
 0x20b   : > { %2873 = vmatmul.bf16.gmra.mxu1 %v10709_v36  ;;  %v2152_v36 = vpack.c.b16 %v2146_v14, %v2145_v21 }
 0x20c   : > { %2931 = vmatmul.bf16.gmra.mxu3 %v2106_v12 }
 0x20d   : > { %v10430_v43 = vpop.f32.mrf.mxu2 }
 0x20f   : > { %v10432_v45 = vpop.f32.mrf.mxu3  ;;  %v10434_v24 = vpop.f32.mrf.mxu0 }
 0x210   : > { %v10436_v13 = vpop.f32.mrf.mxu1  ;;  %v1840_v15 = vadd.f32 %v10432_v45, %v10430_v43 }
 0x215   : > { %v10438_v51 = vpop.f32.mrf.mxu2 }
 0x217   : > { %v10440_v40 = vpop.f32.mrf.mxu3  ;;  %v1910_v39 = vpop.f32.mrf.mxu0 }
 0x218   : > { %v1939_v50 = vpop.f32.mrf.mxu1 }
 0x219   : > { %v1940_v3 = vadd.f32 %v1939_v50, %v1910_v39  ;;  %v1849_v39 = vpack.c.bf16 %v1837_v52, %v1837_v52 }
 0x21a   : > { %2945 = vmatmul.bf16.vlgmr.msra.gmra.mxu0 %v2127_v54 }
 0x21b   : > { %2974 = vmatmul.bf16.vlgmr.msra.gmra.mxu1 %v2151_v56  ;;  %v1959_v9 = vpack.c.bf16 %v1940_v3, %v1940_v3  ;;  %v2148_v54 = vunpack.c.l.b16 %v1849_v39 }
 0x21d   : > { %v2772_v16 = vpop.f32.mrf.mxu2  ;;  %v2167_v26 = vunpack.c.l.b16 %v1959_v9 }
 0x21e   : > { %v2773_v38 = vadd.f32 %v10444_v4, %v2772_v16  ;;  %v2129_v16 = vpack.c.b16 %v2124_v7, %v2123_v31 }
 0x21f   : > { %v2801_v23 = vpop.f32.mrf.mxu3  ;;  %v1912_v48 = vpop.f32.mrf.mxu0 }
 0x220   : > { %v1941_v60 = vpop.f32.mrf.mxu1  ;;  %v10453_v32 = vadd.f32 %v2801_v23, %v2773_v38  ;;  %v2153_v23 = vpack.c.b16 %v2148_v54, %v2147_v6  ;;  %v1727_v38 = vadd.f32 %v10436_v13, %v10434_v24  ;;  %v1735_v24 = vpack.c.bf16 %v1725_v30, %v1725_v30 }
 0x221   : > { %v1942_v5 = vadd.f32 %v1941_v60, %v1912_v48  ;;  %v1842_v48 = vadd.f32 %v10440_v40, %v10438_v51 }
 0x222   : > { %v1736_v10 = vpack.c.bf16 %v1727_v38, %v1727_v38  ;;  %v2125_v17 = vunpack.c.l.b16 %v1735_v24 }
 0x223   : > { %v1960_v46 = vpack.c.bf16 %v1942_v5, %v1942_v5  ;;  %v1850_v5 = vpack.c.bf16 %v1840_v15, %v1840_v15  ;;  %v1851_v14 = vpack.c.bf16 %v1842_v48, %v1842_v48 }
 0x224   : > { %v2126_v51 = vunpack.c.l.b16 %v1736_v10 }
 0x225   : > { %v2168_v42 = vunpack.c.l.b16 %v1960_v46  ;;  %v10455_v29 = vpop.f32.mrf.mxu2  ;;  %v2150_v40 = vunpack.c.l.b16 %v1851_v14 }
 0x226   : > { %v2130_v0 = vpack.c.b16 %v2126_v51, %v2125_v17 }
 0x227   : > { %v2175_v27 = vpack.c.b16 %v2168_v42, %v2167_v26  ;;  %v10457_v63 = vpop.f32.mrf.mxu3  ;;  %v1915_v28 = vpop.f32.mrf.mxu0  ;;  %v2149_v42 = vunpack.c.l.b16 %v1850_v5 }
 0x228   : > { %v1944_v12 = vpop.f32.mrf.mxu1 }
 0x229   : > { %3003 = vmatmul.bf16.vlgmr.msra.gmra.mxu2 %v2175_v27  ;;  %v1945_v55 = vadd.f32 %v1944_v12, %v1915_v28  ;;  %v2154_v47 = vpack.c.b16 %v2150_v40, %v2149_v42 }
 0x22a   : > { %2950 = vmatmul.bf16.gmra.mxu0 %v2128_v35 }
 0x22b   : > { %2979 = vmatmul.bf16.gmra.mxu1 %v2152_v36  ;;  %v1961_v49 = vpack.c.bf16 %v1945_v55, %v1945_v55 }
 0x22d   : > { %v2777_v62 = vpop.f32.mrf.mxu2  ;;  %v2169_v56 = vunpack.c.l.b16 %v1961_v49 }
 0x22e   : > { %v2778_v8 = vadd.f32 %v10444_v4, %v2777_v62 }
 0x22f   : > { %v2806_v11 = vpop.f32.mrf.mxu3  ;;  %v1917_v18 = vpop.f32.mrf.mxu0 }
 0x230   : > { %v1946_v59 = vpop.f32.mrf.mxu1  ;;  %v10468_v50 = vadd.f32 %v2806_v11, %v2778_v8 }
 0x231   : > { %v1947_v37 = vadd.f32 %v1946_v59, %v1917_v18 }
 0x233   : > { %v1962_v22 = vpack.c.bf16 %v1947_v37, %v1947_v37 }
 0x235   : > { %v2170_v57 = vunpack.c.l.b16 %v1962_v22  ;;  %v10470_v2 = vpop.f32.mrf.mxu2 }
 0x237   : > { %v10472_v53 = vpop.f32.mrf.mxu3  ;;  %v2176_v41 = vpack.c.b16 %v2170_v57, %v2169_v56  ;;  %v1920_v3 = vpop.f32.mrf.mxu0 }
 0x238   : > { %v1949_v34 = vpop.f32.mrf.mxu1 }
 0x239   : > { %3008 = vmatmul.bf16.gmra.mxu2 %v2176_v41  ;;  %v1950_v60 = vadd.f32 %v1949_v34, %v1920_v3 }
 0x23a   : > { %2955 = vmatmul.bf16.gmra.mxu0 %v2129_v16 }
 0x23b   : > { %2984 = vmatmul.bf16.gmra.mxu1 %v2153_v23  ;;  %v1963_v43 = vpack.c.bf16 %v1950_v60, %v1950_v60 }
 0x23d   : > { %v2782_v44 = vpop.f32.mrf.mxu2  ;;  %v2171_v1 = vunpack.c.l.b16 %v1963_v43 }
 0x23e   : > { %v2783_v25 = vadd.f32 %v10444_v4, %v2782_v44 }
 0x23f   : > { %v2811_v9 = vpop.f32.mrf.mxu3  ;;  %v1922_v46 = vpop.f32.mrf.mxu0 }
 0x240   : > { %v1951_v21 = vpop.f32.mrf.mxu1  ;;  %v2812_v26 = vadd.f32 %v2811_v9, %v2783_v25 }
 0x241   : > { %v1952_v45 = vadd.f32 %v1951_v21, %v1922_v46 }
 0x243   : > { %v1964_v13 = vpack.c.bf16 %v1952_v45, %v1952_v45 }
 0x245   : > { %v2172_v27 = vunpack.c.l.b16 %v1964_v13  ;;  %v10483_v61 = vpop.f32.mrf.mxu2 }
 0x247   : > { %v10485_v28 = vpop.f32.mrf.mxu3  ;;  %v2177_v12 = vpack.c.b16 %v2172_v27, %v2171_v1  ;;  %v1925_v35 = vpop.f32.mrf.mxu0 }
 0x248   : > { %v1954_v36 = vpop.f32.mrf.mxu1 }
 0x249   : > { %3013 = vmatmul.bf16.gmra.mxu2 %v2177_v12  ;;  %v1955_v52 = vadd.f32 %v1954_v36, %v1925_v35 }
 0x24a   : > { %2960 = vmatmul.bf16.gmra.mxu0 %v2130_v0 }
 0x24b   : > { %2989 = vmatmul.bf16.gmra.mxu1 %v2154_v47  ;;  %v1965_v8 = vpack.c.bf16 %v1955_v52, %v1955_v52 }
 0x24d   : > { %v2787_v55 = vpop.f32.mrf.mxu2  ;;  %v2173_v39 = vunpack.c.l.b16 %v1965_v8 }
 0x24e   : > { %v2788_v62 = vadd.f32 %v10444_v4, %v2787_v55 }
 0x24f   : > { %v2816_v58 = vpop.f32.mrf.mxu3  ;;  %v1927_v11 = vpop.f32.mrf.mxu0 }
 0x250   : > { %v1956_v33 = vpop.f32.mrf.mxu1  ;;  %v2817_v59 = vadd.f32 %v2816_v58, %v2788_v62 }
 0x251   : > { %v1957_v18 = vadd.f32 %v1956_v33, %v1927_v11 }
 0x253   : > { %v1966_v20 = vpack.c.bf16 %v1957_v18, %v1957_v18 }
 0x255   : > { %v2174_v49 = vunpack.c.l.b16 %v1966_v20  ;;  %v10488_v37 = vpop.f32.mrf.mxu2 }
 0x257   : > { %v10490_v19 = vpop.f32.mrf.mxu3  ;;  %v2178_v22 = vpack.c.b16 %v2174_v49, %v2173_v39  ;;  %v2830_v6 = vpop.f32.mrf.mxu0 }
 0x258   : > { %v2859_v7 = vpop.f32.mrf.mxu1  ;;  %v2831_v54 = vadd.f32 %v2830_v6, %v10453_v32 }
 0x259   : > { %3018 = vmatmul.bf16.gmra.mxu2 %v2178_v22 }
 0x25a   : > { %v2860_v56 = vadd.f32 %v2859_v7, %v2831_v54 }
 0x25d   : > { %v2888_v57 = vpop.f32.mrf.mxu2 }
 0x25e   : > { %v2889_v31 = vadd.f32 %v2888_v57, %v2860_v56 }
 0x25f   : > { %v10493_v41 = vpop.f32.mrf.mxu0  ;;  %v2917_v34 = vpop.f32.mrf.mxu3 }
 0x260   : > { %v10495_v3 = vpop.f32.mrf.mxu1  ;;  %v2918_v16 = vadd.f32 %v2917_v34, %v2889_v31 }
 0x265   : > { %v10497_v23 = vpop.f32.mrf.mxu2 }
 0x267   : > { %v2835_v15 = vpop.f32.mrf.mxu0 }
 0x268   : > { %v2864_v38 = vpop.f32.mrf.mxu1  ;;  %v2836_v48 = vadd.f32 %v2835_v15, %v10468_v50  ;;  %v2790_v15 = vadd.f32 %v10444_v4, %v10488_v37 }
 0x26a   : > { %v2865_v60 = vadd.f32 %v2864_v38, %v2836_v48  ;;  %v2780_v48 = vadd.f32 %v10444_v4, %v10470_v2 }
 0x26d   : > { %v2893_v30 = vpop.f32.mrf.mxu2 }
 0x26e   : > { %v10500_v44 = vadd.f32 %v2893_v30, %v2865_v60  ;;  %v2819_v30 = vadd.f32 %v10490_v19, %v2790_v15 }
 0x26f   : > { %v2837_v32 = vpop.f32.mrf.mxu0 }
 0x270   : > { %v10502_v9 = vpop.f32.mrf.mxu1 }
 0x275   : > { %v10504_v5 = vpop.f32.mrf.mxu2 }
 0x277   : > { %v2840_v25 = vpop.f32.mrf.mxu0 }
 0x278   : > { %v2869_v46 = vpop.f32.mrf.mxu1  ;;  %v2841_v21 = vadd.f32 %v2840_v25, %v2812_v26  ;;  %v10508_v26 = vpop.f32.mrf.mxu3 }
 0x27a   : > { %v2870_v10 = vadd.f32 %v2869_v46, %v2841_v21 }
 0x27d   : > { %v2898_v14 = vpop.f32.mrf.mxu2 }
 0x27e   : > { %v10506_v43 = vadd.f32 %v2898_v14, %v2870_v10  ;;  %v2775_v14 = vadd.f32 %v10444_v4, %v10455_v29 }
 0x27f   : > { %v2842_v45 = vpop.f32.mrf.mxu0 }
 0x280   : > { %v2871_v24 = vpop.f32.mrf.mxu1  ;;  %v2922_v62 = vpop.f32.mrf.mxu3 }
 0x285   : > { %v2900_v13 = vpop.f32.mrf.mxu2 }
 0x287   : > { %v2845_v50 = vpop.f32.mrf.mxu0 }
 0x288   : > { %v2874_v42 = vpop.f32.mrf.mxu1  ;;  %v2846_v51 = vadd.f32 %v2845_v50, %v2817_v59  ;;  %v2924_v59 = vpop.f32.mrf.mxu3 }
 0x28a   : > { %v2875_v40 = vadd.f32 %v2874_v42, %v2846_v51 }
 0x28d   : > { %v2903_v1 = vpop.f32.mrf.mxu2 }
 0x28e   : > { %v2904_v27 = vadd.f32 %v2903_v1, %v2875_v40  ;;  %v2804_v40 = vadd.f32 %v10457_v63, %v2775_v14  ;;  %v8581_v14 = vld [vmem:[#allocation10 + $0x30] sm:$0xff] }
 0x28f   : > { %v2847_v17 = vpop.f32.mrf.mxu0 }
 0x290   : > { %v2876_v12 = vpop.f32.mrf.mxu1  ;;  %v2927_v6 = vpop.f32.mrf.mxu3  ;;  %v2848_v10 = vadd.f32 %v2847_v17, %v2819_v30  ;;  %v2833_v19 = vadd.f32 %v10493_v41, %v2804_v40  ;;  %v8582_v40 = vld [vmem:[#allocation10 + $0x38] sm:$0xff] }
 0x291   : > { %v2928_v63 = vadd.f32 %v2927_v6, %v10506_v43 }
 0x292   : > { %v2877_v51 = vadd.f32 %v2876_v12, %v2848_v10  ;;  %v8579_v10 = vld [vmem:[#allocation10 + $0x20] sm:$0xff] }
 0x295   : > { %v2905_v55 = vpop.f32.mrf.mxu2 }
 0x297   : > { %v2946_v35 = vpop.f32.mrf.mxu0 }
 0x298   : > { %v2947_v36 = vadd.f32 %v2946_v35, %v2918_v16  ;;  %v2975_v0 = vpop.f32.mrf.mxu1  ;;  %v2929_v57 = vpop.f32.mrf.mxu3  ;;  %v2785_v16 = vadd.f32 %v10444_v4, %v10483_v61  ;;  %v2809_v61 = vadd.f32 %v10472_v53, %v2780_v48 }
 0x29a   : > { %v2976_v47 = vadd.f32 %v2975_v0, %v2947_v36  ;;  %v2814_v60 = vadd.f32 %v10485_v28, %v2785_v16  ;;  %v2838_v42 = vadd.f32 %v2837_v32, %v2809_v61  ;;  %v2906_v28 = vadd.f32 %v2905_v55, %v2877_v51  ;;  %v8577_v61 = vld [vmem:[#allocation10 + $0x10] sm:$0xff]  ;;  %v8578_v51 = vld [vmem:[#allocation10 + $0x18] sm:$0xff] }
 0x29c   : > { %v2843_v21 = vadd.f32 %v2842_v45, %v2814_v60  ;;  %v2867_v35 = vadd.f32 %v10502_v9, %v2838_v42  ;;  %v8591_v42 = vld [vmem:[#allocation11 + $0x38] sm:$0xff] }
 0x29e   : > { %v2872_v37 = vadd.f32 %v2871_v24, %v2843_v21  ;;  %v2896_v4 = vadd.f32 %v10504_v5, %v2867_v35  ;;  %v2862_v24 = vadd.f32 %v10495_v3, %v2833_v19  ;;  %v8599_v19 = vld [vmem:[#allocation11 + $0x78] sm:$0xff]  ;;  %v8586_v35 = vld [vmem:[#allocation11 + $0x10] sm:$0xff] }
 0x29f   : > { %v10510_v52 = vpop.f32.mrf.mxu0 }
 0x2a0   : > { %v10512_v58 = vpop.f32.mrf.mxu1  ;;  %v2932_v25 = vpop.f32.mrf.mxu3  ;;  %v2901_v1 = vadd.f32 %v2900_v13, %v2872_v37  ;;  %v2925_v41 = vadd.f32 %v2924_v59, %v2896_v4  ;;  %v8590_v37 = vld [vmem:[#allocation11 + $0x30] sm:$0xff]  ;;  %v8584_v4 = vld [vmem:[#allocation11] sm:$0xff] }
 0x2a1   : > { %v2933_v45 = vadd.f32 %v2932_v25, %v2904_v27  ;;  %v2923_v27 = vadd.f32 %v2922_v62, %v10500_v44 }
 0x2a2   : > { %v2930_v29 = vadd.f32 %v2929_v57, %v2901_v1  ;;  %v8588_v1 = vld [vmem:[#allocation11 + $0x20] sm:$0xff] }
 0x2a7   : > { %v2951_v11 = vpop.f32.mrf.mxu0 }
 0x2a8   : > { %v10516_v18 = vpop.f32.mrf.mxu1  ;;  %v2934_v17 = vpop.f32.mrf.mxu3  ;;  %v2952_v3 = vadd.f32 %v2951_v11, %v2923_v27  ;;  %v8603_v27 = vld [vmem:[#allocation11 + $0x98] sm:$0xff] }
 0x2a9   : > { %v2935_v53 = vadd.f32 %v2934_v17, %v2906_v28  ;;  %v8587_v28 = vld [vmem:[#allocation11 + $0x18] sm:$0xff]  ;;  %v8585_v17 = vld [vmem:[#allocation11 + $0x8] sm:$0xff] }
 0x2aa   : > { %v2981_v44 = vadd.f32 %v10516_v18, %v2952_v3  ;;  %v8630_v3 = vld [vmem:[#allocation11 + $0x170] sm:$0xff] }
 0x2ac   : > { %v3004_v33 = vpop.f32.mrf.mxu2 }
 0x2ad   : > { %v10514_v8 = vadd.f32 %v3004_v33, %v2976_v47  ;;  %v2891_v47 = vadd.f32 %v10497_v23, %v2862_v24  ;;  %v8595_v24 = vld [vmem:[#allocation11 + $0x58] sm:$0xff] }
 0x2af   : > { %v2953_v20 = vpop.f32.mrf.mxu0  ;;  %v2920_v48 = vadd.f32 %v10508_v26, %v2891_v47  ;;  %v8594_v47 = vld [vmem:[#allocation11 + $0x50] sm:$0xff] }
 0x2b0   : > { %v2982_v49 = vpop.f32.mrf.mxu1  ;;  %v2954_v16 = vadd.f32 %v2953_v20, %v2925_v41  ;;  %v8621_v41 = vld [vmem:[#allocation11 + $0x128] sm:$0xff] }
 0x2b2   : > { %v2983_v23 = vadd.f32 %v2982_v49, %v2954_v16  ;;  %v8602_v16 = vld [vmem:[#allocation11 + $0x90] sm:$0xff] }
 0x2b4   : > { %v10518_v39 = vpop.f32.mrf.mxu2 }
 0x2b7   : > { %v2956_v7 = vpop.f32.mrf.mxu0 }
 0x2b8   : > { %v2985_v54 = vpop.f32.mrf.mxu1  ;;  %v2957_v55 = vadd.f32 %v2956_v7, %v2928_v63  ;;  %v8622_v63 = vld [vmem:[#allocation11 + $0x130] sm:$0xff] }
 0x2ba   : > { %v2986_v30 = vadd.f32 %v2985_v54, %v2957_v55  ;;  %v8593_v55 = vld [vmem:[#allocation11 + $0x48] sm:$0xff] }
 0x2bc   : > { %v10520_v22 = vpop.f32.mrf.mxu2 }
 0x2bd   : > { %v3010_v26 = vadd.f32 %v10520_v22, %v2981_v44  ;;  %v8616_v44 = vld [vmem:[#allocation11 + $0x100] sm:$0xff] }
 0x2bf   : > { %v2958_v31 = vpop.f32.mrf.mxu0  ;;  %v3026_v54 = vmax.f32 %v3010_v26, 0.0  ;;  %v8610_v26 = vld [vmem:[#allocation11 + $0xd0] sm:$0xff] }
 0x2c0   : > { %v2987_v38 = vpop.f32.mrf.mxu1  ;;  %v2959_v12 = vadd.f32 %v2958_v31, %v2930_v29  ;;  %v2949_v31 = vadd.f32 %v10510_v52, %v2920_v48  ;;  %v8606_v29 = vld [vmem:[#allocation11 + $0xb0] sm:$0xff]  ;;  %v8631_v48 = vld [vmem:[#allocation11 + $0x178] sm:$0xff] }
 0x2c2   : > { %v2988_v15 = vadd.f32 %v2987_v38, %v2959_v12  ;;  %v8605_v12 = vld [vmem:[#allocation11 + $0xa8] sm:$0xff] }
 0x2c4   : > { %v3011_v56 = vpop.f32.mrf.mxu2 }
 0x2c5   : > { %v3012_v62 = vadd.f32 %v3011_v56, %v2983_v23  ;;  %v8600_v23 = vld [vmem:[#allocation11 + $0x80] sm:$0xff] }
 0x2c7   : > { %v2961_v46 = vpop.f32.mrf.mxu0  ;;  %v3027_v11 = vmax.f32 %v3012_v62, 0.0  ;;  %v8628_v62 = vld [vmem:[#allocation11 + $0x160] sm:$0xff] }
 0x2c8   : > { %v2990_v2 = vpop.f32.mrf.mxu1  ;;  %v2962_v32 = vadd.f32 %v2961_v46, %v2933_v45  ;;  %v2978_v46 = vadd.f32 %v10512_v58, %v2949_v31  ;;  %v3024_v58 = vmax.f32 %v10514_v8, 0.0  ;;  %v8580_v8 = vld [vmem:[#allocation10 + $0x28] sm:$0xff]  ;;  %v8598_v45 = vld [vmem:[#allocation11 + $0x70] sm:$0xff]  ;;  %v8629_v31 = vld [vmem:[#allocation11 + $0x168] sm:$0xff] }
 0x2c9   : > { %v3033_v56 = vpack.c.bf16 %v3027_v11, %v3026_v54 }
 0x2ca   : > { %v2991_v9 = vadd.f32 %v2990_v2, %v2962_v32  ;;  %v3007_v52 = vadd.f32 %v10518_v39, %v2978_v46  ;;  %v8576_v39 = vld [vmem:[#allocation10 + $0x8] sm:$0xff]  ;;  %v8589_v2 = vld [vmem:[#allocation11 + $0x28] sm:$0xff]  ;;  %v8623_v32 = vld [vmem:[#allocation11 + $0x138] sm:$0xff] }
 0x2cb   : > { %v8638_v46 = vld [vmem:[#allocation11 + $0x1b0] sm:$0xff] }
 0x2cc   : > { %v3014_v34 = vpop.f32.mrf.mxu2  ;;  %v3025_v18 = vmax.f32 %v3007_v52, 0.0 }
 0x2cd   : > { %v3015_v59 = vadd.f32 %v3014_v34, %v2986_v30  ;;  %v8575_v34 = vld [vmem:[#allocation10] sm:$0xff]  ;;  %v8601_v30 = vld [vmem:[#allocation11 + $0x88] sm:$0xff] }
 0x2ce   : > { %v3032_v22 = vpack.c.bf16 %v3025_v18, %v3024_v58  ;;  %v8626_v18 = vld [vmem:[#allocation11 + $0x150] sm:$0xff] }
 0x2cf   : > { %v2963_v36 = vpop.f32.mrf.mxu0  ;;  %v3028_v21 = vmax.f32 %v3015_v59, 0.0  ;;  %v8612_v59 = vld [vmem:[#allocation11 + $0xe0] sm:$0xff] }
 0x2d0   : > { %v2964_v13 = vadd.f32 %v2963_v36, %v2935_v53  ;;  %v2992_v33 = vpop.f32.mrf.mxu1  ;;  %v8597_v36 = vld [vmem:[#allocation11 + $0x68] sm:$0xff]  ;;  %v8596_v53 = vld [vmem:[#allocation11 + $0x60] sm:$0xff] }
 0x2d2   : > { %v2993_v5 = vadd.f32 %v2992_v33, %v2964_v13  ;;  %v8604_v13 = vld [vmem:[#allocation11 + $0xa0] sm:$0xff]  ;;  %v8615_v33 = vld [vmem:[#allocation11 + $0xf8] sm:$0xff] }
 0x2d4   : > { %v3016_v50 = vpop.f32.mrf.mxu2 }
 0x2d5   : > { %v3017_v43 = vadd.f32 %v3016_v50, %v2988_v15  ;;  %v8583_v50 = vld [vmem:[#allocation10 + $0x40] sm:$0xff]  ;;  %v8614_v15 = vld [vmem:[#allocation11 + $0xf0] sm:$0xff] }
 0x2d7   : > { %v3029_v20 = vmax.f32 %v3017_v43, 0.0  ;;  %v8613_v43 = vld [vmem:[#allocation11 + $0xe8] sm:$0xff] }
 0x2d9   : > { %v3034_v49 = vpack.c.bf16 %v3029_v20, %v3028_v21  ;;  %v8627_v21 = vld [vmem:[#allocation11 + $0x158] sm:$0xff] }
 0x2dc   : > { %v3019_v0 = vpop.f32.mrf.mxu2 }
 0x2dd   : > { %v3020_v57 = vadd.f32 %v3019_v0, %v2991_v9  ;;  %v8607_v0 = vld [vmem:[#allocation11 + $0xb8] sm:$0xff]  ;;  %v8620_v9 = vld [vmem:[#allocation11 + $0x120] sm:$0xff] }
 0x2df   : > { %v3030_v7 = vmax.f32 %v3020_v57, 0.0  ;;  %v8619_v57 = vld [vmem:[#allocation11 + $0x118] sm:$0xff] }
 0x2e4   : > { %v3021_v60 = vpop.f32.mrf.mxu2 }
 0x2e5   : > { %v3022_v6 = vadd.f32 %v3021_v60, %v2993_v5  ;;  %v8592_v5 = vld [vmem:[#allocation11 + $0x40] sm:$0xff]  ;;  %v8618_v60 = vld [vmem:[#allocation11 + $0x110] sm:$0xff] }
 0x2e7   : > { %v3031_v25 = vmax.f32 %v3022_v6, 0.0  ;;  %v8617_v6 = vld [vmem:[#allocation11 + $0x108] sm:$0xff] }
 0x2e9   : > { %v3035_v38 = vpack.c.bf16 %v3031_v25, %v3030_v7  ;;  %v8639_v25 = vld [vmem:[#allocation11 + $0x1b8] sm:$0xff] }
 0x2eb   : > { %3051 = vmatpush.bf16.msra.mxu3 %v3035_v38  ;;  %3159 = vmatpush.bf16.msrb.mxu1 %v3035_v38 }
 0x2ec   : > { %3213 = vmatpush.bf16.msrb.mxu2 %v3035_v38  ;;  %3267 = vmatpush.bf16.msrb.mxu0 %v3035_v38 }
 0x2ef   : > { %3052 = vmatpush.bf16.msra.mxu3 %v3034_v49  ;;  %3160 = vmatpush.bf16.msrb.mxu1 %v3034_v49 }
 0x2f0   : > { %3214 = vmatpush.bf16.msrb.mxu2 %v3034_v49  ;;  %3268 = vmatpush.bf16.msrb.mxu0 %v3034_v49 }
 0x2f3   : > { %3053 = vmatpush.bf16.msra.mxu3 %v3033_v56  ;;  %3161 = vmatpush.bf16.msrb.mxu1 %v3033_v56 }
 0x2f4   : > { %3215 = vmatpush.bf16.msrb.mxu2 %v3033_v56  ;;  %3269 = vmatpush.bf16.msrb.mxu0 %v3033_v56 }
 0x2f7   : > { %3054 = vmatpush.bf16.msra.mxu3 %v3032_v22  ;;  %3162 = vmatpush.bf16.msrb.mxu1 %v3032_v22 }
 0x2f8   : > { %3216 = vmatpush.bf16.msrb.mxu2 %v3032_v22  ;;  %3270 = vmatpush.bf16.msrb.mxu0 %v3032_v22 }
 0x2fa   : > { %7146 = vmatmul.msk.bf16.vlgmr.msra.gmra.mxu3 %vm3043_vm0, %v8575_v34  ;;  %7166 = vmatmul.msk.bf16.vlgmr.msrb.gmra.mxu1 %vm3043_vm0, %v8579_v10  ;;  %v8636_v34 = vld [vmem:[#allocation11 + $0x1a0] sm:$0xff]  ;;  %v8655_v10 = vld [vmem:[#allocation11 + $0x238] sm:$0xff] }
 0x2fb   : > { %3078 = vmatpush.bf16.msrb.mxu3 %v3035_v38  ;;  %3186 = vmatpush.bf16.msra.mxu1 %v3035_v38 }
 0x2fc   : > { %7176 = vmatmul.msk.bf16.vlgmr.msrb.gmra.mxu2 %vm3043_vm0, %v8581_v14  ;;  %7186 = vmatmul.msk.bf16.vlgmr.msrb.gmra.mxu0 %vm3043_vm0, %v8583_v50  ;;  %v8625_v14 = vld [vmem:[#allocation11 + $0x148] sm:$0xff]  ;;  %v8608_v50 = vld [vmem:[#allocation11 + $0xc0] sm:$0xff] }
 0x2fd   : > { %3927 = vmatpush.bf16.msra.mxu2 %v8599_v19  ;;  %3955 = vmatpush.bf16.msra.mxu0 %v8615_v33  ;;  %v8646_v19 = vld [vmem:[#allocation11 + $0x1f0] sm:$0xff]  ;;  %v8643_v33 = vld [vmem:[#allocation11 + $0x1d8] sm:$0xff] }
 0x2ff   : > { %3079 = vmatpush.bf16.msrb.mxu3 %v3034_v49  ;;  %3187 = vmatpush.bf16.msra.mxu1 %v3034_v49 }
 0x301   : > { %3928 = vmatpush.bf16.msra.mxu2 %v8598_v45  ;;  %3956 = vmatpush.bf16.msra.mxu0 %v8614_v15 }
 0x303   : > { %3080 = vmatpush.bf16.msrb.mxu3 %v3033_v56  ;;  %3188 = vmatpush.bf16.msra.mxu1 %v3033_v56 }
 0x305   : > { %3929 = vmatpush.bf16.msra.mxu2 %v8597_v36  ;;  %3957 = vmatpush.bf16.msra.mxu0 %v8613_v43  ;;  %v8642_v43 = vld [vmem:[#allocation11 + $0x1d0] sm:$0xff] }
 0x307   : > { %3081 = vmatpush.bf16.msrb.mxu3 %v3032_v22  ;;  %3189 = vmatpush.bf16.msra.mxu1 %v3032_v22 }
 0x309   : > { %3930 = vmatpush.bf16.msra.mxu2 %v8596_v53  ;;  %3958 = vmatpush.bf16.msra.mxu0 %v8612_v59  ;;  %v8645_v53 = vld [vmem:[#allocation11 + $0x1e8] sm:$0xff] }
 0x30a   : > { %7171 = vmatmul.msk.bf16.vlgmr.msra.gmra.mxu1 %vm3043_vm0, %v8580_v8  ;;  %7151 = vmatmul.msk.bf16.vlgmr.msrb.gmra.mxu3 %vm3043_vm0, %v8576_v39 }
 0x30b   : > { %3105 = vmatpush.bf16.msra.mxu3 %v3035_v38  ;;  %3913 = vmatpush.bf16.msrb.mxu1 %v8591_v42  ;;  %v8647_v42 = vld [vmem:[#allocation11 + $0x1f8] sm:$0xff] }
 0x30d   : > { %3931 = vmatpush.bf16.msra.mxu2 %v8595_v24 }
 0x30f   : > { %3106 = vmatpush.bf16.msra.mxu3 %v3034_v49  ;;  %3914 = vmatpush.bf16.msrb.mxu1 %v8590_v37  ;;  %v8654_v37 = vld [vmem:[#allocation11 + $0x230] sm:$0xff] }
 0x311   : > { %3932 = vmatpush.bf16.msra.mxu2 %v8594_v47 }
 0x313   : > { %3107 = vmatpush.bf16.msra.mxu3 %v3033_v56  ;;  %3915 = vmatpush.bf16.msrb.mxu1 %v8589_v2 }
 0x315   : > { %3933 = vmatpush.bf16.msra.mxu2 %v8593_v55  ;;  %v8644_v55 = vld [vmem:[#allocation11 + $0x1e0] sm:$0xff] }
 0x317   : > { %3108 = vmatpush.bf16.msra.mxu3 %v3032_v22  ;;  %3916 = vmatpush.bf16.msrb.mxu1 %v8588_v1 }
 0x319   : > { %3934 = vmatpush.bf16.msra.mxu2 %v8592_v5 }
 0x31a   : > { %7156 = vmatmul.msk.bf16.vlgmr.msra.gmra.mxu3 %vm3043_vm0, %v8577_v61  ;;  %v8635_v61 = vld [vmem:[#allocation11 + $0x198] sm:$0xff] }
 0x31b   : > { %3132 = vmatpush.bf16.msrb.mxu3 %v3035_v38  ;;  %3917 = vmatpush.bf16.msrb.mxu1 %v8587_v28  ;;  %v8634_v28 = vld [vmem:[#allocation11 + $0x190] sm:$0xff] }
 0x31d   : > { %3983 = vmatpush.bf16.msrb.mxu2 %v8631_v48 }
 0x31f   : > { %3133 = vmatpush.bf16.msrb.mxu3 %v3034_v49  ;;  %3918 = vmatpush.bf16.msrb.mxu1 %v8586_v35  ;;  %v8653_v35 = vld [vmem:[#allocation11 + $0x228] sm:$0xff] }
 0x321   : > { %3984 = vmatpush.bf16.msrb.mxu2 %v8630_v3 }
 0x323   : > { %3134 = vmatpush.bf16.msrb.mxu3 %v3033_v56  ;;  %3919 = vmatpush.bf16.msrb.mxu1 %v8585_v17 }
 0x325   : > { %3985 = vmatpush.bf16.msrb.mxu2 %v8629_v31 }
 0x327   : > { %3135 = vmatpush.bf16.msrb.mxu3 %v3032_v22  ;;  %3920 = vmatpush.bf16.msrb.mxu1 %v8584_v4 }
 0x329   : > { %3986 = vmatpush.bf16.msrb.mxu2 %v8628_v62  ;;  %v8641_v62 = vld [vmem:[#allocation11 + $0x1c8] sm:$0xff] }
 0x32a   : > { %7161 = vmatmul.msk.bf16.vlgmr.msrb.gmra.mxu3 %vm3043_vm0, %v8578_v51 }
 0x32b   : > { %3240 = vmatpush.bf16.msra.mxu3 %v3035_v38  ;;  %3969 = vmatpush.bf16.msra.mxu1 %v8623_v32  ;;  %v8611_v38 = vld [vmem:[#allocation11 + $0xd8] sm:$0xff]  ;;  %v8652_v32 = vld [vmem:[#allocation11 + $0x220] sm:$0xff] }
 0x32c   : > { %3959 = vmatpush.bf16.msra.mxu0 %v8611_v38 }
 0x32d   : > { %3987 = vmatpush.bf16.msrb.mxu2 %v8627_v21 }
 0x32f   : > { %3241 = vmatpush.bf16.msra.mxu3 %v3034_v49  ;;  %3970 = vmatpush.bf16.msra.mxu1 %v8622_v63  ;;  %v8637_v49 = vld [vmem:[#allocation11 + $0x1a8] sm:$0xff] }
 0x330   : > { %3960 = vmatpush.bf16.msra.mxu0 %v8610_v26 }
 0x331   : > { %3988 = vmatpush.bf16.msrb.mxu2 %v8626_v18 }
 0x333   : > { %3242 = vmatpush.bf16.msra.mxu3 %v3033_v56  ;;  %3971 = vmatpush.bf16.msra.mxu1 %v8621_v41  ;;  %v8632_v41 = vld [vmem:[#allocation11 + $0x180] sm:$0xff] }
 0x335   : > { %3989 = vmatpush.bf16.msrb.mxu2 %v8625_v14 }
 0x337   : > { %3243 = vmatpush.bf16.msra.mxu3 %v3032_v22  ;;  %3972 = vmatpush.bf16.msra.mxu1 %v8620_v9  ;;  %v8609_v22 = vld [vmem:[#allocation11 + $0xc8] sm:$0xff]  ;;  %v8651_v9 = vld [vmem:[#allocation11 + $0x218] sm:$0xff] }
 0x338   : > { %3961 = vmatpush.bf16.msra.mxu0 %v8609_v22 }
 0x33a   : > { %7181 = vmatmul.msk.bf16.vlgmr.msra.gmra.mxu3 %vm3043_vm0, %v8582_v40  ;;  %v8624_v40 = vld [vmem:[#allocation11 + $0x140] sm:$0xff] }
 0x33b   : > { %3941 = vmatpush.bf16.msrb.mxu3 %v8607_v0  ;;  %3973 = vmatpush.bf16.msra.mxu1 %v8619_v57 }
 0x33c   : > { %3962 = vmatpush.bf16.msra.mxu0 %v8608_v50  ;;  %3990 = vmatpush.bf16.msrb.mxu2 %v8624_v40 }
 0x33f   : > { %3942 = vmatpush.bf16.msrb.mxu3 %v8606_v29  ;;  %3974 = vmatpush.bf16.msra.mxu1 %v8618_v60  ;;  %v8633_v29 = vld [vmem:[#allocation11 + $0x188] sm:$0xff] }
 0x340   : > { %4011 = vmatpush.bf16.msrb.mxu0 %v8647_v42 }
 0x343   : > { %3943 = vmatpush.bf16.msrb.mxu3 %v8605_v12  ;;  %3975 = vmatpush.bf16.msra.mxu1 %v8617_v6  ;;  %v8649_v6 = vld [vmem:[#allocation11 + $0x208] sm:$0xff] }
 0x344   : > { %4012 = vmatpush.bf16.msrb.mxu0 %v8646_v19 }
 0x347   : > { %3944 = vmatpush.bf16.msrb.mxu3 %v8604_v13  ;;  %3976 = vmatpush.bf16.msra.mxu1 %v8616_v44 }
 0x348   : > { %4013 = vmatpush.bf16.msrb.mxu0 %v8645_v53 }
 0x34b   : > { %3945 = vmatpush.bf16.msrb.mxu3 %v8603_v27 }
 0x34c   : > { %4014 = vmatpush.bf16.msrb.mxu0 %v8644_v55 }
 0x34f   : > { %3946 = vmatpush.bf16.msrb.mxu3 %v8602_v16  ;;  %v8650_v16 = vld [vmem:[#allocation11 + $0x210] sm:$0xff] }
 0x350   : > { %4015 = vmatpush.bf16.msrb.mxu0 %v8643_v33 }
 0x353   : > { %3947 = vmatpush.bf16.msrb.mxu3 %v8601_v30 }
 0x354   : > { %4016 = vmatpush.bf16.msrb.mxu0 %v8642_v43 }
 0x357   : > { %3948 = vmatpush.bf16.msrb.mxu3 %v8600_v23 }
 0x358   : > { %4017 = vmatpush.bf16.msrb.mxu0 %v8641_v62 }
 0x35b   : > { %3997 = vmatpush.bf16.msra.mxu3 %v8639_v25 }
 0x35f   : > { %3998 = vmatpush.bf16.msra.mxu3 %v8638_v46 }
 0x363   : > { %3999 = vmatpush.bf16.msra.mxu3 %v8637_v49  ;;  %v8640_v49 = vld [vmem:[#allocation11 + $0x1c0] sm:$0xff] }
 0x364   : > { %4018 = vmatpush.bf16.msrb.mxu0 %v8640_v49  ;;  %v4081_v49 = vld [vmem:[#allocation14 + $0x4] sm:$0x3] }
 0x367   : > { %4000 = vmatpush.bf16.msra.mxu3 %v8636_v34 }
 0x36b   : > { %4001 = vmatpush.bf16.msra.mxu3 %v8635_v61 }
 0x36f   : > { %4002 = vmatpush.bf16.msra.mxu3 %v8634_v28 }
 0x373   : > { %4003 = vmatpush.bf16.msra.mxu3 %v8633_v29 }
 0x377   : > { %v3164_v20 = vpop.f32.mrf.mxu1  ;;  %4004 = vmatpush.bf16.msra.mxu3 %v8632_v41 }
 0x378   : > { %v3169_v2 = vpack.c.bf16 %v3164_v20, %v3164_v20  ;;  %v8648_v20 = vld [vmem:[#allocation11 + $0x200] sm:$0xff] }
 0x379   : > { %v3272_v45 = vpop.f32.mrf.mxu0 }
 0x37a   : > { %v3305_v17 = vunpack.c.l.b16 %v3169_v2  ;;  %v3277_v48 = vpack.c.bf16 %v3272_v45, %v3272_v45 }
 0x37c   : > { %v3329_v23 = vunpack.c.l.b16 %v3277_v48 }
 0x37d   : > { %v3056_v7 = vpop.f32.mrf.mxu3 }
 0x37e   : > { %v3061_v52 = vpack.c.bf16 %v3056_v7, %v3056_v7 }
 0x37f   : > { %v3166_v39 = vpop.f32.mrf.mxu1  ;;  %v3218_v31 = vpop.f32.mrf.mxu2 }
 0x380   : > { %v3281_v56 = vunpack.c.l.b16 %v3061_v52  ;;  %v3170_v1 = vpack.c.bf16 %v3166_v39, %v3166_v39 }
 0x381   : > { %v3274_v15 = vpop.f32.mrf.mxu0 }
 0x382   : > { %v3306_v36 = vunpack.c.l.b16 %v3170_v1  ;;  %v3278_v60 = vpack.c.bf16 %v3274_v15, %v3274_v15 }
 0x384   : > { %v3307_v12 = vpack.c.b16 %v3306_v36, %v3305_v17  ;;  %v3330_v59 = vunpack.c.l.b16 %v3278_v60 }
 0x385   : > { %v3058_v11 = vpop.f32.mrf.mxu3 }
 0x386   : > { %v3062_v54 = vpack.c.bf16 %v3058_v11, %v3058_v11  ;;  %v3331_v26 = vpack.c.b16 %v3330_v59, %v3329_v23 }
 0x387   : > { %v3191_v0 = vpop.f32.mrf.mxu1 }
 0x388   : > { %v3282_v58 = vunpack.c.l.b16 %v3062_v54  ;;  %v3196_v3 = vpack.c.bf16 %v3191_v0, %v3191_v0 }
 0x38a   : > { %v3283_v8 = vpack.c.b16 %v3282_v58, %v3281_v56  ;;  %v3311_v25 = vunpack.c.l.b16 %v3196_v3  ;;  %v3220_v56 = vpop.f32.mrf.mxu2  ;;  %v3223_v58 = vpack.c.bf16 %v3218_v31, %v3218_v31 }
 0x38b   : > { %v3224_v22 = vpack.c.bf16 %v3220_v56, %v3220_v56  ;;  %v8662_v56 = vld [vmem:[#allocation16 + $0x30] sm:$0xff] }
 0x38c   : > { %3921 = vmatmul.bf16.vlgmr.msrb.gmra.mxu1 %v3283_v8 }
 0x38d   : > { %4025 = vmatpush.bf16.msrb.mxu1 %v8655_v10  ;;  %v3083_v51 = vpop.f32.mrf.mxu3  ;;  %v3317_v10 = vunpack.c.l.b16 %v3223_v58  ;;  %v3318_v8 = vunpack.c.l.b16 %v3224_v22  ;;  %v8671_v58 = vld [vmem:[#allocation16 + $0x78] sm:$0xff]  ;;  %v8670_v22 = vld [vmem:[#allocation16 + $0x70] sm:$0xff] }
 0x38e   : > { %v3088_v4 = vpack.c.bf16 %v3083_v51, %v3083_v51 }
 0x38f   : > { %v3193_v57 = vpop.f32.mrf.mxu1  ;;  %v3319_v42 = vpack.c.b16 %v3318_v8, %v3317_v10  ;;  %v8669_v10 = vld [vmem:[#allocation16 + $0x68] sm:$0xff]  ;;  %v8660_v8 = vld [vmem:[#allocation16 + $0x20] sm:$0xff] }
 0x390   : > { %v3287_v13 = vunpack.c.l.b16 %v3088_v4  ;;  %v3197_v30 = vpack.c.bf16 %v3193_v57, %v3193_v57  ;;  %v9075_v4 = vld [vmem:[#allocation13] ss:$0 sm:$0xff] }
 0x391   : > { %4026 = vmatpush.bf16.msrb.mxu1 %v8654_v37 }
 0x392   : > { %v3312_v44 = vunpack.c.l.b16 %v3197_v30 }
 0x394   : > { %v3313_v11 = vpack.c.b16 %v3312_v44, %v3311_v25 }
 0x395   : > { %4027 = vmatpush.bf16.msrb.mxu1 %v8653_v35  ;;  %v3085_v24 = vpop.f32.mrf.mxu3 }
 0x396   : > { %v3089_v63 = vpack.c.bf16 %v3085_v24, %v3085_v24 }
 0x398   : > { %v3288_v47 = vunpack.c.l.b16 %v3089_v63 }
 0x399   : > { %4028 = vmatpush.bf16.msrb.mxu1 %v8652_v32 }
 0x39a   : > { %v3289_v27 = vpack.c.b16 %v3288_v47, %v3287_v13 }
 0x39c   : > { %3977 = vmatmul.bf16.vlgmr.msra.gmra.mxu1 %v3307_v12  ;;  %3935 = vmatmul.bf16.vlgmr.msra.gmra.mxu2 %v3289_v27 }
 0x39d   : > { %4029 = vmatpush.bf16.msrb.mxu1 %v8651_v9  ;;  %v3110_v5 = vpop.f32.mrf.mxu3 }
 0x39e   : > { %v3115_v7 = vpack.c.bf16 %v3110_v5, %v3110_v5 }
 0x3a0   : > { %v3293_v21 = vunpack.c.l.b16 %v3115_v7 }
 0x3a1   : > { %4030 = vmatpush.bf16.msrb.mxu1 %v8650_v16 }
 0x3a5   : > { %4031 = vmatpush.bf16.msrb.mxu1 %v8649_v6  ;;  %v3112_v38 = vpop.f32.mrf.mxu3 }
 0x3a6   : > { %v3116_v46 = vpack.c.bf16 %v3112_v38, %v3112_v38 }
 0x3a8   : > { %v3294_v52 = vunpack.c.l.b16 %v3116_v46 }
 0x3a9   : > { %4032 = vmatpush.bf16.msrb.mxu1 %v8648_v20 }
 0x3aa   : > { %v3295_v54 = vpack.c.b16 %v3294_v52, %v3293_v21  ;;  %v4042_v52 = vld [vmem:[#allocation14] sm:$0x3] }
 0x3ac   : > { %4033 = vmatmul.bf16.vlgmr.msrb.gmra.mxu1 %v3331_v26  ;;  %3949 = vmatmul.bf16.vlgmr.msrb.gmra.mxu3 %v3295_v54  ;;  %v4157_v54 = vld [vmem:[#allocation14 + $0xc] sm:$0x3] }
 0x3ad   : > { %3991 = vmatmul.bf16.vlgmr.msrb.gmra.mxu2 %v3313_v11  ;;  %v3137_v18 = vpop.f32.mrf.mxu3  ;;  %v4062_v11 = vld [vmem:[#allocation14 + $0x2] sm:$0x3] }
 0x3ae   : > { %v3142_v34 = vpack.c.bf16 %v3137_v18, %v3137_v18  ;;  %v8663_v18 = vld [vmem:[#allocation16 + $0x38] sm:$0xff] }
 0x3b0   : > { %v3299_v50 = vunpack.c.l.b16 %v3142_v34  ;;  %v8661_v34 = vld [vmem:[#allocation16 + $0x28] sm:$0xff] }
 0x3b5   : > { %v3139_v39 = vpop.f32.mrf.mxu3 }
 0x3b6   : > { %v3143_v14 = vpack.c.bf16 %v3139_v39, %v3139_v39  ;;  %v4100_v39 = vld [vmem:[#allocation14 + $0x6] sm:$0x3] }
 0x3b8   : > { %v3300_v61 = vunpack.c.l.b16 %v3143_v14  ;;  %v8679_v14 = vld [vmem:[#allocation16 + $0xb8] sm:$0xff] }
 0x3ba   : > { %v3301_v37 = vpack.c.b16 %v3300_v61, %v3299_v50  ;;  %v4119_v50 = vld [vmem:[#allocation14 + $0x8] sm:$0x3]  ;;  %v8687_v61 = vld [vmem:[#allocation16 + $0xf8] sm:$0xff] }
 0x3bc   : > { %3963 = vmatmul.bf16.vlgmr.msra.gmra.mxu0 %v3301_v37  ;;  %4005 = vmatmul.bf16.vlgmr.msra.gmra.mxu3 %v3319_v42  ;;  %v4138_v42 = vld [vmem:[#allocation14 + $0xa] sm:$0x3] }
 0x3bd   : > { %v3245_v51 = vpop.f32.mrf.mxu3  ;;  %v8659_v37 = vld [vmem:[#allocation16 + $0x18] sm:$0xff] }
 0x3be   : > { %v3250_v40 = vpack.c.bf16 %v3245_v51, %v3245_v51  ;;  %v8668_v51 = vld [vmem:[#allocation16 + $0x60] sm:$0xff] }
 0x3c0   : > { %v3323_v28 = vunpack.c.l.b16 %v3250_v40  ;;  %v8678_v40 = vld [vmem:[#allocation16 + $0xb0] sm:$0xff] }
 0x3c5   : > { %v3247_v2 = vpop.f32.mrf.mxu3 }
 0x3c6   : > { %v3251_v1 = vpack.c.bf16 %v3247_v2, %v3247_v2  ;;  %v8686_v2 = vld [vmem:[#allocation16 + $0xf0] sm:$0xff] }
 0x3c8   : > { %v3324_v19 = vunpack.c.l.b16 %v3251_v1  ;;  %v8658_v1 = vld [vmem:[#allocation16 + $0x10] sm:$0xff] }
 0x3ca   : > { %v3325_v35 = vpack.c.b16 %v3324_v19, %v3323_v28  ;;  %v8667_v28 = vld [vmem:[#allocation16 + $0x58] sm:$0xff]  ;;  %v8677_v19 = vld [vmem:[#allocation16 + $0xa8] sm:$0xff] }
 0x3cc   : > { %4019 = vmatmul.bf16.vlgmr.msrb.gmra.mxu0 %v3325_v35  ;;  %v8685_v35 = vld [vmem:[#allocation16 + $0xe8] sm:$0xff] }
 0x409   : > { %v3922_v45 = vpop.f32.mrf.mxu1 }
 0x40a   : > { %v3923_v63 = vadd.f32 %v9075_v4, %v3922_v45  ;;  %v8657_v45 = vld [vmem:[#allocation16 + $0x8] sm:$0xff] }
 0x411   : > { %v3924_v36 = vpop.f32.mrf.mxu1 }
 0x412   : > { %v3925_v13 = vadd.f32 %v9075_v4, %v3924_v36  ;;  %v8676_v36 = vld [vmem:[#allocation16 + $0xa0] sm:$0xff] }
 0x413   : > { %v8656_v4 = vld [vmem:[#allocation16] sm:$0xff] }
 0x419   : > { %v3978_v29 = vpop.f32.mrf.mxu1 }
 0x41f   : > { %v3936_v17 = vpop.f32.mrf.mxu2 }
 0x420   : > { %v3937_v12 = vadd.f32 %v3936_v17, %v3923_v63  ;;  %v8666_v17 = vld [vmem:[#allocation16 + $0x50] sm:$0xff]  ;;  %v8683_v63 = vld [vmem:[#allocation16 + $0xd8] sm:$0xff] }
 0x421   : > { %v3980_v9 = vpop.f32.mrf.mxu1 }
 0x427   : > { %v3938_v53 = vpop.f32.mrf.mxu2 }
 0x428   : > { %v3939_v41 = vadd.f32 %v3938_v53, %v3925_v13  ;;  %v4176_v53 = vld [vmem:[#allocation14 + $0xe] sm:$0x3]  ;;  %v8674_v13 = vld [vmem:[#allocation16 + $0x90] sm:$0xff] }
 0x429   : > { %v4034_v30 = vpop.f32.mrf.mxu1 }
 0x42f   : > { %v3950_v0 = vpop.f32.mrf.mxu3 }
 0x430   : > { %v3951_v47 = vadd.f32 %v3950_v0, %v3937_v12  ;;  %v3992_v27 = vpop.f32.mrf.mxu2  ;;  %v8684_v0 = vld [vmem:[#allocation16 + $0xe0] sm:$0xff]  ;;  %v8694_v12 = vld [vmem:[#allocation16 + $0x130] sm:$0xff] }
 0x431   : > { %v4036_v20 = vpop.f32.mrf.mxu1 }
 0x437   : > { %v3952_v32 = vpop.f32.mrf.mxu3 }
 0x438   : > { %v3953_v16 = vadd.f32 %v3952_v32, %v3939_v41  ;;  %v3994_v43 = vpop.f32.mrf.mxu2  ;;  %v8675_v32 = vld [vmem:[#allocation16 + $0x98] sm:$0xff]  ;;  %v8693_v41 = vld [vmem:[#allocation16 + $0x128] sm:$0xff] }
 0x439   : > { %v3964_v24 = vpop.f32.mrf.mxu0 }
 0x43a   : > { %v3965_v55 = vadd.f32 %v3964_v24, %v3951_v47  ;;  %v4195_v24 = vld [vmem:[#allocation14 + $0x10] sm:$0x3]  ;;  %v8682_v47 = vld [vmem:[#allocation16 + $0xd0] sm:$0xff] }
 0x43c   : > { %v3979_v5 = vadd.f32 %v3978_v29, %v3965_v55  ;;  %v8695_v29 = vld [vmem:[#allocation16 + $0x138] sm:$0xff]  ;;  %v8673_v55 = vld [vmem:[#allocation16 + $0x88] sm:$0xff] }
 0x43e   : > { %v3993_v48 = vadd.f32 %v3992_v27, %v3979_v5  ;;  %v8692_v27 = vld [vmem:[#allocation16 + $0x120] sm:$0xff]  ;;  %v8711_v5 = vld [vmem:[#allocation16 + $0x1b8] sm:$0xff] }
 0x43f   : > { %v4006_v15 = vpop.f32.mrf.mxu3 }
 0x440   : > { %v4007_v6 = vadd.f32 %v4006_v15, %v3993_v48  ;;  %v8672_v15 = vld [vmem:[#allocation16 + $0x80] sm:$0xff] }
 0x441   : > { %v3966_v33 = vpop.f32.mrf.mxu0  ;;  %v8664_v48 = vld [vmem:[#allocation16 + $0x40] sm:$0xff] }
 0x442   : > { %v3967_v57 = vadd.f32 %v3966_v33, %v3953_v16  ;;  %v8691_v33 = vld [vmem:[#allocation16 + $0x118] sm:$0xff]  ;;  %v8665_v16 = vld [vmem:[#allocation16 + $0x48] sm:$0xff] }
 0x444   : > { %v3981_v60 = vadd.f32 %v3980_v9, %v3967_v57  ;;  %v8681_v9 = vld [vmem:[#allocation16 + $0xc8] sm:$0xff]  ;;  %v8690_v57 = vld [vmem:[#allocation16 + $0x110] sm:$0xff] }
 0x446   : > { %v3995_v31 = vadd.f32 %v3994_v43, %v3981_v60  ;;  %v8703_v60 = vld [vmem:[#allocation16 + $0x178] sm:$0xff]  ;;  %v8680_v43 = vld [vmem:[#allocation16 + $0xc0] sm:$0xff] }
 0x447   : > { %v4008_v23 = vpop.f32.mrf.mxu3 }
 0x448   : > { %v4009_v7 = vadd.f32 %v4008_v23, %v3995_v31  ;;  %v8702_v31 = vld [vmem:[#allocation16 + $0x170] sm:$0xff]  ;;  %v8709_v23 = vld [vmem:[#allocation16 + $0x1a8] sm:$0xff] }
 0x449   : > { %v4020_v3 = vpop.f32.mrf.mxu0 }
 0x44a   : > { %v4021_v59 = vadd.f32 %v4020_v3, %v4007_v6  ;;  %v8710_v3 = vld [vmem:[#allocation16 + $0x1b0] sm:$0xff]  ;;  %v8719_v6 = vld [vmem:[#allocation16 + $0x1f8] sm:$0xff] }
 0x44c   : > { %v4035_v44 = vadd.f32 %v4034_v30, %v4021_v59  ;;  %v8689_v30 = vld [vmem:[#allocation16 + $0x108] sm:$0xff]  ;;  %v8688_v59 = vld [vmem:[#allocation16 + $0x100] sm:$0xff] }
 0x44e   : > { %v4039_v46 = vmax.f32 %v4035_v44, 0.0  ;;  %v8718_v44 = vld [vmem:[#allocation16 + $0x1f0] sm:$0xff] }
 0x451   : > { %v4022_v25 = vpop.f32.mrf.mxu0 }
 0x452   : > { %v4023_v62 = vadd.f32 %v4022_v25, %v4009_v7  ;;  %v8701_v7 = vld [vmem:[#allocation16 + $0x168] sm:$0xff]  ;;  %v8708_v25 = vld [vmem:[#allocation16 + $0x1a0] sm:$0xff] }
 0x454   : > { %v4037_v38 = vadd.f32 %v4036_v20, %v4023_v62  ;;  %v8717_v62 = vld [vmem:[#allocation16 + $0x1e8] sm:$0xff]  ;;  %v8700_v20 = vld [vmem:[#allocation16 + $0x160] sm:$0xff] }
 0x456   : > { %v4040_v26 = vmax.f32 %v4037_v38, 0.0  ;;  %v8707_v38 = vld [vmem:[#allocation16 + $0x198] sm:$0xff] }
 0x458   : > { %v4041_v21 = vpack.c.bf16 %v4040_v26, %v4039_v46  ;;  %v8699_v46 = vld [vmem:[#allocation16 + $0x158] sm:$0xff]  ;;  %v8706_v26 = vld [vmem:[#allocation16 + $0x190] sm:$0xff] }
 0x45a   : > { %4054 = vmatpush.bf16.msra.mxu2 %v4041_v21  ;;  %4073 = vmatpush.bf16.msrb.mxu3 %v4041_v21 }
 0x45b   : > { %4092 = vmatpush.bf16.msra.mxu0 %v4041_v21  ;;  %4168 = vmatpush.bf16.msra.mxu1 %v4041_v21 }
 0x45d   : > { %7475 = vmatmul.msk.bf16.vlgmr.msra.gmra.mxu2 %vm4043_vm1, %v4042_v52  ;;  %7476 = vmatmul.msk.bf16.vlgmr.msrb.gmra.mxu3 %vm4043_vm1, %v4062_v11  ;;  %v8698_v52 = vld [vmem:[#allocation16 + $0x150] sm:$0xff]  ;;  %v8705_v11 = vld [vmem:[#allocation16 + $0x188] sm:$0xff] }
 0x45e   : > { %4111 = vmatpush.bf16.msrb.mxu2 %v4041_v21  ;;  %4130 = vmatpush.bf16.msra.mxu3 %v4041_v21 }
 0x45f   : > { %4149 = vmatpush.bf16.msrb.mxu0 %v4041_v21  ;;  %7481 = vmatmul.msk.bf16.vlgmr.msra.gmra.mxu1 %vm4043_vm1, %v4157_v54  ;;  %v8697_v54 = vld [vmem:[#allocation16 + $0x148] sm:$0xff] }
 0x460   : > { %7477 = vmatmul.msk.bf16.vlgmr.msra.gmra.mxu0 %vm4043_vm1, %v4081_v49  ;;  %4806 = vmatpush.bf16.msrb.mxu1 %v8671_v58  ;;  %v8715_v49 = vld [vmem:[#allocation16 + $0x1d8] sm:$0xff]  ;;  %v8713_v58 = vld [vmem:[#allocation16 + $0x1c8] sm:$0xff] }
 0x462   : > { %4187 = vmatpush.bf16.msra.mxu2 %v4041_v21  ;;  %4206 = vmatpush.bf16.msrb.mxu3 %v4041_v21  ;;  %v8716_v21 = vld [vmem:[#allocation16 + $0x1e0] sm:$0xff] }
 0x463   : > { %4793 = vmatpush.bf16.msra.mxu0 %v8663_v18  ;;  %v8704_v18 = vld [vmem:[#allocation16 + $0x180] sm:$0xff] }
 0x464   : > { %4807 = vmatpush.bf16.msrb.mxu1 %v8670_v22  ;;  %v8696_v22 = vld [vmem:[#allocation16 + $0x140] sm:$0xff] }
 0x467   : > { %4794 = vmatpush.bf16.msra.mxu0 %v8662_v56  ;;  %v8714_v56 = vld [vmem:[#allocation16 + $0x1d0] sm:$0xff] }
 0x468   : > { %4808 = vmatpush.bf16.msrb.mxu1 %v8669_v10 }
 0x46b   : > { %4795 = vmatpush.bf16.msra.mxu0 %v8661_v34 }
 0x46c   : > { %4809 = vmatpush.bf16.msrb.mxu1 %v8668_v51  ;;  %v8726_v51 = vld [vmem:[#allocation16 + $0x230] sm:$0xff] }
 0x46d   : > { %7478 = vmatmul.msk.bf16.vlgmr.msrb.gmra.mxu2 %vm4043_vm1, %v4100_v39  ;;  %7479 = vmatmul.msk.bf16.vlgmr.msra.gmra.mxu3 %vm4043_vm1, %v4119_v50  ;;  %v8712_v50 = vld [vmem:[#allocation16 + $0x1c0] sm:$0xff] }
 0x46e   : > { %4819 = vmatpush.bf16.msrb.mxu2 %v8679_v14  ;;  %4832 = vmatpush.bf16.msra.mxu3 %v8687_v61  ;;  %v8727_v14 = vld [vmem:[#allocation16 + $0x238] sm:$0xff] }
 0x46f   : > { %4796 = vmatpush.bf16.msra.mxu0 %v8660_v8 }
 0x470   : > { %7480 = vmatmul.msk.bf16.vlgmr.msrb.gmra.mxu0 %vm4043_vm1, %v4138_v42  ;;  %4810 = vmatpush.bf16.msrb.mxu1 %v8667_v28  ;;  %v8725_v28 = vld [vmem:[#allocation16 + $0x228] sm:$0xff] }
 0x472   : > { %4820 = vmatpush.bf16.msrb.mxu2 %v8678_v40  ;;  %4833 = vmatpush.bf16.msra.mxu3 %v8686_v2 }
 0x473   : > { %4797 = vmatpush.bf16.msra.mxu0 %v8659_v37 }
 0x474   : > { %4811 = vmatpush.bf16.msrb.mxu1 %v8666_v17 }
 0x476   : > { %4821 = vmatpush.bf16.msrb.mxu2 %v8677_v19  ;;  %4834 = vmatpush.bf16.msra.mxu3 %v8685_v35 }
 0x477   : > { %4798 = vmatpush.bf16.msra.mxu0 %v8658_v1 }
 0x478   : > { %4812 = vmatpush.bf16.msrb.mxu1 %v8665_v16 }
 0x47a   : > { %4822 = vmatpush.bf16.msrb.mxu2 %v8676_v36  ;;  %4835 = vmatpush.bf16.msra.mxu3 %v8684_v0 }
 0x47b   : > { %4799 = vmatpush.bf16.msra.mxu0 %v8657_v45  ;;  %v8724_v45 = vld [vmem:[#allocation16 + $0x220] sm:$0xff] }
 0x47c   : > { %4813 = vmatpush.bf16.msrb.mxu1 %v8664_v48  ;;  %v8742_v48 = vld [vmem:[#allocation19 + $0x74] sm:$0xf] }
 0x47d   : > { %7482 = vmatmul.msk.bf16.vlgmr.msra.gmra.mxu2 %vm4043_vm1, %v4176_v53  ;;  %7483 = vmatmul.msk.bf16.vlgmr.msrb.gmra.mxu3 %vm4043_vm1, %v4195_v24  ;;  %v8723_v53 = vld [vmem:[#allocation16 + $0x218] sm:$0xff] }
 0x47e   : > { %4823 = vmatpush.bf16.msrb.mxu2 %v8675_v32  ;;  %4836 = vmatpush.bf16.msra.mxu3 %v8683_v63  ;;  %v8722_v63 = vld [vmem:[#allocation16 + $0x210] sm:$0xff] }
 0x47f   : > { %4800 = vmatpush.bf16.msra.mxu0 %v8656_v4 }
 0x480   : > { %4858 = vmatpush.bf16.msra.mxu1 %v8703_v60 }
 0x482   : > { %4824 = vmatpush.bf16.msrb.mxu2 %v8674_v13  ;;  %4837 = vmatpush.bf16.msra.mxu3 %v8682_v47  ;;  %v8721_v47 = vld [vmem:[#allocation16 + $0x208] sm:$0xff] }
 0x483   : > { %4845 = vmatpush.bf16.msrb.mxu0 %v8695_v29 }
 0x484   : > { %4859 = vmatpush.bf16.msra.mxu1 %v8702_v31  ;;  %v8740_v31 = vld [vmem:[#allocation19 + $0x64] sm:$0xf] }
 0x486   : > { %4825 = vmatpush.bf16.msrb.mxu2 %v8673_v55  ;;  %4838 = vmatpush.bf16.msra.mxu3 %v8681_v9 }
 0x487   : > { %4846 = vmatpush.bf16.msrb.mxu0 %v8694_v12 }
 0x488   : > { %4860 = vmatpush.bf16.msra.mxu1 %v8701_v7 }
 0x48a   : > { %4826 = vmatpush.bf16.msrb.mxu2 %v8672_v15  ;;  %4839 = vmatpush.bf16.msra.mxu3 %v8680_v43  ;;  %v8741_v43 = vld [vmem:[#allocation19 + $0x64] sm:$0xf0] }
 0x48b   : > { %4847 = vmatpush.bf16.msrb.mxu0 %v8693_v41  ;;  %v8720_v41 = vld [vmem:[#allocation16 + $0x200] sm:$0xff] }
 0x48c   : > { %4861 = vmatpush.bf16.msra.mxu1 %v8700_v20 }
 0x48e   : > { %4871 = vmatpush.bf16.msra.mxu2 %v8711_v5  ;;  %4884 = vmatpush.bf16.msrb.mxu3 %v8719_v6  ;;  %v7830_v5 = vld [vmem:[#allocation19 + $0x70] sm:$0xf] }
 0x48f   : > { %4848 = vmatpush.bf16.msrb.mxu0 %v8692_v27 }
 0x490   : > { %4862 = vmatpush.bf16.msra.mxu1 %v8699_v46 }
 0x492   : > { %4872 = vmatpush.bf16.msra.mxu2 %v8710_v3  ;;  %4885 = vmatpush.bf16.msrb.mxu3 %v8718_v44  ;;  %v7832_v3 = vld [vmem:[#allocation19 + $0x78] sm:$0xf0]  ;;  %v8739_v44 = vld [vmem:[#allocation19 + $0x54] sm:$0xf0] }
 0x493   : > { %4849 = vmatpush.bf16.msrb.mxu0 %v8691_v33  ;;  %v7835_v6 = vor.u32 %v8742_v48, %v7832_v3  ;;  %v8768_v48 = vld [vmem:[#allocation20 + $0xc4] sm:$0xf] }
 0x494   : > { %4863 = vmatpush.bf16.msra.mxu1 %v8698_v52  ;;  %v8736_v52 = vld [vmem:[#allocation19 + $0x44] sm:$0xf] }
 0x495   : > { %v8804_v3 = vld [vmem:[#allocation20 + $0x1e4] sm:$0xf] }
 0x496   : > { %4873 = vmatpush.bf16.msra.mxu2 %v8709_v23  ;;  %4886 = vmatpush.bf16.msrb.mxu3 %v8717_v62  ;;  %v7824_v23 = vld [vmem:[#allocation19 + $0x68] sm:$0xf0]  ;;  %v8738_v62 = vld [vmem:[#allocation19 + $0x54] sm:$0xf] }
 0x497   : > { %4850 = vmatpush.bf16.msrb.mxu0 %v8690_v57  ;;  %v8743_v57 = vld [vmem:[#allocation19 + $0x74] sm:$0xf0]  ;;  %v7827_v7 = vor.u32 %v8740_v31, %v7824_v23  ;;  %v8078_v31 = vld [vmem:[#allocation20 + $0x1e0] sm:$0xf]  ;;  %v8806_v23 = vld [vmem:[#allocation20 + $0x1ec] sm:$0xf0] }
 0x498   : > { %4864 = vmatpush.bf16.msra.mxu1 %v8697_v54  ;;  %v7831_v60 = vor.u32 %v8743_v57, %v7830_v5 }
 0x49a   : > { %4874 = vmatpush.bf16.msra.mxu2 %v8708_v25  ;;  %4887 = vmatpush.bf16.msrb.mxu3 %v8716_v21  ;;  %v7814_v25 = vld [vmem:[#allocation19 + $0x50] sm:$0xf]  ;;  %v8737_v21 = vld [vmem:[#allocation19 + $0x44] sm:$0xf0] }
 0x49b   : > { %4851 = vmatpush.bf16.msrb.mxu0 %v8689_v30  ;;  %v7822_v30 = vld [vmem:[#allocation19 + $0x60] sm:$0xf]  ;;  %v7815_v20 = vor.u32 %v8739_v44, %v7814_v25  ;;  %v8079_v44 = vor.u32 %v8806_v23, %v8078_v31  ;;  %v8784_v31 = vld [vmem:[#allocation20 + $0x144] sm:$0xf] }
 0x49c   : > { %4865 = vmatpush.bf16.msra.mxu1 %v8696_v22 }
 0x49e   : > { %4875 = vmatpush.bf16.msra.mxu2 %v8707_v38  ;;  %4888 = vmatpush.bf16.msrb.mxu3 %v8715_v49  ;;  %v7816_v38 = vld [vmem:[#allocation19 + $0x58] sm:$0xf0]  ;;  %v7808_v49 = vld [vmem:[#allocation19 + $0x48] sm:$0xf0] }
 0x49f   : > { %4852 = vmatpush.bf16.msrb.mxu0 %v8688_v59  ;;  %v7823_v59 = vor.u32 %v8741_v43, %v7822_v30  ;;  %v7819_v46 = vor.u32 %v8738_v62, %v7816_v38  ;;  %v7811_v54 = vor.u32 %v8736_v52, %v7808_v49  ;;  %v7918_v62 = vld [vmem:[#allocation20 + $0xa0] sm:$0xf]  ;;  %v8764_v38 = vld [vmem:[#allocation20 + $0xa4] sm:$0xf]  ;;  %v8802_v49 = vld [vmem:[#allocation20 + $0x1cc] sm:$0xf0] }
 0x4a2   : > { %4876 = vmatpush.bf16.msra.mxu2 %v8706_v26  ;;  %4889 = vmatpush.bf16.msrb.mxu3 %v8714_v56  ;;  %v7806_v26 = vld [vmem:[#allocation19 + $0x40] sm:$0xf]  ;;  %v8735_v56 = vld [vmem:[#allocation19 + $0x34] sm:$0xf0] }
 0x4a6   : > { %4877 = vmatpush.bf16.msra.mxu2 %v8705_v11  ;;  %4890 = vmatpush.bf16.msrb.mxu3 %v8713_v58  ;;  %v7807_v11 = vor.u32 %v8737_v21, %v7806_v26  ;;  %v8734_v58 = vld [vmem:[#allocation19 + $0x34] sm:$0xf]  ;;  %v8800_v26 = vld [vmem:[#allocation20 + $0x1c4] sm:$0xf] }
 0x4a7   : > { %v8064_v21 = vld [vmem:[#allocation20 + $0x1d0] sm:$0xf0] }
 0x4a8   : > { %v8067_v52 = vor.u32 %v8800_v26, %v8064_v21 }
 0x4aa   : > { %4878 = vmatpush.bf16.msra.mxu2 %v8704_v18  ;;  %4891 = vmatpush.bf16.msrb.mxu3 %v8712_v50  ;;  %v7798_v18 = vld [vmem:[#allocation19 + $0x30] sm:$0xf]  ;;  %v8732_v50 = vld [vmem:[#allocation19 + $0x24] sm:$0xf] }
 0x4ab   : > { %v7799_v22 = vor.u32 %v8735_v56, %v7798_v18 }
 0x4dc   : > { %v4170_v8 = vpop.f32.mrf.mxu1 }
 0x4dd   : > { %v4094_v34 = vpop.f32.mrf.mxu0  ;;  %v4174_v35 = vpack.c.bf16 %v4170_v8, %v4170_v8  ;;  %v8733_v8 = vld [vmem:[#allocation19 + $0x24] sm:$0xf0] }
 0x4de   : > { %v4098_v10 = vpack.c.bf16 %v4094_v34, %v4094_v34  ;;  %v7800_v34 = vld [vmem:[#allocation19 + $0x38] sm:$0xf0] }
 0x4e0   : > { %4827 = vmatmul.bf16.vlgmr.msrb.gmra.mxu2 %v4098_v10  ;;  %v4056_v39 = vpop.f32.mrf.mxu2  ;;  %v4075_v42 = vpop.f32.mrf.mxu3  ;;  %v7790_v10 = vld [vmem:[#allocation19 + $0x20] sm:$0xf] }
 0x4e1   : > { %v4060_v61 = vpack.c.bf16 %v4056_v39, %v4056_v39  ;;  %v4079_v37 = vpack.c.bf16 %v4075_v42, %v4075_v42  ;;  %5027 = vmatpush.bf16.msrb.mxu2 %v7835_v6  ;;  %v8080_v6 = vld [vmem:[#allocation20 + $0x1f0] sm:$0xf0] }
 0x4e2   : > { %v8083_v25 = vor.u32 %v8804_v3, %v8080_v6 }
 0x4e3   : > { %4801 = vmatmul.bf16.vlgmr.msra.gmra.mxu0 %v4060_v61  ;;  %4814 = vmatmul.bf16.vlgmr.msrb.gmra.mxu1 %v4079_v37  ;;  %v7792_v61 = vld [vmem:[#allocation19 + $0x28] sm:$0xf0] }
 0x4e4   : > { %4897 = vmatpush.bf16.msra.mxu0 %v8727_v14  ;;  %v4172_v2 = vpop.f32.mrf.mxu1  ;;  %5014 = vmatpush.bf16.msrb.mxu1 %v7831_v60  ;;  %v7803_v14 = vor.u32 %v8734_v58, %v7800_v34  ;;  %v7936_v60 = vld [vmem:[#allocation20 + $0xd0] sm:$0xf0]  ;;  %v7902_v58 = vld [vmem:[#allocation20 + $0x80] sm:$0xf] }
 0x4e5   : > { %v4096_v40 = vpop.f32.mrf.mxu0  ;;  %5028 = vmatpush.bf16.msrb.mxu2 %v7827_v7  ;;  %v7782_v2 = vld [vmem:[#allocation19 + $0x10] sm:$0xf]  ;;  %v7939_v7 = vor.u32 %v8768_v48, %v7936_v60  ;;  %v8752_v48 = vld [vmem:[#allocation20 + $0x44] sm:$0xf]  ;;  %v7872_v60 = vld [vmem:[#allocation20 + $0x50] sm:$0xf0] }
 0x4e6   : > { %v7795_v40 = vor.u32 %v8732_v50, %v7792_v61  ;;  %v8760_v50 = vld [vmem:[#allocation20 + $0x84] sm:$0xf]  ;;  %v7904_v61 = vld [vmem:[#allocation20 + $0x90] sm:$0xf0] }
 0x4e8   : > { %v4058_v1 = vpop.f32.mrf.mxu2  ;;  %4898 = vmatpush.bf16.msra.mxu0 %v8726_v51  ;;  %v4077_v19 = vpop.f32.mrf.mxu3  ;;  %5015 = vmatpush.bf16.msrb.mxu1 %v7823_v59  ;;  %v7791_v51 = vor.u32 %v8733_v8, %v7790_v10  ;;  %v8796_v8 = vld [vmem:[#allocation20 + $0x1a4] sm:$0xf] }
 0x4e9   : > { %5029 = vmatpush.bf16.msrb.mxu2 %v7819_v46  ;;  %v8731_v1 = vld [vmem:[#allocation19 + $0x14] sm:$0xf0]  ;;  %v7920_v46 = vld [vmem:[#allocation20 + $0xb0] sm:$0xf0] }
 0x4ea   : > { %v7923_v10 = vor.u32 %v8764_v38, %v7920_v46  ;;  %v8748_v38 = vld [vmem:[#allocation20 + $0x24] sm:$0xf]  ;;  %v7856_v46 = vld [vmem:[#allocation20 + $0x30] sm:$0xf0] }
 0x4ec   : > { %4899 = vmatpush.bf16.msra.mxu0 %v8725_v28  ;;  %5016 = vmatpush.bf16.msrb.mxu1 %v7815_v20  ;;  %v8730_v28 = vld [vmem:[#allocation19 + $0x14] sm:$0xf]  ;;  %v8766_v20 = vld [vmem:[#allocation20 + $0xac] sm:$0xf0] }
 0x4ed   : > { %v4151_v17 = vpop.f32.mrf.mxu0  ;;  %5030 = vmatpush.bf16.msrb.mxu2 %v7811_v54  ;;  %v7919_v18 = vor.u32 %v8766_v20, %v7918_v62  ;;  %v7854_v62 = vld [vmem:[#allocation20 + $0x20] sm:$0xf]  ;;  %v8750_v20 = vld [vmem:[#allocation20 + $0x2c] sm:$0xf0] }
 0x4ee   : > { %v4155_v0 = vpack.c.bf16 %v4151_v17, %v4151_v17 }
 0x4f0   : > { %4879 = vmatmul.bf16.vlgmr.msra.gmra.mxu2 %v4174_v35  ;;  %v4113_v36 = vpop.f32.mrf.mxu2  ;;  %4900 = vmatpush.bf16.msra.mxu0 %v8724_v45  ;;  %v4132_v29 = vpop.f32.mrf.mxu3  ;;  %v7783_v35 = vor.u32 %v8731_v1, %v7782_v2  ;;  %v7784_v45 = vld [vmem:[#allocation19 + $0x18] sm:$0xf0] }
 0x4f1   : > { %v4117_v4 = vpack.c.bf16 %v4113_v36, %v4113_v36  ;;  %v4136_v32 = vpack.c.bf16 %v4132_v29, %v4132_v29  ;;  %5017 = vmatpush.bf16.msrb.mxu1 %v7807_v11  ;;  %5031 = vmatpush.bf16.msrb.mxu2 %v7803_v14  ;;  %v7787_v36 = vor.u32 %v8730_v28, %v7784_v45  ;;  %v7774_v29 = vld [vmem:[#allocation19] sm:$0xf] }
 0x4f2   : > { %v8062_v11 = vld [vmem:[#allocation20 + $0x1c0] sm:$0xf] }
 0x4f3   : > { %4840 = vmatmul.bf16.vlgmr.msra.gmra.mxu3 %v4117_v4  ;;  %4853 = vmatmul.bf16.vlgmr.msrb.gmra.mxu0 %v4136_v32  ;;  %v8728_v32 = vld [vmem:[#allocation19 + $0x4] sm:$0xf]  ;;  %v8063_v56 = vor.u32 %v8802_v49, %v8062_v11  ;;  %v8046_v14 = vld [vmem:[#allocation20 + $0x1a0] sm:$0xf]  ;;  %v7855_v49 = vor.u32 %v8750_v20, %v7854_v62  ;;  %v7910_v62 = vld [vmem:[#allocation20 + $0x88] sm:$0xf] }
 0x4f4   : > { %4866 = vmatmul.bf16.vlgmr.msra.gmra.mxu1 %v4155_v0  ;;  %4901 = vmatpush.bf16.msra.mxu0 %v8723_v53  ;;  %v9076_v0 = vld [vmem:[#allocation17] ss:$0 sm:$0xff]  ;;  %v8729_v53 = vld [vmem:[#allocation19 + $0x4] sm:$0xf0]  ;;  %v8763_v20 = vld [vmem:[#allocation20 + $0x94] sm:$0xf0] }
 0x4f5   : > { %v4153_v24 = vpop.f32.mrf.mxu0  ;;  %5018 = vmatpush.bf16.msrb.mxu1 %v7799_v22  ;;  %5032 = vmatpush.bf16.msrb.mxu2 %v7795_v40  ;;  %v8762_v22 = vld [vmem:[#allocation20 + $0x8c] sm:$0xf0] }
 0x4f6   : > { %v7775_v24 = vor.u32 %v8729_v53, %v7774_v29  ;;  %v7903_v45 = vor.u32 %v8762_v22, %v7902_v58  ;;  %v8758_v29 = vld [vmem:[#allocation20 + $0x6c] sm:$0xf0]  ;;  %v8756_v53 = vld [vmem:[#allocation20 + $0x64] sm:$0xf]  ;;  %v7859_v22 = vor.u32 %v8748_v38, %v7856_v46  ;;  %v8761_v38 = vld [vmem:[#allocation20 + $0x8c] sm:$0xf]  ;;  %v7911_v46 = vor.u32 %v8763_v20, %v7910_v62 }
 0x4f7   : > { %v8779_v62 = vld [vmem:[#allocation20 + $0x114] sm:$0xf0] }
 0x4f8   : > { %v4115_v12 = vpop.f32.mrf.mxu2  ;;  %v4134_v13 = vpop.f32.mrf.mxu3  ;;  %4902 = vmatpush.bf16.msra.mxu0 %v8722_v63  ;;  %v7776_v63 = vld [vmem:[#allocation19 + $0x8] sm:$0xf0] }
 0x4f9   : > { %5019 = vmatpush.bf16.msrb.mxu1 %v7791_v51  ;;  %5033 = vmatpush.bf16.msrb.mxu2 %v7787_v36  ;;  %v7779_v12 = vor.u32 %v8728_v32, %v7776_v63  ;;  %v8794_v36 = vld [vmem:[#allocation20 + $0x18c] sm:$0xf0]  ;;  %v7888_v32 = vld [vmem:[#allocation20 + $0x70] sm:$0xf0] }
 0x4fc   : > { %4903 = vmatpush.bf16.msra.mxu0 %v8721_v47  ;;  %v7950_v47 = vld [vmem:[#allocation20 + $0xe0] sm:$0xf] }
 0x4fd   : > { %5020 = vmatpush.bf16.msrb.mxu1 %v7783_v35  ;;  %5034 = vmatpush.bf16.msrb.mxu2 %v7779_v12 }
 0x500   : > { %v4189_v55 = vpop.f32.mrf.mxu2  ;;  %v4208_v27 = vpop.f32.mrf.mxu3  ;;  %4904 = vmatpush.bf16.msra.mxu0 %v8720_v41  ;;  %v8774_v41 = vld [vmem:[#allocation20 + $0xec] sm:$0xf0] }
 0x501   : > { %v4193_v9 = vpack.c.bf16 %v4189_v55, %v4189_v55  ;;  %v4212_v33 = vpack.c.bf16 %v4208_v27, %v4208_v27  ;;  %5021 = vmatpush.bf16.msrb.mxu1 %v7775_v24  ;;  %v8772_v55 = vld [vmem:[#allocation20 + $0xe4] sm:$0xf]  ;;  %v7952_v27 = vld [vmem:[#allocation20 + $0xf0] sm:$0xf0]  ;;  %5477 = vmatpush.bf16.msra.mxu2 %v8083_v25  ;;  %v8786_v25 = vld [vmem:[#allocation20 + $0x14c] sm:$0xf0] }
 0x502   : > { %v7955_v57 = vor.u32 %v8772_v55, %v7952_v27  ;;  %v8016_v55 = vld [vmem:[#allocation20 + $0x170] sm:$0xf0]  ;;  %v8790_v27 = vld [vmem:[#allocation20 + $0x16c] sm:$0xf0] }
 0x503   : > { %4892 = vmatmul.bf16.vlgmr.msrb.gmra.mxu3 %v4193_v9  ;;  %4905 = vmatmul.bf16.vlgmr.msra.gmra.mxu0 %v4212_v33  ;;  %v7951_v9 = vor.u32 %v8774_v41, %v7950_v47  ;;  %v7934_v33 = vld [vmem:[#allocation20 + $0xc0] sm:$0xf] }
 0x504   : > { %5451 = vmatpush.bf16.msrb.mxu0 %v8079_v44  ;;  %v7875_v44 = vor.u32 %v8752_v48, %v7872_v60  ;;  %v7926_v48 = vld [vmem:[#allocation20 + $0xa8] sm:$0xf]  ;;  %v8767_v60 = vld [vmem:[#allocation20 + $0xb4] sm:$0xf0] }
 0x505   : > { %5438 = vmatpush.bf16.msra.mxu3 %v7951_v9  ;;  %5464 = vmatpush.bf16.msra.mxu1 %v7955_v57  ;;  %v8014_v9 = vld [vmem:[#allocation20 + $0x160] sm:$0xf]  ;;  %v8754_v57 = vld [vmem:[#allocation20 + $0x4c] sm:$0xf0] }
 0x506   : > { %5478 = vmatpush.bf16.msra.mxu2 %v8067_v52  ;;  %v8015_v6 = vor.u32 %v8790_v27, %v8014_v9  ;;  %v8780_v52 = vld [vmem:[#allocation20 + $0x124] sm:$0xf] }
 0x508   : > { %v4191_v16 = vpop.f32.mrf.mxu2  ;;  %v4210_v15 = vpop.f32.mrf.mxu3  ;;  %5452 = vmatpush.bf16.msrb.mxu0 %v8063_v56  ;;  %v8782_v56 = vld [vmem:[#allocation20 + $0x12c] sm:$0xf0] }
 0x509   : > { %v8770_v16 = vld [vmem:[#allocation20 + $0xcc] sm:$0xf0]  ;;  %5465 = vmatpush.bf16.msra.mxu1 %v7939_v7  ;;  %v7998_v7 = vld [vmem:[#allocation20 + $0x140] sm:$0xf] }
 0x50a   : > { %v7935_v43 = vor.u32 %v8770_v16, %v7934_v33  ;;  %v7891_v33 = vor.u32 %v8756_v53, %v7888_v32  ;;  %v7870_v16 = vld [vmem:[#allocation20 + $0x40] sm:$0xf]  ;;  %v7999_v21 = vor.u32 %v8786_v25, %v7998_v7  ;;  %v8807_v53 = vld [vmem:[#allocation20 + $0x1f4] sm:$0xf0] }
 0x50b   : > { %v7871_v23 = vor.u32 %v8754_v57, %v7870_v16  ;;  %v8803_v25 = vld [vmem:[#allocation20 + $0x1d4] sm:$0xf0] }
 0x50c   : > { %5439 = vmatpush.bf16.msra.mxu3 %v7935_v43 }
 0x50d   : > { %5466 = vmatpush.bf16.msra.mxu1 %v7923_v10  ;;  %v8746_v10 = vld [vmem:[#allocation20 + $0xc] sm:$0xf0] }
 0x510   : > { %5440 = vmatpush.bf16.msra.mxu3 %v7919_v18  ;;  %v7982_v18 = vld [vmem:[#allocation20 + $0x120] sm:$0xf] }
 0x514   : > { %5441 = vmatpush.bf16.msra.mxu3 %v7903_v45  ;;  %v8778_v45 = vld [vmem:[#allocation20 + $0x10c] sm:$0xf0] }
 0x560   : > { %v4802_v39 = vpop.f32.mrf.mxu0  ;;  %v4815_v42 = vpop.f32.mrf.mxu1 }
 0x561   : > { %v4803_v13 = vadd.f32 %v9076_v0, %v4802_v39  ;;  %v8048_v39 = vld [vmem:[#allocation20 + $0x1b0] sm:$0xf0]  ;;  %v7907_v0 = vor.u32 %v8760_v50, %v7904_v61 }
 0x562   : > { %v8051_v1 = vor.u32 %v8796_v8, %v8048_v39  ;;  %v8744_v8 = vld [vmem:[#allocation20 + $0x4] sm:$0xf]  ;;  %v7840_v39 = vld [vmem:[#allocation20 + $0x10] sm:$0xf0] }
 0x563   : > { %v10566_v37 = vpop.f32.mrf.mxu2  ;;  %v4816_v59 = vadd.f32 %v4815_v42, %v4803_v13  ;;  %v8798_v42 = vld [vmem:[#allocation20 + $0x1ac] sm:$0xf0]  ;;  %v8788_v13 = vld [vmem:[#allocation20 + $0x164] sm:$0xf]  ;;  %5467 = vmatpush.bf16.msra.mxu1 %v7907_v0  ;;  %v7843_v0 = vor.u32 %v8744_v8, %v7840_v39  ;;  %v8793_v39 = vld [vmem:[#allocation20 + $0x18c] sm:$0xf] }
 0x564   : > { %v8047_v28 = vor.u32 %v8798_v42, %v8046_v14  ;;  %5479 = vmatpush.bf16.msra.mxu2 %v8051_v1  ;;  %v8019_v43 = vor.u32 %v8788_v13, %v8016_v55  ;;  %v7958_v14 = vld [vmem:[#allocation20 + $0xe8] sm:$0xf]  ;;  %v8776_v1 = vld [vmem:[#allocation20 + $0x104] sm:$0xf]  ;;  %v7944_v55 = vld [vmem:[#allocation20 + $0xd8] sm:$0xf0] }
 0x565   : > { %v4829_v34 = vadd.f32 %v10566_v37, %v4816_v59  ;;  %v8032_v37 = vld [vmem:[#allocation20 + $0x190] sm:$0xf0] }
 0x566   : > { %5453 = vmatpush.bf16.msrb.mxu0 %v8047_v28  ;;  %v8000_v59 = vld [vmem:[#allocation20 + $0x150] sm:$0xf0] }
 0x567   : > { %5468 = vmatpush.bf16.msra.mxu1 %v7891_v33 }
 0x568   : > { %v4804_v19 = vpop.f32.mrf.mxu0  ;;  %v4817_v17 = vpop.f32.mrf.mxu1 }
 0x569   : > { %v8792_v19 = vld [vmem:[#allocation20 + $0x184] sm:$0xf]  ;;  %v8030_v17 = vld [vmem:[#allocation20 + $0x180] sm:$0xf] }
 0x56a   : > { %v8035_v63 = vor.u32 %v8792_v19, %v8032_v37  ;;  %v8031_v12 = vor.u32 %v8794_v36, %v8030_v17  ;;  %v7968_v19 = vld [vmem:[#allocation20 + $0x110] sm:$0xf0]  ;;  %v8805_v17 = vld [vmem:[#allocation20 + $0x1ec] sm:$0xf]  ;;  %v8088_v36 = vld [vmem:[#allocation20 + $0x1f8] sm:$0xf0] }
 0x56b   : > { %v4830_v4 = vpop.f32.mrf.mxu2  ;;  %5469 = vmatpush.bf16.msra.mxu1 %v7875_v44  ;;  %v7971_v13 = vor.u32 %v8776_v1, %v7968_v19  ;;  %v8091_v27 = vor.u32 %v8805_v17, %v8088_v36  ;;  %v8791_v36 = vld [vmem:[#allocation20 + $0x174] sm:$0xf0] }
 0x56c   : > { %v7886_v4 = vld [vmem:[#allocation20 + $0x60] sm:$0xf]  ;;  %5480 = vmatpush.bf16.msra.mxu2 %v8035_v63  ;;  %5454 = vmatpush.bf16.msrb.mxu0 %v8031_v12  ;;  %v7942_v63 = vld [vmem:[#allocation20 + $0xc8] sm:$0xf]  ;;  %v8771_v12 = vld [vmem:[#allocation20 + $0xd4] sm:$0xf0] }
 0x56d   : > { %v7887_v41 = vor.u32 %v8758_v29, %v7886_v4  ;;  %v8086_v29 = vld [vmem:[#allocation20 + $0x1e8] sm:$0xf]  ;;  %v7943_v16 = vor.u32 %v8771_v12, %v7942_v63  ;;  %v8785_v63 = vld [vmem:[#allocation20 + $0x14c] sm:$0xf] }
 0x56e   : > { %v8087_v33 = vor.u32 %v8807_v53, %v8086_v29 }
 0x56f   : > { %5442 = vmatpush.bf16.msra.mxu3 %v7887_v41  ;;  %5470 = vmatpush.bf16.msra.mxu1 %v7859_v22  ;;  %v8769_v41 = vld [vmem:[#allocation20 + $0xcc] sm:$0xf] }
 0x570   : > { %v10568_v15 = vpop.f32.mrf.mxu0  ;;  %5481 = vmatpush.bf16.msra.mxu2 %v8019_v43  ;;  %5455 = vmatpush.bf16.msrb.mxu0 %v8015_v6  ;;  %v7947_v57 = vor.u32 %v8769_v41, %v7944_v55  ;;  %v7928_v43 = vld [vmem:[#allocation20 + $0xb8] sm:$0xf0]  ;;  %v8757_v22 = vld [vmem:[#allocation20 + $0x6c] sm:$0xf]  ;;  %v8787_v41 = vld [vmem:[#allocation20 + $0x154] sm:$0xf0] }
 0x571   : > { %v10570_v5 = vpop.f32.mrf.mxu1 }
 0x573   : > { %v10572_v30 = vpop.f32.mrf.mxu2  ;;  %5443 = vmatpush.bf16.msra.mxu3 %v7871_v23  ;;  %5471 = vmatpush.bf16.msra.mxu1 %v7843_v0  ;;  %v8072_v23 = vld [vmem:[#allocation20 + $0x1d8] sm:$0xf0]  ;;  %v7862_v0 = vld [vmem:[#allocation20 + $0x28] sm:$0xf] }
 0x574   : > { %5456 = vmatpush.bf16.msrb.mxu0 %v7999_v21  ;;  %v8797_v21 = vld [vmem:[#allocation20 + $0x1ac] sm:$0xf] }
 0x576   : > { %v4841_v54 = vpop.f32.mrf.mxu3 }
 0x577   : > { %v4842_v51 = vadd.f32 %v4841_v54, %v4829_v34  ;;  %v7984_v54 = vld [vmem:[#allocation20 + $0x130] sm:$0xf0]  ;;  %v7838_v34 = vld [vmem:[#allocation20] sm:$0xf]  ;;  %5444 = vmatpush.bf16.msra.mxu3 %v7855_v49  ;;  %v8054_v49 = vld [vmem:[#allocation20 + $0x1a8] sm:$0xf] }
 0x578   : > { %v4856_v40 = vpop.f32.mrf.mxu0  ;;  %v7987_v42 = vor.u32 %v8780_v52, %v7984_v54  ;;  %v7839_v28 = vor.u32 %v8746_v10, %v7838_v34  ;;  %v8056_v52 = vld [vmem:[#allocation20 + $0x1b8] sm:$0xf0]  ;;  %v8799_v54 = vld [vmem:[#allocation20 + $0x1b4] sm:$0xf0] }
 0x579   : > { %v4869_v2 = vpop.f32.mrf.mxu1  ;;  %v4855_v24 = vadd.f32 %v10568_v15, %v4842_v51  ;;  %v8773_v51 = vld [vmem:[#allocation20 + $0xec] sm:$0xf]  ;;  %v7960_v40 = vld [vmem:[#allocation20 + $0xf8] sm:$0xf0] }
 0x57a   : > { %v7983_v2 = vor.u32 %v8782_v56, %v7982_v18  ;;  %v8055_v18 = vor.u32 %v8799_v54, %v8054_v49  ;;  %v7894_v56 = vld [vmem:[#allocation20 + $0x68] sm:$0xf]  ;;  %v7896_v10 = vld [vmem:[#allocation20 + $0x78] sm:$0xf0] }
 0x57b   : > { %v4882_v35 = vpop.f32.mrf.mxu2  ;;  %v4868_v3 = vadd.f32 %v10570_v5, %v4855_v24  ;;  %v8003_v5 = vor.u32 %v8784_v31, %v8000_v59  ;;  %v7963_v24 = vor.u32 %v8773_v51, %v7960_v40  ;;  %5445 = vmatpush.bf16.msra.mxu3 %v7839_v28  ;;  %v8801_v31 = vld [vmem:[#allocation20 + $0x1cc] sm:$0xf]  ;;  %v8070_v59 = vld [vmem:[#allocation20 + $0x1c8] sm:$0xf]  ;;  %v7899_v8 = vor.u32 %v8757_v22, %v7896_v10  ;;  %v8755_v40 = vld [vmem:[#allocation20 + $0x54] sm:$0xf0] }
 0x57c   : > { %v7966_v35 = vld [vmem:[#allocation20 + $0x100] sm:$0xf]  ;;  %5457 = vmatpush.bf16.msrb.mxu0 %v7983_v2  ;;  %v8075_v7 = vor.u32 %v8801_v31, %v8072_v23  ;;  %v8071_v44 = vor.u32 %v8803_v25, %v8070_v59  ;;  %v7878_v51 = vld [vmem:[#allocation20 + $0x48] sm:$0xf]  ;;  %v8753_v2 = vld [vmem:[#allocation20 + $0x4c] sm:$0xf] }
 0x57d   : > { %v4881_v26 = vadd.f32 %v10572_v30, %v4868_v3  ;;  %v8775_v30 = vld [vmem:[#allocation20 + $0xf4] sm:$0xf0]  ;;  %5482 = vmatpush.bf16.msra.mxu2 %v8003_v5  ;;  %v7967_v9 = vor.u32 %v8778_v45, %v7966_v35  ;;  %v8765_v3 = vld [vmem:[#allocation20 + $0xac] sm:$0xf]  ;;  %v7879_v1 = vor.u32 %v8755_v40, %v7878_v51  ;;  %v7880_v28 = vld [vmem:[#allocation20 + $0x58] sm:$0xf0] }
 0x57e   : > { %v4843_v47 = vpop.f32.mrf.mxu3  ;;  %v7959_v4 = vor.u32 %v8775_v30, %v7958_v14  ;;  %v7931_v6 = vor.u32 %v8765_v3, %v7928_v43  ;;  %v8040_v14 = vld [vmem:[#allocation20 + $0x198] sm:$0xf0]  ;;  %v8038_v30 = vld [vmem:[#allocation20 + $0x188] sm:$0xf]  ;;  %v7883_v19 = vor.u32 %v8753_v2, %v7880_v28  ;;  %v8789_v35 = vld [vmem:[#allocation20 + $0x16c] sm:$0xf] }
 0x57f   : > { %v8024_v45 = vld [vmem:[#allocation20 + $0x178] sm:$0xf0]  ;;  %v8783_v31 = vld [vmem:[#allocation20 + $0x134] sm:$0xf0]  ;;  %v8777_v59 = vld [vmem:[#allocation20 + $0x10c] sm:$0xf] }
 0x580   : > { %v4906_v15 = vpop.f32.mrf.mxu0  ;;  %5490 = vmatpush.bf16.msrb.mxu3 %v7959_v4  ;;  %5458 = vmatpush.bf16.msrb.mxu0 %v7967_v9  ;;  %v8027_v17 = vor.u32 %v8789_v35, %v8024_v45  ;;  %v8751_v4 = vld [vmem:[#allocation20 + $0x34] sm:$0xf0]  ;;  %v7992_v3 = vld [vmem:[#allocation20 + $0x138] sm:$0xf0]  ;;  %v7974_v25 = vld [vmem:[#allocation20 + $0x108] sm:$0xf] }
 0x581   : > { %5483 = vmatpush.bf16.msra.mxu2 %v7987_v42  ;;  %v7863_v53 = vor.u32 %v8751_v4, %v7862_v0  ;;  %v7975_v20 = vor.u32 %v8779_v62, %v7974_v25  ;;  %v8214_v10 = vld [vmem:[#allocation22 + $0xf0] sm:$0xf]  ;;  %v8206_v40 = vld [vmem:[#allocation22 + $0xe0] sm:$0xf]  ;;  %v8837_v2 = vld [vmem:[#allocation22 + $0xe4] sm:$0xf0] }
 0x582   : > { %v8126_v35 = vld [vmem:[#allocation22 + $0x40] sm:$0xf]  ;;  %v8817_v45 = vld [vmem:[#allocation22 + $0x44] sm:$0xf0]  ;;  %v8118_v4 = vld [vmem:[#allocation22 + $0x30] sm:$0xf] }
 0x583   : > { %v8262_v25 = vld [vmem:[#allocation22 + $0x150] sm:$0xf] }
 0x584   : > { %5503 = vmatpush.bf16.msra.mxu0 %v8087_v33  ;;  %5491 = vmatpush.bf16.msrb.mxu3 %v7943_v16  ;;  %v8747_v33 = vld [vmem:[#allocation20 + $0x14] sm:$0xf0]  ;;  %v8745_v16 = vld [vmem:[#allocation20 + $0xc] sm:$0xf] }
 0x585   : > { %5484 = vmatpush.bf16.msra.mxu2 %v7971_v13  ;;  %v8008_v13 = vld [vmem:[#allocation20 + $0x158] sm:$0xf0] }
 0x586   : > { %v4893_v11 = vpop.f32.mrf.mxu3  ;;  %v8011_v55 = vor.u32 %v8785_v63, %v8008_v13  ;;  %v8278_v63 = vld [vmem:[#allocation22 + $0x170] sm:$0xf] }
 0x587   : > { %v4894_v58 = vadd.f32 %v4893_v11, %v4881_v26  ;;  %v7912_v26 = vld [vmem:[#allocation20 + $0x98] sm:$0xf0]  ;;  %v8059_v11 = vor.u32 %v8797_v21, %v8056_v52  ;;  %v8150_v21 = vld [vmem:[#allocation22 + $0x70] sm:$0xf]  ;;  %v8823_v52 = vld [vmem:[#allocation22 + $0x74] sm:$0xf0] }
 0x588   : > { %v4908_v61 = vpop.f32.mrf.mxu0  ;;  %5504 = vmatpush.bf16.msra.mxu0 %v8071_v44  ;;  %v7915_v5 = vor.u32 %v8761_v38, %v7912_v26  ;;  %v4928_v38 = vld [vmem:[%s10710_s22] sm:$0x3]  ;;  %v8151_v54 = vor.u32 %v8823_v52, %v8150_v21  ;;  %v8809_v21 = vld [vmem:[#allocation22 + $0x4] sm:$0xf0]  ;;  %s6274_s22 = scalar_lea.hbm %s10714_s21, %s10705_s15  ;;  %s9523_s15 = scalar_lea.hbm %s10714_s21, 2 }
 0x589   : > { %v4907_v50 = vadd.f32 %v4906_v15, %v4894_v58  ;;  %v7927_v15 = vor.u32 %v8767_v60, %v7926_v48  ;;  %v8759_v58 = vld [vmem:[#allocation20 + $0x74] sm:$0xf0]  ;;  %v7848_v48 = vld [vmem:[#allocation20 + $0x18] sm:$0xf0]  ;;  %v8781_v60 = vld [vmem:[#allocation20 + $0x12c] sm:$0xf] }
 0x58a   : > { %v7895_v34 = vor.u32 %v8759_v58, %v7894_v56  ;;  %v8795_v61 = vld [vmem:[#allocation20 + $0x194] sm:$0xf0]  ;;  %v7995_v43 = vor.u32 %v8781_v60, %v7992_v3  ;;  %v4931_v49 = vperm.slane %v4928_v38, 1  ;;  %v8142_v56 = vld [vmem:[#allocation22 + $0x60] sm:$0xf] }
 0x58b   : > { %v4910_v37 = vmax.f32 %v4907_v50, 0.0  ;;  %5492 = vmatpush.bf16.msrb.mxu3 %v7927_v15  ;;  %v8043_v50 = vor.u32 %v8793_v39, %v8040_v14  ;;  %v8039_v42 = vor.u32 %v8795_v61, %v8038_v30  ;;  %v7851_v15 = vor.u32 %v8745_v16, %v7848_v48  ;;  %v8821_v58 = vld [vmem:[#allocation22 + $0x64] sm:$0xf0]  ;;  %v8819_v61 = vld [vmem:[#allocation22 + $0x54] sm:$0xf0] }
 0x58c   : > { %5505 = vmatpush.bf16.msra.mxu0 %v8055_v18  ;;  %v8143_v14 = vor.u32 %v8821_v58, %v8142_v56  ;;  %v8270_v16 = vld [vmem:[#allocation22 + $0x160] sm:$0xf]  ;;  %v8342_v3 = vld [vmem:[#allocation22 + $0x1f0] sm:$0xf]  ;;  %v8849_v56 = vld [vmem:[#allocation22 + $0x144] sm:$0xf0] }
 0x58d   : > { %v4911_v32 = vpack.c.bf16 %v4910_v37, %v4910_v37  ;;  %v8022_v37 = vld [vmem:[#allocation20 + $0x168] sm:$0xf]  ;;  %v8326_v58 = vld [vmem:[#allocation22 + $0x1d0] sm:$0xf] }
 0x58e   : > { %v4895_v47 = vpop.f32.mrf.mxu3  ;;  %v8023_v29 = vor.u32 %v8791_v36, %v8022_v37  ;;  %v8198_v37 = vld [vmem:[#allocation22 + $0xd0] sm:$0xf]  ;;  %v8835_v36 = vld [vmem:[#allocation22 + $0xd4] sm:$0xf0] }
 0x58f   : > { %5022 = vmatmul.bf16.vlgmr.msrb.gmra.mxu1 %v4911_v32  ;;  %5035 = vmatmul.bf16.vlgmr.msrb.gmra.mxu2 %v4911_v32  ;;  %v8749_v32 = vld [vmem:[#allocation20 + $0x2c] sm:$0xf]  ;;  %v8006_v47 = vld [vmem:[#allocation20 + $0x148] sm:$0xf]  ;;  %v8199_v0 = vor.u32 %v8835_v36, %v8198_v37  ;;  %v8838_v37 = vld [vmem:[#allocation22 + $0xf4] sm:$0xf] }
 0x590   : > { %5516 = vmatpush.bf16.msrb.mxu1 %v7963_v24  ;;  %5529 = vmatpush.bf16.msrb.mxu2 %v8091_v27  ;;  %v7864_v24 = vld [vmem:[#allocation20 + $0x38] sm:$0xf0]  ;;  %v8007_v9 = vor.u32 %v8787_v41, %v8006_v47  ;;  %v7846_v27 = vld [vmem:[#allocation20 + $0x8] sm:$0xf]  ;;  %v8110_v41 = vld [vmem:[#allocation22 + $0x20] sm:$0xf] }
 0x591   : > { %5493 = vmatpush.bf16.msrb.mxu3 %v7911_v46  ;;  %5506 = vmatpush.bf16.msra.mxu0 %v8039_v42  ;;  %v7867_v12 = vor.u32 %v8749_v32, %v7864_v24  ;;  %v4930_v46 = vperm.slane %v4928_v38, 0  ;;  %v8833_v24 = vld [vmem:[#allocation22 + $0xc4] sm:$0xf0]  ;;  %v8334_v38 = vld [vmem:[#allocation22 + $0x1e0] sm:$0xf] }
 0x594   : > { %5517 = vmatpush.bf16.msrb.mxu1 %v7947_v57  ;;  %5530 = vmatpush.bf16.msrb.mxu2 %v8075_v7  ;;  %v7847_v57 = vor.u32 %v8747_v33, %v7846_v27  ;;  %v7976_v7 = vld [vmem:[#allocation20 + $0x118] sm:$0xf0]  ;;  %v8831_v33 = vld [vmem:[#allocation22 + $0xb4] sm:$0xf0] }
 0x595   : > { %5494 = vmatpush.bf16.msrb.mxu3 %v7895_v34  ;;  %5507 = vmatpush.bf16.msra.mxu0 %v8023_v29  ;;  %v7979_v44 = vor.u32 %v8777_v59, %v7976_v7  ;;  %v8815_v29 = vld [vmem:[#allocation22 + $0x34] sm:$0xf0]  ;;  %v8829_v7 = vld [vmem:[#allocation22 + $0xa4] sm:$0xf0] }
 0x596   : > { %v8119_v32 = vor.u32 %v8815_v29, %v8118_v4  ;;  %v8845_v4 = vld [vmem:[#allocation22 + $0x124] sm:$0xf0] }
 0x598   : > { %5518 = vmatpush.bf16.msrb.mxu1 %v7931_v6  ;;  %5531 = vmatpush.bf16.msrb.mxu2 %v8059_v11  ;;  %v7990_v6 = vld [vmem:[#allocation20 + $0x128] sm:$0xf] }
 0x599   : > { %5495 = vmatpush.bf16.msrb.mxu3 %v7879_v1  ;;  %5508 = vmatpush.bf16.msra.mxu0 %v8007_v9  ;;  %v7991_v23 = vor.u32 %v8783_v31, %v7990_v6  ;;  %v8182_v9 = vld [vmem:[#allocation22 + $0xb0] sm:$0xf]  ;;  %v8811_v31 = vld [vmem:[#allocation22 + $0x14] sm:$0xf0] }
 0x59a   : > { %v8183_v48 = vor.u32 %v8831_v33, %v8182_v9  ;;  %v8102_v6 = vld [vmem:[#allocation22 + $0x10] sm:$0xf]  ;;  %v10584_v9 = vld [vmem:[%s10711_s18] sm:$0xf]  ;;  %v8843_v33 = vld [vmem:[#allocation22 + $0x114] sm:$0xf0] }
 0x59b   : > { %v8103_v59 = vor.u32 %v8811_v31, %v8102_v6  ;;  %v8834_v6 = vld [vmem:[#allocation22 + $0xd4] sm:$0xf]  ;;  %v8200_v31 = vld [vmem:[#allocation22 + $0xd8] sm:$0xf0]  ;;  %s6278_s18 = sshll.u32 %s6274_s22, 4  ;;  %s6279_s18 = int_to_ptr.hbm [resolvable:$true] %s6278_s18 }
 0x59c   : > { %5519 = vmatpush.bf16.msrb.mxu1 %v7915_v5  ;;  %5532 = vmatpush.bf16.msrb.mxu2 %v8043_v50  ;;  %v8134_v50 = vld [vmem:[#allocation22 + $0x50] sm:$0xf]  ;;  %s9517_s19 = sshra.s32 %s6279_s18, 4  ;;  %s9518_s19 = int_to_ptr.hbm [resolvable:$true] %s9517_s19 }
 0x59d   : > { %5496 = vmatpush.bf16.msrb.mxu3 %v7863_v53  ;;  %5509 = vmatpush.bf16.msra.mxu0 %v7991_v23  ;;  %v8135_v1 = vor.u32 %v8819_v61, %v8134_v50  ;;  %v8190_v53 = vld [vmem:[#allocation22 + $0xc0] sm:$0xf]  ;;  %v8825_v50 = vld [vmem:[#allocation22 + $0x84] sm:$0xf0]  ;;  %v8246_v61 = vld [vmem:[#allocation22 + $0x130] sm:$0xf]  ;;  %p9524_p12 = scmp.lt.s32.totalorder %s9518_s19, %s10714_s21 }
 0x59e   : > { %v8191_v13 = vor.u32 %v8833_v24, %v8190_v53  ;;  %v8174_v23 = vld [vmem:[#allocation22 + $0xa0] sm:$0xf]  ;;  %v8310_v53 = vld [vmem:[#allocation22 + $0x1b0] sm:$0xf]  ;;  %v8818_v24 = vld [vmem:[#allocation22 + $0x54] sm:$0xf] }
 0x59f   : > { %v8175_v62 = vor.u32 %v8829_v7, %v8174_v23  ;;  %v8203_v7 = vor.u32 %v8834_v6, %v8200_v31  ;;  %v8808_v6 = vld [vmem:[#allocation22 + $0x4] sm:$0xf]  ;;  %v8096_v31 = vld [vmem:[#allocation22 + $0x8] sm:$0xf0] }
 0x5a0   : > { %5520 = vmatpush.bf16.msrb.mxu1 %v7899_v8  ;;  %5533 = vmatpush.bf16.msrb.mxu2 %v8027_v17  ;;  %v8839_v8 = vld [vmem:[#allocation22 + $0xf4] sm:$0xf0]  ;;  %v8127_v17 = vor.u32 %v8817_v45, %v8126_v35  ;;  %v8144_v35 = vld [vmem:[#allocation22 + $0x68] sm:$0xf0] }
 0x5a1   : > { %5497 = vmatpush.bf16.msrb.mxu3 %v7847_v57  ;;  %5510 = vmatpush.bf16.msra.mxu0 %v7975_v20  ;;  %v8215_v42 = vor.u32 %v8839_v8, %v8214_v10  ;;  %v8853_v57 = vld [vmem:[#allocation22 + $0x164] sm:$0xf0]  ;;  %v8822_v8 = vld [vmem:[#allocation22 + $0x74] sm:$0xf] }
 0x5a2   : > { %v8271_v60 = vor.u32 %v8853_v57, %v8270_v16  ;;  %v8302_v16 = vld [vmem:[#allocation22 + $0x1a0] sm:$0xf] }
 0x5a4   : > { %5521 = vmatpush.bf16.msrb.mxu1 %v7883_v19  ;;  %5534 = vmatpush.bf16.msrb.mxu2 %v8011_v55  ;;  %v8207_v19 = vor.u32 %v8837_v2, %v8206_v40  ;;  %v8813_v55 = vld [vmem:[#allocation22 + $0x24] sm:$0xf0]  ;;  %v8318_v40 = vld [vmem:[#allocation22 + $0x1c0] sm:$0xf] }
 0x5a5   : > { %v8111_v27 = vor.u32 %v8813_v55, %v8110_v41  ;;  %v8865_v2 = vld [vmem:[#allocation22 + $0x1c4] sm:$0xf0] }
 0x5a8   : > { %5522 = vmatpush.bf16.msrb.mxu1 %v7867_v12  ;;  %5535 = vmatpush.bf16.msrb.mxu2 %v7995_v43  ;;  %v8855_v12 = vld [vmem:[#allocation22 + $0x174] sm:$0xf0] }
 0x5a9   : > { %v8279_v47 = vor.u32 %v8855_v12, %v8278_v63  ;;  %v8136_v12 = vld [vmem:[#allocation22 + $0x58] sm:$0xf0] }
 0x5aa   : > { %v8139_v41 = vor.u32 %v8818_v24, %v8136_v12 }
 0x5ac   : > { %5523 = vmatpush.bf16.msrb.mxu1 %v7851_v15  ;;  %5536 = vmatpush.bf16.msrb.mxu2 %v7979_v44  ;;  %v8871_v15 = vld [vmem:[#allocation22 + $0x1f4] sm:$0xf0] }
 0x5ad   : > { %v8343_v43 = vor.u32 %v8871_v15, %v8342_v3  ;;  %v8851_v44 = vld [vmem:[#allocation22 + $0x154] sm:$0xf0]  ;;  %v8128_v3 = vld [vmem:[#allocation22 + $0x48] sm:$0xf0] }
 0x5ae   : > { %v8263_v20 = vor.u32 %v8851_v44, %v8262_v25  ;;  %v8222_v25 = vld [vmem:[#allocation22 + $0x100] sm:$0xf]  ;;  %v8841_v44 = vld [vmem:[#allocation22 + $0x104] sm:$0xf0] }
 0x60c   : > { %v5023_v26 = vpop.f32.mrf.mxu1 }
 0x60d   : > { %v5024_v5 = vadd.f32 %v5023_v26, %v4930_v46  ;;  %v8869_v46 = vld [vmem:[#allocation22 + $0x1e4] sm:$0xf0] }
 0x60e   : > { %v8335_v26 = vor.u32 %v8869_v46, %v8334_v38  ;;  %v8223_v38 = vor.u32 %v8841_v44, %v8222_v25  ;;  %v8859_v46 = vld [vmem:[#allocation22 + $0x194] sm:$0xf0]  ;;  %v8099_v44 = vor.u32 %v8808_v6, %v8096_v31 }
 0x60f   : > { %v5040_v11 = vmax.f32 %v5024_v5, 0.0  ;;  %v8094_v5 = vld [vmem:[#allocation22] sm:$0xf] }
 0x610   : > { %v8095_v52 = vor.u32 %v8809_v21, %v8094_v5  ;;  %v8120_v5 = vld [vmem:[#allocation22 + $0x38] sm:$0xf0] }
 0x611   : > { %v5042_v18 = vpack.c.bf16 %v5040_v11, %v5040_v11  ;;  %v8166_v11 = vld [vmem:[#allocation22 + $0x90] sm:$0xf] }
 0x612   : > { %v5036_v22 = vpop.f32.mrf.mxu2 }
 0x613   : > { %v5037_v34 = vadd.f32 %v5036_v22, %v4931_v49  ;;  %5446 = vmatmul.bf16.vlgmr.msra.gmra.mxu3 %v5042_v18  ;;  %5472 = vmatmul.bf16.vlgmr.msra.gmra.mxu1 %v5042_v18  ;;  %v8827_v49 = vld [vmem:[#allocation22 + $0x94] sm:$0xf0] }
 0x614   : > { %v5025_v39 = vpop.f32.mrf.mxu1  ;;  %5988 = vmatpush.bf16.msra.mxu3 %v8151_v54  ;;  %6014 = vmatpush.bf16.msra.mxu1 %v8279_v47  ;;  %v8254_v54 = vld [vmem:[#allocation22 + $0x140] sm:$0xf]  ;;  %v8867_v22 = vld [vmem:[#allocation22 + $0x1d4] sm:$0xf0]  ;;  %v8208_v47 = vld [vmem:[#allocation22 + $0xe8] sm:$0xf0] }
 0x615   : > { %v5041_v30 = vmax.f32 %v5037_v34, 0.0  ;;  %v8255_v34 = vor.u32 %v8849_v56, %v8254_v54  ;;  %v8327_v10 = vor.u32 %v8867_v22, %v8326_v58  ;;  %v8152_v39 = vld [vmem:[#allocation22 + $0x78] sm:$0xf0]  ;;  %v8854_v54 = vld [vmem:[#allocation22 + $0x174] sm:$0xf]  ;;  %v5111_v58 = vperm.slane %v10584_v9, 1 }
 0x616   : > { %v8280_v56 = vld [vmem:[#allocation22 + $0x178] sm:$0xf0] }
 0x617   : > { %v5043_v51 = vpack.c.bf16 %v5041_v30, %v5041_v30  ;;  %v8158_v30 = vld [vmem:[#allocation22 + $0x80] sm:$0xf]  ;;  %v8283_v22 = vor.u32 %v8854_v54, %v8280_v56 }
 0x618   : > { %5989 = vmatpush.bf16.msra.mxu3 %v8143_v14  ;;  %6015 = vmatpush.bf16.msra.mxu1 %v8271_v60  ;;  %v8155_v14 = vor.u32 %v8822_v8, %v8152_v39  ;;  %v8816_v60 = vld [vmem:[#allocation22 + $0x44] sm:$0xf] }
 0x619   : > { %5485 = vmatmul.bf16.vlgmr.msra.gmra.mxu2 %v5043_v51  ;;  %5459 = vmatmul.bf16.vlgmr.msrb.gmra.mxu0 %v5043_v51 }
 0x61a   : > { %v5038_v28 = vpop.f32.mrf.mxu2  ;;  %6001 = vmatpush.bf16.msrb.mxu0 %v8215_v42  ;;  %6027 = vmatpush.bf16.msra.mxu2 %v8343_v43  ;;  %v8159_v42 = vor.u32 %v8825_v50, %v8158_v30  ;;  %v8131_v43 = vor.u32 %v8816_v60, %v8128_v3  ;;  %v8812_v30 = vld [vmem:[#allocation22 + $0x24] sm:$0xf]  ;;  %v8112_v50 = vld [vmem:[#allocation22 + $0x28] sm:$0xf0] }
 0x61b   : > { %v8319_v28 = vor.u32 %v8865_v2, %v8318_v40  ;;  %v8184_v40 = vld [vmem:[#allocation22 + $0xb8] sm:$0xf0]  ;;  %v8852_v2 = vld [vmem:[#allocation22 + $0x164] sm:$0xf] }
 0x61c   : > { %5990 = vmatpush.bf16.msra.mxu3 %v8135_v1  ;;  %6016 = vmatpush.bf16.msra.mxu1 %v8263_v20  ;;  %v9620_v20 = vmov 4.0  }
 0x61d   : > { %9077 = vrcp.f32 %v9620_v20  ;;  %v8848_v20 = vld [vmem:[#allocation22 + $0x144] sm:$0xf] }
 0x61e   : > { %6002 = vmatpush.bf16.msrb.mxu0 %v8207_v19  ;;  %6028 = vmatpush.bf16.msra.mxu2 %v8335_v26  ;;  %v8820_v19 = vld [vmem:[#allocation22 + $0x64] sm:$0xf]  ;;  %v8814_v26 = vld [vmem:[#allocation22 + $0x34] sm:$0xf] }
 0x61f   : > { %v8147_v45 = vor.u32 %v8820_v19, %v8144_v35 }
 0x620   : > { %5991 = vmatpush.bf16.msra.mxu3 %v8127_v17  ;;  %6017 = vmatpush.bf16.msra.mxu1 %v8255_v34  ;;  %v8216_v17 = vld [vmem:[#allocation22 + $0xf8] sm:$0xf0]  ;;  %v8286_v34 = vld [vmem:[#allocation22 + $0x180] sm:$0xf] }
 0x621   : > { %v8219_v36 = vor.u32 %v8838_v37, %v8216_v17  ;;  %v8870_v37 = vld [vmem:[#allocation22 + $0x1f4] sm:$0xf]  ;;  %v8344_v17 = vld [vmem:[#allocation22 + $0x1f8] sm:$0xf0] }
 0x622   : > { %6003 = vmatpush.bf16.msrb.mxu0 %v8199_v0  ;;  %6029 = vmatpush.bf16.msra.mxu2 %v8327_v10  ;;  %v8238_v0 = vld [vmem:[#allocation22 + $0x120] sm:$0xf]  ;;  %v8857_v10 = vld [vmem:[#allocation22 + $0x184] sm:$0xf0] }
 0x623   : > { %5498 = vmatmul.bf16.vlgmr.msrb.gmra.mxu3 %v5042_v18  ;;  %5524 = vmatmul.bf16.vlgmr.msrb.gmra.mxu1 %v5042_v18  ;;  %v8167_v18 = vor.u32 %v8827_v49, %v8166_v11  ;;  %v8239_v29 = vor.u32 %v8845_v4, %v8238_v0  ;;  %v8832_v11 = vld [vmem:[#allocation22 + $0xc4] sm:$0xf]  ;;  %v8192_v49 = vld [vmem:[#allocation22 + $0xc8] sm:$0xf0]  ;;  %v8347_v0 = vor.u32 %v8870_v37, %v8344_v17  ;;  %v8810_v4 = vld [vmem:[#allocation22 + $0x14] sm:$0xf] }
 0x624   : > { %5992 = vmatpush.bf16.msra.mxu3 %v8119_v32  ;;  %v8863_v32 = vld [vmem:[#allocation22 + $0x1b4] sm:$0xf0]  ;;  %v8844_v37 = vld [vmem:[#allocation22 + $0x124] sm:$0xf]  ;;  %v8240_v17 = vld [vmem:[#allocation22 + $0x128] sm:$0xf0] }
 0x625   : > { %v8311_v63 = vor.u32 %v8863_v32, %v8310_v53  ;;  %v8828_v53 = vld [vmem:[#allocation22 + $0xa4] sm:$0xf] }
 0x626   : > { %6004 = vmatpush.bf16.msrb.mxu0 %v8191_v13  ;;  %6030 = vmatpush.bf16.msra.mxu2 %v8319_v28  ;;  %v8836_v13 = vld [vmem:[#allocation22 + $0xe4] sm:$0xf]  ;;  %v10588_v28 = vpop.eup %9077 }
 0x627   : > { %v8211_v55 = vor.u32 %v8836_v13, %v8208_v47  ;;  %v8176_v13 = vld [vmem:[#allocation22 + $0xa8] sm:$0xf0]  ;;  %v8850_v47 = vld [vmem:[#allocation22 + $0x154] sm:$0xf]  ;;  %vm5588_vm3 = vweird.f32 %v10588_v28 }
 0x628   : > { %5993 = vmatpush.bf16.msra.mxu3 %v8111_v27  ;;  %v8230_v27 = vld [vmem:[#allocation22 + $0x110] sm:$0xf] }
 0x629   : > { %5537 = vmatmul.bf16.vlgmr.msrb.gmra.mxu2 %v5043_v51  ;;  %5511 = vmatmul.bf16.vlgmr.msra.gmra.mxu0 %v5043_v51  ;;  %v8847_v51 = vld [vmem:[#allocation22 + $0x134] sm:$0xf0]  ;;  %v8231_v57 = vor.u32 %v8843_v33, %v8230_v27  ;;  %v8264_v27 = vld [vmem:[#allocation22 + $0x158] sm:$0xf0]  ;;  %v8868_v33 = vld [vmem:[#allocation22 + $0x1e4] sm:$0xf] }
 0x62a   : > { %6005 = vmatpush.bf16.msrb.mxu0 %v8183_v48  ;;  %v8247_v1 = vor.u32 %v8847_v51, %v8246_v61  ;;  %6031 = vmatpush.bf16.msra.mxu2 %v8311_v63  ;;  %v8861_v48 = vld [vmem:[#allocation22 + $0x1a4] sm:$0xf0]  ;;  %v8830_v61 = vld [vmem:[#allocation22 + $0xb4] sm:$0xf]  ;;  %v8115_v51 = vor.u32 %v8812_v30, %v8112_v50  ;;  %v5584_v63 = vmul.f32 4.0, %v10588_v28  ;;  %v8267_v60 = vor.u32 %v8850_v47, %v8264_v27 }
 0x62b   : > { %v8303_v15 = vor.u32 %v8861_v48, %v8302_v16  ;;  %v8187_v35 = vor.u32 %v8830_v61, %v8184_v40  ;;  %v8336_v16 = vld [vmem:[#allocation22 + $0x1e8] sm:$0xf0]  ;;  %v8864_v30 = vld [vmem:[#allocation22 + $0x1c4] sm:$0xf]  ;;  %v8842_v47 = vld [vmem:[#allocation22 + $0x114] sm:$0xf] }
 0x62c   : > { %5994 = vmatpush.bf16.msra.mxu3 %v8103_v59  ;;  %6018 = vmatpush.bf16.msra.mxu1 %v8247_v1  ;;  %v5110_v59 = vperm.slane %v10584_v9, 0  ;;  %v8272_v1 = vld [vmem:[#allocation22 + $0x168] sm:$0xf0]  ;;  %v8339_v3 = vor.u32 %v8868_v33, %v8336_v16  ;;  %v8860_v27 = vld [vmem:[#allocation22 + $0x1a4] sm:$0xf] }
 0x62d   : > { %v8304_v33 = vld [vmem:[#allocation22 + $0x1a8] sm:$0xf0] }
 0x62e   : > { %6006 = vmatpush.bf16.msrb.mxu0 %v8175_v62  ;;  %v8294_v62 = vld [vmem:[#allocation22 + $0x190] sm:$0xf]  ;;  %6032 = vmatpush.bf16.msra.mxu2 %v8303_v15  ;;  %v8307_v31 = vor.u32 %v8860_v27, %v8304_v33  ;;  %v8872_v27 = vld [vmem:[#allocation23] sm:$0xff] }
 0x62f   : > { %v8295_v21 = vor.u32 %v8859_v46, %v8294_v62  ;;  %v8168_v62 = vld [vmem:[#allocation22 + $0x98] sm:$0xf0]  ;;  %v8884_v33 = vld [vmem:[#allocation23 + $0x60] sm:$0xff] }
 0x630   : > { %5995 = vmatpush.bf16.msra.mxu3 %v8095_v52  ;;  %6019 = vmatpush.bf16.msra.mxu1 %v8239_v29  ;;  %v8123_v52 = vor.u32 %v8814_v26, %v8120_v5  ;;  %v8104_v29 = vld [vmem:[#allocation22 + $0x18] sm:$0xf0]  ;;  %v8256_v26 = vld [vmem:[#allocation22 + $0x148] sm:$0xf0]  ;;  %v8866_v5 = vld [vmem:[#allocation22 + $0x1d4] sm:$0xf] }
 0x631   : > { %v8107_v12 = vor.u32 %v8810_v4, %v8104_v29  ;;  %v8243_v29 = vor.u32 %v8844_v37, %v8240_v17 }
 0x632   : > { %6007 = vmatpush.bf16.msrb.mxu0 %v8167_v18  ;;  %v8195_v18 = vor.u32 %v8832_v11, %v8192_v49  ;;  %6033 = vmatpush.bf16.msra.mxu2 %v8295_v21  ;;  %v8328_v21 = vld [vmem:[#allocation22 + $0x1d8] sm:$0xf0]  ;;  %v8259_v49 = vor.u32 %v8848_v20, %v8256_v26 }
 0x633   : > { %v8331_v56 = vor.u32 %v8866_v5, %v8328_v21 }
 0x634   : > { %6040 = vmatpush.bf16.msrb.mxu3 %v8155_v14  ;;  %6020 = vmatpush.bf16.msra.mxu1 %v8231_v57  ;;  %v8287_v14 = vor.u32 %v8857_v10, %v8286_v34 }
 0x636   : > { %6008 = vmatpush.bf16.msrb.mxu0 %v8159_v42  ;;  %6034 = vmatpush.bf16.msra.mxu2 %v8287_v14  ;;  %v8248_v14 = vld [vmem:[#allocation22 + $0x138] sm:$0xf0] }
 0x638   : > { %6041 = vmatpush.bf16.msrb.mxu3 %v8147_v45  ;;  %6021 = vmatpush.bf16.msra.mxu1 %v8223_v38  ;;  %v8275_v45 = vor.u32 %v8852_v2, %v8272_v1 }
 0x63a   : > { %6053 = vmatpush.bf16.msra.mxu0 %v8219_v36  ;;  %6079 = vmatpush.bf16.msrb.mxu2 %v8347_v0  ;;  %v5113_v0 = vperm.slane %v10584_v9, 3 }
 0x63c   : > { %6042 = vmatpush.bf16.msrb.mxu3 %v8139_v41  ;;  %6066 = vmatpush.bf16.msrb.mxu1 %v8283_v22  ;;  %v8160_v22 = vld [vmem:[#allocation22 + $0x88] sm:$0xf0] }
 0x63e   : > { %6054 = vmatpush.bf16.msra.mxu0 %v8211_v55  ;;  %v8179_v55 = vor.u32 %v8828_v53, %v8176_v13  ;;  %6080 = vmatpush.bf16.msrb.mxu2 %v8339_v3  ;;  %v8862_v53 = vld [vmem:[#allocation22 + $0x1b4] sm:$0xf] }
 0x640   : > { %6043 = vmatpush.bf16.msrb.mxu3 %v8131_v43  ;;  %6067 = vmatpush.bf16.msrb.mxu1 %v8275_v45 }
 0x642   : > { %6055 = vmatpush.bf16.msra.mxu0 %v8203_v7  ;;  %v5585_v7 = vsub.f32 1.0, %v5584_v63  ;;  %6081 = vmatpush.bf16.msrb.mxu2 %v8331_v56 }
 0x644   : > { %6044 = vmatpush.bf16.msrb.mxu3 %v8123_v52  ;;  %6068 = vmatpush.bf16.msrb.mxu1 %v8267_v60  ;;  %v5586_v34 = vmul.f32 %v10588_v28, %v5585_v7 }
 0x646   : > { %6056 = vmatpush.bf16.msra.mxu0 %v8195_v18  ;;  %v5112_v18 = vperm.slane %v10584_v9, 2 }
 0x648   : > { %6045 = vmatpush.bf16.msrb.mxu3 %v8115_v51  ;;  %6069 = vmatpush.bf16.msrb.mxu1 %v8259_v49  ;;  %v8320_v51 = vld [vmem:[#allocation22 + $0x1c8] sm:$0xf0] }
 0x649   : > { %v8323_v2 = vor.u32 %v8864_v30, %v8320_v51  ;;  %v8879_v51 = vld [vmem:[#allocation23 + $0x38] sm:$0xff] }
 0x64a   : > { %6057 = vmatpush.bf16.msra.mxu0 %v8187_v35 }
 0x64b   : > { %6082 = vmatpush.bf16.msrb.mxu2 %v8323_v2 }
 0x64c   : > { %6046 = vmatpush.bf16.msrb.mxu3 %v8107_v12 }
 0x64e   : > { %6058 = vmatpush.bf16.msra.mxu0 %v8179_v55 }
 0x650   : > { %6047 = vmatpush.bf16.msrb.mxu3 %v8099_v44  ;;  %v8858_v44 = vld [vmem:[#allocation22 + $0x194] sm:$0xf] }
 0x690   : > { %v5473_v23 = vpop.f32.mrf.mxu1 }
 0x691   : > { %v5474_v32 = vadd.f32 %v5473_v23, %v5111_v58  ;;  %v8826_v23 = vld [vmem:[#allocation22 + $0x94] sm:$0xf]  ;;  %v8824_v58 = vld [vmem:[#allocation22 + $0x84] sm:$0xf] }
 0x692   : > { %v8171_v46 = vor.u32 %v8826_v23, %v8168_v62  ;;  %v8840_v23 = vld [vmem:[#allocation22 + $0x104] sm:$0xf]  ;;  %v8296_v62 = vld [vmem:[#allocation22 + $0x198] sm:$0xf0] }
 0x693   : > { %v8299_v49 = vor.u32 %v8858_v44, %v8296_v62 }
 0x694   : > { %6059 = vmatpush.bf16.msra.mxu0 %v8171_v46 }
 0x696   : > { %v5447_v8 = vpop.f32.mrf.mxu3  ;;  %v5460_v39 = vpop.f32.mrf.mxu0 }
 0x697   : > { %v5448_v42 = vadd.f32 %v5447_v8, %v5110_v59  ;;  %v8163_v8 = vor.u32 %v8824_v58, %v8160_v22  ;;  %v8856_v22 = vld [vmem:[#allocation22 + $0x184] sm:$0xf] }
 0x698   : > { %v5475_v19 = vpop.f32.mrf.mxu1 }
 0x699   : > { %v5461_v36 = vadd.f32 %v5460_v39, %v5448_v42  ;;  %v8846_v39 = vld [vmem:[#allocation22 + $0x134] sm:$0xf]  ;;  %6060 = vmatpush.bf16.msra.mxu0 %v8163_v8 }
 0x69a   : > { %v8251_v42 = vor.u32 %v8846_v39, %v8248_v14 }
 0x69b   : > { %v5542_v24 = vmax.f32 %v5461_v36, 0.0  ;;  %v5587_v36 = vadd.f32 %v10588_v28, %v5586_v34  ;;  %v8288_v34 = vld [vmem:[#allocation22 + $0x188] sm:$0xf0] }
 0x69c   : > { %v5486_v41 = vpop.f32.mrf.mxu2  ;;  %6070 = vmatpush.bf16.msrb.mxu1 %v8251_v42  ;;  %v8291_v30 = vor.u32 %v8856_v22, %v8288_v34 }
 0x69d   : > { %v5546_v57 = vpack.c.bf16 %v5542_v24, %v5542_v24  ;;  %v5487_v48 = vadd.f32 %v5486_v41, %v5474_v32  ;;  %v8312_v32 = vld [vmem:[#allocation22 + $0x1b8] sm:$0xf0] }
 0x69e   : > { %v5449_v15 = vpop.f32.mrf.mxu3  ;;  %v5462_v43 = vpop.f32.mrf.mxu0  ;;  %v8315_v13 = vor.u32 %v8862_v53, %v8312_v32  ;;  %v8232_v41 = vld [vmem:[#allocation22 + $0x118] sm:$0xf0]  ;;  %v8878_v53 = vld [vmem:[#allocation23 + $0x30] sm:$0xff]  ;;  %v8877_v32 = vld [vmem:[#allocation23 + $0x28] sm:$0xff] }
 0x69f   : > { %v5550_v59 = vunpack.c.l.bf16 %v5546_v57  ;;  %v5543_v25 = vmax.f32 %v5487_v48, 0.0  ;;  %v5589_v57 = vsel %vm5588_vm3, %v10588_v28, %v5587_v36  ;;  %v8235_v3 = vor.u32 %v8842_v47, %v8232_v41  ;;  %v8886_v47 = vld [vmem:[#allocation23 + $0x70] sm:$0xff]  ;;  %v8873_v41 = vld [vmem:[#allocation23 + $0x8] sm:$0xff] }
 0x6a0   : > { %v5525_v38 = vpop.f32.mrf.mxu1  ;;  %6071 = vmatpush.bf16.msrb.mxu1 %v8243_v29  ;;  %6083 = vmatpush.bf16.msrb.mxu2 %v8315_v13  ;;  %v8874_v13 = vld [vmem:[#allocation23 + $0x10] sm:$0xff] }
 0x6a1   : > { %v5555_v52 = vsel %vm5554_vm2, %v5550_v59, 0.0  ;;  %v5547_v11 = vpack.c.bf16 %v5543_v25, %v5543_v25  ;;  %v5526_v48 = vadd.f32 %v5525_v38, %v5113_v0  ;;  %v8224_v59 = vld [vmem:[#allocation22 + $0x108] sm:$0xf0] }
 0x6a2   : > { %v5556_v54 = vrot.slane %v5555_v52, 4  ;;  %v8227_v21 = vor.u32 %v8840_v23, %v8224_v59 }
 0x6a3   : > { %v5551_v10 = vunpack.c.l.bf16 %v5547_v11 }
 0x6a4   : > { %v5557_v50 = vadd.f32 %v5556_v54, %v5555_v52  ;;  %v5488_v61 = vpop.f32.mrf.mxu2  ;;  %6072 = vmatpush.bf16.msrb.mxu1 %v8235_v3  ;;  %6084 = vmatpush.bf16.msrb.mxu2 %v8307_v31  ;;  %v5662_v3 = vld [vmem:[%s10712_s13] sm:$0x3]  ;;  %s9519_s13 = scalar_lea.hbm %s9518_s19, 1 }
 0x6a5   : > { %v5562_v40 = vsel %vm5554_vm2, %v5551_v10, 0.0  ;;  %v5984_v31 = vperm.slane %v5662_v3, 0  ;;  %p9520_p1 = scmp.ne.s32.totalorder %s9518_s19, %s9519_s13  ;;  %p9525_p8 = scmp.lt.s32.totalorder %s9523_s15, %s9519_s13 }
 0x6a6   : > { %v5558_v1 = vrot.slane %v5557_v50, 2  ;;  %v5563_v19 = vrot.slane %v5562_v40, 4  ;;  %v5499_v35 = vpop.f32.mrf.mxu3  ;;  %v5512_v45 = vpop.f32.mrf.mxu0 }
 0x6a7   : > { %v5500_v4 = vadd.f32 %v5499_v35, %v5112_v18  ;;  %p9521_p3 = pnand %p9520_p1, %p9866_p13  ;;  %p9526_p7 = por %p9525_p8, %p9524_p12 }
 0x6a8   : > { %v5559_v24 = vadd.f32 %v5558_v1, %v5557_v50  ;;  %v5564_v63 = vadd.f32 %v5563_v19, %v5562_v40  ;;  %v5527_v12 = vpop.f32.mrf.mxu1  ;;  %6073 = vmatpush.bf16.msrb.mxu1 %v8227_v21  ;;  %6085 = vmatpush.bf16.msrb.mxu2 %v8299_v49  ;;  %v5985_v21 = vperm.slane %v5662_v3, 1 }
 0x6a9   : > { %v5513_v55 = vadd.f32 %v5512_v45, %v5500_v4  ;;  %v8887_v12 = vld [vmem:[#allocation23 + $0x78] sm:$0xff]  ;;  %p9522_p5 = pneg %p9521_p3 }
 0x6aa   : > { %v5560_v16 = vrot.slane %v5559_v24, 1  ;;  %v5565_v9 = vrot.slane %v5564_v63, 2 }
 0x6ab   : > { %v5544_v60 = vmax.f32 %v5513_v55, 0.0  ;;  %v8885_v55 = vld [vmem:[#allocation23 + $0x68] sm:$0xff]  ;;  %p9527_p9 = pnand %p9526_p7, %p9522_p5 }
 0x6ac   : > { %v5561_v15 = vadd.f32 %v5560_v16, %v5559_v24  ;;  %v5566_v43 = vadd.f32 %v5565_v9, %v5564_v63  ;;  %v5538_v6 = vpop.f32.mrf.mxu2  ;;  %6086 = vmatpush.bf16.msrb.mxu2 %v8291_v30  ;;  %v8876_v24 = vld [vmem:[#allocation23 + $0x20] sm:$0xff]  ;;  %v8875_v63 = vld [vmem:[#allocation23 + $0x18] sm:$0xff] }
 0x6ad   : > { %v5548_v7 = vpack.c.bf16 %v5544_v60, %v5544_v60  ;;  %v5539_v25 = vadd.f32 %v5538_v6, %v5526_v48  ;;  %v8883_v16 = vld [vmem:[#allocation23 + $0x58] sm:$0xff]  ;;  %v8881_v60 = vld [vmem:[#allocation23 + $0x48] sm:$0xff]  ;;  %v8880_v6 = vld [vmem:[#allocation23 + $0x40] sm:$0xff] }
 0x6ae   : > { %v5590_v20 = vmul.f32 %v5589_v57, %v5561_v15  ;;  %v5567_v46 = vrot.slane %v5566_v43, 1  ;;  %v5501_v26 = vpop.f32.mrf.mxu3  ;;  %v5514_v5 = vpop.f32.mrf.mxu0  ;;  %v6128_v30 = vld [vmem:[%s10713_s5] sm:$0x1] }
 0x6af   : > { %v5552_v28 = vunpack.c.l.bf16 %v5548_v7  ;;  %v5545_v38 = vmax.f32 %v5539_v25, 0.0 }
 0x6b0   : > { %v5594_v52 = vpack.c.bf16 %v5590_v20, %v5590_v20  ;;  %v5568_v11 = vadd.f32 %v5567_v46, %v5566_v43 }
 0x6b1   : > { %v5569_v54 = vsel %vm5554_vm2, %v5552_v28, 0.0  ;;  %v5549_v18 = vpack.c.bf16 %v5545_v38, %v5545_v38 }
 0x6b2   : > { %v5591_v56 = vmul.f32 %v5589_v57, %v5568_v11  ;;  %v5570_v58 = vrot.slane %v5569_v54, 4  ;;  %5996 = vmatmul.bf16.vlgmr.msra.gmra.mxu3 %v5594_v52 }
 0x6b3   : > { %v5553_v10 = vunpack.c.l.bf16 %v5549_v18  ;;  %6225 = vmatpush.bf16.msra.mxu3 %v8879_v51 }
 0x6b4   : > { %v5595_v8 = vpack.c.bf16 %v5591_v56, %v5591_v56  ;;  %v5571_v39 = vadd.f32 %v5570_v58, %v5569_v54  ;;  %v5540_v14 = vpop.f32.mrf.mxu2 }
 0x6b5   : > { %v5576_v50 = vsel %vm5554_vm2, %v5553_v10, 0.0 }
 0x6b6   : > { %v5572_v61 = vrot.slane %v5571_v39, 2  ;;  %v5577_v42 = vrot.slane %v5576_v50, 4  ;;  %6009 = vmatmul.bf16.vlgmr.msrb.gmra.mxu0 %v5595_v8 }
 0x6b7   : > { %6226 = vmatpush.bf16.msra.mxu3 %v8878_v53  ;;  %6238 = vmatpush.bf16.msrb.mxu0 %v8887_v12 }
 0x6b8   : > { %v5573_v40 = vadd.f32 %v5572_v61, %v5571_v39  ;;  %v5578_v2 = vadd.f32 %v5577_v42, %v5576_v50 }
 0x6ba   : > { %v5574_v1 = vrot.slane %v5573_v40, 1  ;;  %v5579_v19 = vrot.slane %v5578_v2, 2 }
 0x6bb   : > { %6227 = vmatpush.bf16.msra.mxu3 %v8877_v32  ;;  %6239 = vmatpush.bf16.msrb.mxu0 %v8886_v47 }
 0x6bc   : > { %v5575_v35 = vadd.f32 %v5574_v1, %v5573_v40  ;;  %v5580_v45 = vadd.f32 %v5579_v19, %v5578_v2 }
 0x6be   : > { %v5592_v37 = vmul.f32 %v5589_v57, %v5575_v35  ;;  %v5581_v17 = vrot.slane %v5580_v45, 1 }
 0x6bf   : > { %6228 = vmatpush.bf16.msra.mxu3 %v8876_v24  ;;  %6240 = vmatpush.bf16.msrb.mxu0 %v8885_v55 }
 0x6c0   : > { %v5596_v36 = vpack.c.bf16 %v5592_v37, %v5592_v37  ;;  %v5582_v0 = vadd.f32 %v5581_v17, %v5580_v45 }
 0x6c2   : > { %v5593_v4 = vmul.f32 %v5589_v57, %v5582_v0  ;;  %6022 = vmatmul.bf16.vlgmr.msra.gmra.mxu1 %v5596_v36  ;;  %6048 = vmatmul.bf16.vlgmr.msrb.gmra.mxu3 %v5594_v52  ;;  %v8882_v57 = vld [vmem:[#allocation23 + $0x50] sm:$0xff] }
 0x6c3   : > { %6229 = vmatpush.bf16.msra.mxu3 %v8875_v63  ;;  %6241 = vmatpush.bf16.msrb.mxu0 %v8884_v33 }
 0x6c4   : > { %v5597_v29 = vpack.c.bf16 %v5593_v4, %v5593_v4 }
 0x6c6   : > { %6035 = vmatmul.bf16.vlgmr.msra.gmra.mxu2 %v5597_v29  ;;  %6061 = vmatmul.bf16.vlgmr.msra.gmra.mxu0 %v5595_v8 }
 0x6c7   : > { %6230 = vmatpush.bf16.msra.mxu3 %v8874_v13  ;;  %6242 = vmatpush.bf16.msrb.mxu0 %v8883_v16 }
 0x6cb   : > { %6231 = vmatpush.bf16.msra.mxu3 %v8873_v41  ;;  %6243 = vmatpush.bf16.msrb.mxu0 %v8882_v57 }
 0x6cf   : > { %6232 = vmatpush.bf16.msra.mxu3 %v8872_v27  ;;  %6244 = vmatpush.bf16.msrb.mxu0 %v8881_v60 }
 0x6d2   : > { %6074 = vmatmul.bf16.vlgmr.msrb.gmra.mxu1 %v5596_v36 }
 0x6d3   : > { %6245 = vmatpush.bf16.msrb.mxu0 %v8880_v6 }
 0x6d6   : > { %6087 = vmatmul.bf16.vlgmr.msrb.gmra.mxu2 %v5597_v29 }
 0x733   : > { %v6010_v9 = vpop.f32.mrf.mxu0 }
 0x735   : > { %v5997_v48 = vpop.f32.mrf.mxu3 }
 0x736   : > { %v5998_v59 = vadd.f32 %v5997_v48, %v5984_v31 }
 0x738   : > { %v6011_v44 = vadd.f32 %v6010_v9, %v5998_v59 }
 0x73b   : > { %v6012_v15 = vpop.f32.mrf.mxu0 }
 0x73d   : > { %v5999_v43 = vpop.f32.mrf.mxu3 }
 0x73f   : > { %v6023_v23 = vpop.f32.mrf.mxu1 }
 0x740   : > { %v6024_v20 = vadd.f32 %v6023_v23, %v6011_v44 }
 0x743   : > { %v6062_v7 = vpop.f32.mrf.mxu0 }
 0x745   : > { %v6049_v25 = vpop.f32.mrf.mxu3 }
 0x746   : > { %v6050_v54 = vadd.f32 %v6049_v25, %v5985_v21 }
 0x747   : > { %v6025_v62 = vpop.f32.mrf.mxu1 }
 0x748   : > { %v6063_v18 = vadd.f32 %v6062_v7, %v6050_v54 }
 0x749   : > { %v6036_v46 = vpop.f32.mrf.mxu2 }
 0x74a   : > { %v6037_v26 = vadd.f32 %v6036_v46, %v6024_v20 }
 0x74b   : > { %v6064_v5 = vpop.f32.mrf.mxu0 }
 0x74c   : > { %v6092_v28 = vmax.f32 %v6037_v26, 0.0 }
 0x74d   : > { %v6051_v38 = vpop.f32.mrf.mxu3 }
 0x74e   : > { %v6094_v52 = vpack.c.bf16 %v6092_v28, %v6092_v28 }
 0x74f   : > { %v6075_v11 = vpop.f32.mrf.mxu1 }
 0x750   : > { %6233 = vmatmul.bf16.vlgmr.msra.gmra.mxu3 %v6094_v52  ;;  %v6076_v58 = vadd.f32 %v6075_v11, %v6063_v18 }
 0x751   : > { %v6038_v49 = vpop.f32.mrf.mxu2 }
 0x757   : > { %v6077_v56 = vpop.f32.mrf.mxu1 }
 0x759   : > { %v6088_v22 = vpop.f32.mrf.mxu2 }
 0x75a   : > { %v6089_v34 = vadd.f32 %v6088_v22, %v6076_v58 }
 0x75c   : > { %v6093_v10 = vmax.f32 %v6089_v34, 0.0 }
 0x75e   : > { %v6095_v8 = vpack.c.bf16 %v6093_v10, %v6093_v10 }
 0x760   : > { %6246 = vmatmul.bf16.vlgmr.msrb.gmra.mxu0 %v6095_v8 }
 0x761   : > { %v6090_v39 = vpop.f32.mrf.mxu2 }
 0x7d3   : > { %v6234_v14 = vpop.f32.mrf.mxu3 }
 0x7d4   : > { %v6235_v61 = vadd.f32 %v6234_v14, %v6128_v30 }
 0x7db   : > { %v6236_v50 = vpop.f32.mrf.mxu3 }
 0x7dd   : > { %v6247_v42 = vpop.f32.mrf.mxu0 }
 0x7de   : > { %v6248_v51 = vadd.f32 %v6247_v42, %v6235_v61 }
 0x7e0   : > { %v6252_v40 = vsel %vm6251_vm4, %v6248_v51, -inf }
 0x7e1   : > { %6253 = vmax.xlane.f32.xlu0 %v6252_v40 }
 0x7e5   : > { %v6249_v2 = vpop.f32.mrf.mxu0 }
 0x854   : > { %v6254_v1 = vpop.xlane.xlu0 %6253 }
 0x855   : > { %v6255_v19 = vsub.f32 %v6248_v51, %v6254_v1 }
 0x857   : > { %v6256_v35 = vmul.f32 1.442695, %v6255_v19 }
 0x859   : > { %9079 = vpow2.f32 %v6256_v35 }
 0x85f   : > { %v9080_v45 = vpop.eup %9079 }
 0x860   : > { %v6258_v37 = vsel %vm6251_vm4, %v9080_v45, 0.0 }
 0x861   : > { %6259 = vadd.xlane.f32.xlu0 %v6258_v37 }
 0x8d4   : > { %v6260_v17 = vpop.xlane.xlu0 %6259 }
 0x8d5   : > { %9081 = vlog2.f32 %v6260_v17 }
 0x8db   : > { %v9082_v36 = vpop.eup %9081 }
 0x8dc   : > { %v6262_v0 = vmul.f32 0.6931472, %v9082_v36 }
 0x8de   : > { %v6263_v4 = vsub.f32 %v6255_v19, %v6262_v0 }
 0x8e0   : > { %6264 = vst [vmem:[%s803_s0] sm:$0x1] %v6263_v4 }
 0x8e1   : > { %9530 = shalt.err (!%p9527_p9)
}
 0x8e2   : > { %8942 = dma.vmem_to_hbm [thread:$0]  (%p9866_p13), %s6277_s26, 16, %s6279_s18, %s6266_s3  }
 0x8e3 PF: > { %s6290_s2 = sand.u32 1, %s9585_s27   ;;  %p10715_p10 = scmp.ge.s32.totalorder %s9597_s30, 2 }
 0x8e4   : > { %s6291_s6 = scalar_lea.sflag [#allocation4], %s6290_s2 }
 0x8e5   : > { %p8989_p11 = pnand %p10715_p10, %p9871_p4 }
 0x8e7   : > { %p8990_p0 = pneg %p8989_p11 }
 0x8e9   : > { %9580 = dma.done.wait (%p8990_p0), %s6291_s6, 16  }
 0x8ea   : > { %9582 = vsyncadd (%p8990_p0), %s6291_s6, 4294967280  ;;  %p38_p2 = scmp.ge.s32.totalorder %s9846_s23, 4   ;;  %s10716_s27 = smov %s9589_s28 }
 0x8eb   : > { %s10717_s28 = smov %s9593_s29  ;;  %s10718_s29 = smov %s9858_s11 }
 0x8ec   : > { %s10719_s30 = smov %s9846_s23  ;;  %40 = sbr.rel (!%p38_p2) target bundleno = 25 (0x19), region = 213 }
 0x8f1   :  { %6296 = vsyncpa [#allocation3], 1 }
 0x8f2   :  { %6298 = vsyncpa [#allocation3 + $0x1], 1 }
 0x8f3   :  { %6299 = vsyncpa [#allocation6], 1 }
 0x8f4   :  { %6300 = vsyncpa [#allocation9], 1 }
 0x8f5   :  { %6301 = vsyncpa [#allocation12], 1 }
 0x8f6   :  { %6302 = vsyncpa [#allocation15], 1 }
 0x8f7   :  { %6303 = vsyncpa [#allocation18], 1 }
 0x8f8   :  { %6304 = vsyncpa [#allocation21], 1 }
 0x8f9   :  { %6305 = vsyncpa [#allocation24], 1 }
 0x8fa   :  { %6306 = vsyncpa [#allocation4], 1 }
 0x8fb   :  { %6308 = vsyncpa [#allocation4 + $0x1], 1 }

</bundles_post_ra>
